<compile_context>
chip_gen: v7x
topology: tpu7x:2x2x1
jax: 0.10.0
libtpu: 0.0.40
codegen_flags: <defaults>
</compile_context>

<pallas_src>
import functools

import jax
import jax.numpy as jnp
from jax.experimental import pallas as pl
from jax.experimental.pallas import tpu as pltpu


# ----------------------------------------------------------------------------
# helpers
# ----------------------------------------------------------------------------
def _pick_tile(m, prefs=(256, 128, 64, 32, 16, 8)):
    """Largest preferred row-tile that divides m (multiple of 8 sublanes)."""
    for t in prefs:
        if t <= m and m % t == 0:
            return t
    return m


# ----------------------------------------------------------------------------
# Pallas kernels
# ----------------------------------------------------------------------------
def _pw_relu_kernel(x_ref, w_ref, b_ref, o_ref):
    """1x1 conv (matmul over channels) + folded-BN bias + ReLU."""
    y = jnp.dot(x_ref[...], w_ref[...], preferred_element_type=jnp.float32)
    y = jnp.maximum(y + b_ref[...], 0.0)
    o_ref[...] = y.astype(o_ref.dtype)


def pointwise_relu(x2d, w, b, out_dtype=jnp.float32):
    """x2d: [M, Cin] @ w: [Cin, Cout] (+bias, ReLU), tiled over rows."""
    m, cin = x2d.shape
    cout = w.shape[1]
    tm = _pick_tile(m)
    return pl.pallas_call(
        _pw_relu_kernel,
        grid=(m // tm,),
        in_specs=[
            pl.BlockSpec((tm, cin), lambda i: (i, 0)),
            pl.BlockSpec((cin, cout), lambda i: (0, 0)),
            pl.BlockSpec((1, cout), lambda i: (0, 0)),
        ],
        out_specs=pl.BlockSpec((tm, cout), lambda i: (i, 0)),
        out_shape=jax.ShapeDtypeStruct((m, cout), out_dtype),
        compiler_params=pltpu.CompilerParams(dimension_semantics=("parallel",)),
    )(x2d, w, b)


def _sepconv_kernel(x_ref, dww_ref, dwb_ref, pww_ref, pwb_ref, o_ref, acc_ref,
                    *, h, w, dil):
    """Fused SeparableConv2d (relu_first=False):
    depthwise 3x3 dilated (BN scale folded) -> +bias -> ReLU
    -> 1x1 pointwise (BN scale folded) -> +bias -> ReLU.
    Halo is handled with static in-kernel slices; no HBM padding."""
    x = x_ref[...].astype(jnp.float32)                 # [H, W, Cin]
    # center tap (always fully valid) initializes the accumulator
    acc_ref[...] = x * dww_ref[4:5, :]
    for dy in range(3):
        for dx in range(3):
            if dy == 1 and dx == 1:
                continue
            oy = (dy - 1) * dil
            ox = (dx - 1) * dil
            oy0, oy1 = max(0, -oy), min(h, h - oy)
            ox0, ox1 = max(0, -ox), min(w, w - ox)
            if oy1 <= oy0 or ox1 <= ox0:
                continue  # dilated tap lands entirely in the zero padding
            acc_ref[oy0:oy1, ox0:ox1, :] += (
                x[oy0 + oy:oy1 + oy, ox0 + ox:ox1 + ox, :]
                * dww_ref[3 * dy + dx:3 * dy + dx + 1, :])
    z = jnp.maximum(acc_ref[...] + dwb_ref[...], 0.0)  # bn_depth bias + ReLU
    y = jnp.dot(z.reshape(h * w, -1), pww_ref[...],
                preferred_element_type=jnp.float32)    # 1x1 pointwise on MXU
    y = jnp.maximum(y + pwb_ref[...], 0.0)             # bn_point bias + ReLU
    o_ref[...] = y.reshape(h, w, -1).astype(o_ref.dtype)


def sepconv_fused(x_nhwc, p, dilation, out_dtype=jnp.bfloat16):
    """x: [N,H,W,Cin] -> [N,H,W,Cout]; one pallas_call per branch, grid over N."""
    n, h, w, cin = x_nhwc.shape
    cout = p["pw_w"].shape[1]
    # TODO(synk): for non-toy H*W, additionally tile H with an explicit halo
    # (index_map over-fetch) so the per-image scratch stays within VMEM.
    return pl.pallas_call(
        functools.partial(_sepconv_kernel, h=h, w=w, dil=dilation),
        grid=(n,),
        in_specs=[
            pl.BlockSpec((None, h, w, cin), lambda b: (b, 0, 0, 0)),
            pl.BlockSpec((9, cin), lambda b: (0, 0)),
            pl.BlockSpec((1, cin), lambda b: (0, 0)),
            pl.BlockSpec((cin, cout), lambda b: (0, 0)),
            pl.BlockSpec((1, cout), lambda b: (0, 0)),
        ],
        out_specs=pl.BlockSpec((None, h, w, cout), lambda b: (b, 0, 0, 0)),
        out_shape=jax.ShapeDtypeStruct((n, h, w, cout), out_dtype),
        scratch_shapes=[pltpu.VMEM((h, w, cin), jnp.float32)],
        compiler_params=pltpu.CompilerParams(dimension_semantics=("parallel",)),
    )(x_nhwc, p["dw_w"], p["dw_b"], p["pw_w"], p["pw_b"])


def _pool_branch_kernel(x_ref, ipw_ref, ipb_ref, pjw_ref, o_ref, *, inv_hw):
    """Image pooling branch, fully fused per image:
    GAP (ones-vector matmul on MXU) -> 1x1 conv (BN folded) -> ReLU
    -> projection rows for the pooled slot -> per-image bias [1, Cproj]."""
    h, w, cin = x_ref.shape
    xm = x_ref[...].reshape(h * w, cin).astype(jnp.float32)
    ones = jnp.full((1, h * w), inv_hw, dtype=jnp.float32)
    g = jnp.dot(ones, xm, preferred_element_type=jnp.float32)          # [1,Cin]
    g = jnp.maximum(
        jnp.dot(g, ipw_ref[...], preferred_element_type=jnp.float32)
        + ipb_ref[...], 0.0)                                           # [1,Cout]
    o_ref[...] = jnp.dot(g, pjw_ref[...],
                         preferred_element_type=jnp.float32)           # [1,Cproj]


def pool_branch(x_nhwc, ip_w, ip_b, proj_w_pool):
    n, h, w, cin = x_nhwc.shape
    cout = ip_w.shape[1]
    cproj = proj_w_pool.shape[1]
    return pl.pallas_call(
        functools.partial(_pool_branch_kernel, inv_hw=1.0 / float(h * w)),
        grid=(n,),
        in_specs=[
            pl.BlockSpec((None, h, w, cin), lambda b: (b, 0, 0, 0)),
            pl.BlockSpec((cin, cout), lambda b: (0, 0)),
            pl.BlockSpec((1, cout), lambda b: (0, 0)),
            pl.BlockSpec((cout, cproj), lambda b: (0, 0)),
        ],
        out_specs=pl.BlockSpec((None, 1, cproj), lambda b: (b, 0, 0)),
        out_shape=jax.ShapeDtypeStruct((n, 1, cproj), jnp.float32),
        compiler_params=pltpu.CompilerParams(dimension_semantics=("parallel",)),
    )(x_nhwc, ip_w, ip_b, proj_w_pool)


def _proj_kernel(x0_ref, x1_ref, x2_ref, x3_ref, pb_ref, b_ref,
                 w0_ref, w1_ref, w2_ref, w3_ref, o_ref):
    """Concat-free ASPP projection: accumulate 4 partial matmuls (proj weight
    split row-wise) + per-image pooled-branch bias + folded-BN bias, ReLU."""
    acc = jnp.dot(x0_ref[...], w0_ref[...], preferred_element_type=jnp.float32)
    acc = acc + jnp.dot(x1_ref[...], w1_ref[...], preferred_element_type=jnp.float32)
    acc = acc + jnp.dot(x2_ref[...], w2_ref[...], preferred_element_type=jnp.float32)
    acc = acc + jnp.dot(x3_ref[...], w3_ref[...], preferred_element_type=jnp.float32)
    acc = acc + pb_ref[...] + b_ref[...]
    o_ref[...] = jnp.maximum(acc, 0.0).astype(o_ref.dtype)


def project(x0, x1, x2, x3, pool_bias, params):
    """x_k: [N, HW, Cout] (bf16), pool_bias: [N, 1, Cproj] -> [N, HW, Cproj]."""
    n, hw, c = x0.shape
    cproj = params["proj_b"].shape[1]
    th = _pick_tile(hw)
    bspec_x = pl.BlockSpec((None, th, c), lambda b, t: (b, t, 0))
    bspec_w = pl.BlockSpec((c, cproj), lambda b, t: (0, 0))
    return pl.pallas_call(
        _proj_kernel,
        grid=(n, hw // th),
        in_specs=[
            bspec_x, bspec_x, bspec_x, bspec_x,
            pl.BlockSpec((None, 1, cproj), lambda b, t: (b, 0, 0)),
            pl.BlockSpec((1, cproj), lambda b, t: (0, 0)),
            bspec_w, bspec_w, bspec_w, bspec_w,
        ],
        out_specs=pl.BlockSpec((None, th, cproj), lambda b, t: (b, t, 0)),
        out_shape=jax.ShapeDtypeStruct((n, hw, cproj), jnp.float32),
        compiler_params=pltpu.CompilerParams(
            dimension_semantics=("parallel", "parallel")),
    )(x0, x1, x2, x3, pool_bias, params["proj_b"],
      params["proj_w_x0"], params["proj_w_x1"],
      params["proj_w_x2"], params["proj_w_x3"])


# ----------------------------------------------------------------------------
# Deterministic synthetic parameters with BatchNorm folded at init
# ----------------------------------------------------------------------------
def _bn_fold(key, c):
    k1, k2, k3, k4 = jax.random.split(key, 4)
    gamma = jax.random.uniform(k1, (c,), minval=0.5, maxval=1.5)
    beta = jax.random.normal(k2, (c,)) * 0.1
    mean = jax.random.normal(k3, (c,)) * 0.1
    var = jax.random.uniform(k4, (c,), minval=0.5, maxval=1.5)
    scale = gamma / jnp.sqrt(var + 1e-5)
    bias = beta - mean * scale
    return scale.astype(jnp.float32), bias.astype(jnp.float32)


def _conv_w(key, cin, cout):
    return (jax.random.normal(key, (cin, cout)) / jnp.sqrt(cin)).astype(jnp.float32)


def _dw_w(key, c):
    return (jax.random.normal(key, (9, c)) / 3.0).astype(jnp.float32)


def init_sepconv(key, cin, cout):
    k = jax.random.split(key, 4)
    sd, bd = _bn_fold(k[1], cin)     # bn_depth
    sp, bp = _bn_fold(k[3], cout)    # bn_point
    return {
        "dw_w": _dw_w(k[0], cin) * sd[None, :],
        "dw_b": bd.reshape(1, cin),
        "pw_w": _conv_w(k[2], cin, cout) * sp[None, :],
        "pw_b": bp.reshape(1, cout),
    }


def init_aspp(key, cin, cout, output_stride=8):
    dilations = {16: (6, 12, 18), 8: (12, 24, 36), 32: (6, 12, 18)}[output_stride]
    ks = jax.random.split(key, 9)
    s0, b0 = _bn_fold(ks[1], cout)
    sip, bip = _bn_fold(ks[6], cout)
    spj, bpj = _bn_fold(ks[8], cout)
    proj_w = _conv_w(ks[7], 5 * cout, cout) * spj[None, :]
    params = {
        "aspp0_w": _conv_w(ks[0], cin, cout) * s0[None, :],
        "aspp0_b": b0.reshape(1, cout),
        "aspp1": init_sepconv(ks[2], cin, cout),
        "aspp2": init_sepconv(ks[3], cin, cout),
        "aspp3": init_sepconv(ks[4], cin, cout),
        "ip_w": _conv_w(ks[5], cin, cout) * sip[None, :],
        "ip_b": bip.reshape(1, cout),
        # projection weight split by concat order (pool, x0, x1, x2, x3)
        "proj_w_pool": proj_w[0 * cout:1 * cout],
        "proj_w_x0": proj_w[1 * cout:2 * cout].astype(jnp.bfloat16),
        "proj_w_x1": proj_w[2 * cout:3 * cout].astype(jnp.bfloat16),
        "proj_w_x2": proj_w[3 * cout:4 * cout].astype(jnp.bfloat16),
        "proj_w_x3": proj_w[4 * cout:5 * cout].astype(jnp.bfloat16),
        "proj_b": bpj.reshape(1, cout),
    }
    return params, dilations


# ----------------------------------------------------------------------------
# _ASPP forward (NCHW in / NCHW out, eval mode)
# ----------------------------------------------------------------------------
@functools.partial(jax.jit, static_argnames=("dilations",))
def aspp_forward(params, x_nchw, dilations):
    x = jnp.transpose(x_nchw, (0, 2, 3, 1)).astype(jnp.float32)   # NHWC
    n, h, w, cin = x.shape
    cout = params["aspp0_w"].shape[1]
    d1, d2, d3 = dilations

    # image pooling branch: GAP -> 1x1 conv -> BN -> ReLU -> (nearest upsample
    # of a 1x1 map == spatial constant) folded into a per-image projection bias
    pool_bias = pool_branch(x, params["ip_w"], params["ip_b"],
                            params["proj_w_pool"])                 # [N,1,Cout]

    # aspp0: 1x1 conv -> BN -> ReLU (tiled pointwise matmul)
    x0 = pointwise_relu(x.reshape(n * h * w, cin), params["aspp0_w"],
                        params["aspp0_b"], out_dtype=jnp.bfloat16)
    x0 = x0.reshape(n, h * w, cout)

    # aspp1..3: fused separable convs (relu_first=False)
    x1 = sepconv_fused(x, params["aspp1"], d1).reshape(n, h * w, cout)
    x2 = sepconv_fused(x, params["aspp2"], d2).reshape(n, h * w, cout)
    x3 = sepconv_fused(x, params["aspp3"], d3).reshape(n, h * w, cout)

    # concat-free projection + BN + ReLU (Dropout2d is identity in eval mode)
    y = project(x0, x1, x2, x3, pool_bias, params)                 # [N,HW,Cout]
    y = y.reshape(n, h, w, cout)
    return jnp.transpose(y, (0, 3, 1, 2))                          # NCHW


# ----------------------------------------------------------------------------
if __name__ == "__main__":
    key = jax.random.PRNGKey(0)
    k_param, k_x = jax.random.split(key)

    in_channels, out_channels = 64, 32
    x = jax.random.normal(k_x, (2, in_channels, 16, 16), dtype=jnp.float32)

    params, dilations = init_aspp(k_param, in_channels, out_channels,
                                  output_stride=8)   # dilations (12, 24, 36)

    y = aspp_forward(params, x, dilations)
    y = jax.block_until_ready(y)

    assert y.shape == (2, out_channels, 16, 16), y.shape
    assert bool(jnp.all(jnp.isfinite(y)))
    print("KERNEL_OK")
</pallas_src>

<mosaic_0001>
module attributes {stable_mosaic.version = 11 : i64} {
  func.func @_sepconv_kernel(%arg0: i32, %arg1: memref<1x16x16x64xf32, #tpu.memory_space<vmem>>, %arg2: memref<9x64xf32, #tpu.memory_space<vmem>>, %arg3: memref<1x64xf32, #tpu.memory_space<vmem>>, %arg4: memref<64x32xf32, #tpu.memory_space<vmem>>, %arg5: memref<1x32xf32, #tpu.memory_space<vmem>>, %arg6: memref<1x16x16x32xbf16, #tpu.memory_space<vmem>>, %arg7: memref<16x16x64xf32, #tpu.memory_space<vmem>>) attributes {dimension_semantics = [#tpu.dimension_semantics<parallel>], iteration_bounds = array<i64: 2>, scalar_prefetch = 0 : i64, scratch_operands = 1 : i64, tpu.core_type = #tpu.core_type<tc>, window_params = [{transform_indices = @transform_0, window_bounds = array<i64: 1, 16, 16, 64>}, {pipeline_mode = #tpu.pipeline_mode<synchronous>, transform_indices = @transform_1, window_bounds = array<i64: 9, 64>}, {pipeline_mode = #tpu.pipeline_mode<synchronous>, transform_indices = @transform_2, window_bounds = array<i64: 1, 64>}, {pipeline_mode = #tpu.pipeline_mode<synchronous>, transform_indices = @transform_3, window_bounds = array<i64: 64, 32>}, {pipeline_mode = #tpu.pipeline_mode<synchronous>, transform_indices = @transform_4, window_bounds = array<i64: 1, 32>}, {transform_indices = @transform_5, window_bounds = array<i64: 1, 16, 16, 32>}]} {
    %c0 = arith.constant 0 : index
    %c0_0 = arith.constant 0 : index
    %c0_1 = arith.constant 0 : index
    %c0_2 = arith.constant 0 : index
    %0 = vector.load %arg1[%c0, %c0_0, %c0_1, %c0_2] : memref<1x16x16x64xf32, #tpu.memory_space<vmem>>, vector<1x16x16x64xf32>
    %1 = vector.shape_cast %0 : vector<1x16x16x64xf32> to vector<16x16x64xf32>
    %c4 = arith.constant 4 : index
    %c0_3 = arith.constant 0 : index
    %2 = vector.load %arg2[%c4, %c0_3] : memref<9x64xf32, #tpu.memory_space<vmem>>, vector<1x64xf32>
    %3 = vector.shape_cast %2 : vector<1x64xf32> to vector<1x1x64xf32>
    %4 = vector.broadcast %3 : vector<1x1x64xf32> to vector<16x16x64xf32>
    %5 = arith.mulf %1, %4 : vector<16x16x64xf32>
    %c0_4 = arith.constant 0 : index
    %c0_5 = arith.constant 0 : index
    %c0_6 = arith.constant 0 : index
    %6 = vector.load %arg7[%c0_4, %c0_5, %c0_6] : memref<16x16x64xf32, #tpu.memory_space<vmem>>, vector<16x16x64xf32>
    tpu.vector_store %arg7[%c0_4, %c0_5, %c0_6], %5 {strides = array<i32>} : memref<16x16x64xf32, #tpu.memory_space<vmem>>, vector<16x16x64xf32>,
    %c12 = arith.constant 12 : index
    %c12_7 = arith.constant 12 : index
    %c0_8 = arith.constant 0 : index
    %7 = vector.load %arg7[%c12, %c12_7, %c0_8] : memref<16x16x64xf32, #tpu.memory_space<vmem>>, vector<4x4x64xf32>
    %8 = vector.extract_strided_slice %1 {offsets = [0, 0, 0], sizes = [4, 4, 64], strides = [1, 1, 1]} : vector<16x16x64xf32> to vector<4x4x64xf32>
    %c0_9 = arith.constant 0 : index
    %c0_10 = arith.constant 0 : index
    %9 = vector.load %arg2[%c0_9, %c0_10] : memref<9x64xf32, #tpu.memory_space<vmem>>, vector<1x64xf32>
    %10 = vector.shape_cast %9 : vector<1x64xf32> to vector<1x1x64xf32>
    %11 = vector.broadcast %10 : vector<1x1x64xf32> to vector<4x4x64xf32>
    %12 = arith.mulf %8, %11 : vector<4x4x64xf32>
    %13 = arith.addf %7, %12 : vector<4x4x64xf32>
    %c12_11 = arith.constant 12 : index
    %c12_12 = arith.constant 12 : index
    %c0_13 = arith.constant 0 : index
    %14 = vector.load %arg7[%c12_11, %c12_12, %c0_13] : memref<16x16x64xf32, #tpu.memory_space<vmem>>, vector<4x4x64xf32>
    tpu.vector_store %arg7[%c12_11, %c12_12, %c0_13], %13 {strides = array<i32>} : memref<16x16x64xf32, #tpu.memory_space<vmem>>, vector<4x4x64xf32>,
    %c12_14 = arith.constant 12 : index
    %c0_15 = arith.constant 0 : index
    %c0_16 = arith.constant 0 : index
    %15 = vector.load %arg7[%c12_14, %c0_15, %c0_16] : memref<16x16x64xf32, #tpu.memory_space<vmem>>, vector<4x16x64xf32>
    %16 = vector.extract_strided_slice %1 {offsets = [0, 0, 0], sizes = [4, 16, 64], strides = [1, 1, 1]} : vector<16x16x64xf32> to vector<4x16x64xf32>
    %c1 = arith.constant 1 : index
    %c0_17 = arith.constant 0 : index
    %17 = vector.load %arg2[%c1, %c0_17] : memref<9x64xf32, #tpu.memory_space<vmem>>, vector<1x64xf32>
    %18 = vector.shape_cast %17 : vector<1x64xf32> to vector<1x1x64xf32>
    %19 = vector.broadcast %18 : vector<1x1x64xf32> to vector<4x16x64xf32>
    %20 = arith.mulf %16, %19 : vector<4x16x64xf32>
    %21 = arith.addf %15, %20 : vector<4x16x64xf32>
    %c12_18 = arith.constant 12 : index
    %c0_19 = arith.constant 0 : index
    %c0_20 = arith.constant 0 : index
    %22 = vector.load %arg7[%c12_18, %c0_19, %c0_20] : memref<16x16x64xf32, #tpu.memory_space<vmem>>, vector<4x16x64xf32>
    tpu.vector_store %arg7[%c12_18, %c0_19, %c0_20], %21 {strides = array<i32>} : memref<16x16x64xf32, #tpu.memory_space<vmem>>, vector<4x16x64xf32>,
    %c12_21 = arith.constant 12 : index
    %c0_22 = arith.constant 0 : index
    %c0_23 = arith.constant 0 : index
    %23 = vector.load %arg7[%c12_21, %c0_22, %c0_23] : memref<16x16x64xf32, #tpu.memory_space<vmem>>, vector<4x4x64xf32>
    %24 = vector.extract_strided_slice %1 {offsets = [0, 12, 0], sizes = [4, 4, 64], strides = [1, 1, 1]} : vector<16x16x64xf32> to vector<4x4x64xf32>
    %c2 = arith.constant 2 : index
    %c0_24 = arith.constant 0 : index
    %25 = vector.load %arg2[%c2, %c0_24] : memref<9x64xf32, #tpu.memory_space<vmem>>, vector<1x64xf32>
    %26 = vector.shape_cast %25 : vector<1x64xf32> to vector<1x1x64xf32>
    %27 = vector.broadcast %26 : vector<1x1x64xf32> to vector<4x4x64xf32>
    %28 = arith.mulf %24, %27 : vector<4x4x64xf32>
    %29 = arith.addf %23, %28 : vector<4x4x64xf32>
    %c12_25 = arith.constant 12 : index
    %c0_26 = arith.constant 0 : index
    %c0_27 = arith.constant 0 : index
    %30 = vector.load %arg7[%c12_25, %c0_26, %c0_27] : memref<16x16x64xf32, #tpu.memory_space<vmem>>, vector<4x4x64xf32>
    tpu.vector_store %arg7[%c12_25, %c0_26, %c0_27], %29 {strides = array<i32>} : memref<16x16x64xf32, #tpu.memory_space<vmem>>, vector<4x4x64xf32>,
    %c0_28 = arith.constant 0 : index
    %c12_29 = arith.constant 12 : index
    %c0_30 = arith.constant 0 : index
    %31 = vector.load %arg7[%c0_28, %c12_29, %c0_30] : memref<16x16x64xf32, #tpu.memory_space<vmem>>, vector<16x4x64xf32>
    %32 = vector.extract_strided_slice %1 {offsets = [0, 0, 0], sizes = [16, 4, 64], strides = [1, 1, 1]} : vector<16x16x64xf32> to vector<16x4x64xf32>
    %c3 = arith.constant 3 : index
    %c0_31 = arith.constant 0 : index
    %33 = vector.load %arg2[%c3, %c0_31] : memref<9x64xf32, #tpu.memory_space<vmem>>, vector<1x64xf32>
    %34 = vector.shape_cast %33 : vector<1x64xf32> to vector<1x1x64xf32>
    %35 = vector.broadcast %34 : vector<1x1x64xf32> to vector<16x4x64xf32>
    %36 = arith.mulf %32, %35 : vector<16x4x64xf32>
    %37 = arith.addf %31, %36 : vector<16x4x64xf32>
    %c0_32 = arith.constant 0 : index
    %c12_33 = arith.constant 12 : index
    %c0_34 = arith.constant 0 : index
    %38 = vector.load %arg7[%c0_32, %c12_33, %c0_34] : memref<16x16x64xf32, #tpu.memory_space<vmem>>, vector<16x4x64xf32>
    tpu.vector_store %arg7[%c0_32, %c12_33, %c0_34], %37 {strides = array<i32>} : memref<16x16x64xf32, #tpu.memory_space<vmem>>, vector<16x4x64xf32>,
    %c0_35 = arith.constant 0 : index
    %c0_36 = arith.constant 0 : index
    %c0_37 = arith.constant 0 : index
    %39 = vector.load %arg7[%c0_35, %c0_36, %c0_37] : memref<16x16x64xf32, #tpu.memory_space<vmem>>, vector<16x4x64xf32>
    %40 = vector.extract_strided_slice %1 {offsets = [0, 12, 0], sizes = [16, 4, 64], strides = [1, 1, 1]} : vector<16x16x64xf32> to vector<16x4x64xf32>
    %c5 = arith.constant 5 : index
    %c0_38 = arith.constant 0 : index
    %41 = vector.load %arg2[%c5, %c0_38] : memref<9x64xf32, #tpu.memory_space<vmem>>, vector<1x64xf32>
    %42 = vector.shape_cast %41 : vector<1x64xf32> to vector<1x1x64xf32>
    %43 = vector.broadcast %42 : vector<1x1x64xf32> to vector<16x4x64xf32>
    %44 = arith.mulf %40, %43 : vector<16x4x64xf32>
    %45 = arith.addf %39, %44 : vector<16x4x64xf32>
    %c0_39 = arith.constant 0 : index
    %c0_40 = arith.constant 0 : index
    %c0_41 = arith.constant 0 : index
    %46 = vector.load %arg7[%c0_39, %c0_40, %c0_41] : memref<16x16x64xf32, #tpu.memory_space<vmem>>, vector<16x4x64xf32>
    tpu.vector_store %arg7[%c0_39, %c0_40, %c0_41], %45 {strides = array<i32>} : memref<16x16x64xf32, #tpu.memory_space<vmem>>, vector<16x4x64xf32>,
    %c0_42 = arith.constant 0 : index
    %c12_43 = arith.constant 12 : index
    %c0_44 = arith.constant 0 : index
    %47 = vector.load %arg7[%c0_42, %c12_43, %c0_44] : memref<16x16x64xf32, #tpu.memory_space<vmem>>, vector<4x4x64xf32>
    %48 = vector.extract_strided_slice %1 {offsets = [12, 0, 0], sizes = [4, 4, 64], strides = [1, 1, 1]} : vector<16x16x64xf32> to vector<4x4x64xf32>
    %c6 = arith.constant 6 : index
    %c0_45 = arith.constant 0 : index
    %49 = vector.load %arg2[%c6, %c0_45] : memref<9x64xf32, #tpu.memory_space<vmem>>, vector<1x64xf32>
    %50 = vector.shape_cast %49 : vector<1x64xf32> to vector<1x1x64xf32>
    %51 = vector.broadcast %50 : vector<1x1x64xf32> to vector<4x4x64xf32>
    %52 = arith.mulf %48, %51 : vector<4x4x64xf32>
    %53 = arith.addf %47, %52 : vector<4x4x64xf32>
    %c0_46 = arith.constant 0 : index
    %c12_47 = arith.constant 12 : index
    %c0_48 = arith.constant 0 : index
    %54 = vector.load %arg7[%c0_46, %c12_47, %c0_48] : memref<16x16x64xf32, #tpu.memory_space<vmem>>, vector<4x4x64xf32>
    tpu.vector_store %arg7[%c0_46, %c12_47, %c0_48], %53 {strides = array<i32>} : memref<16x16x64xf32, #tpu.memory_space<vmem>>, vector<4x4x64xf32>,
    %c0_49 = arith.constant 0 : index
    %c0_50 = arith.constant 0 : index
    %c0_51 = arith.constant 0 : index
    %55 = vector.load %arg7[%c0_49, %c0_50, %c0_51] : memref<16x16x64xf32, #tpu.memory_space<vmem>>, vector<4x16x64xf32>
    %56 = vector.extract_strided_slice %1 {offsets = [12, 0, 0], sizes = [4, 16, 64], strides = [1, 1, 1]} : vector<16x16x64xf32> to vector<4x16x64xf32>
    %c7 = arith.constant 7 : index
    %c0_52 = arith.constant 0 : index
    %57 = vector.load %arg2[%c7, %c0_52] : memref<9x64xf32, #tpu.memory_space<vmem>>, vector<1x64xf32>
    %58 = vector.shape_cast %57 : vector<1x64xf32> to vector<1x1x64xf32>
    %59 = vector.broadcast %58 : vector<1x1x64xf32> to vector<4x16x64xf32>
    %60 = arith.mulf %56, %59 : vector<4x16x64xf32>
    %61 = arith.addf %55, %60 : vector<4x16x64xf32>
    %c0_53 = arith.constant 0 : index
    %c0_54 = arith.constant 0 : index
    %c0_55 = arith.constant 0 : index
    %62 = vector.load %arg7[%c0_53, %c0_54, %c0_55] : memref<16x16x64xf32, #tpu.memory_space<vmem>>, vector<4x16x64xf32>
    tpu.vector_store %arg7[%c0_53, %c0_54, %c0_55], %61 {strides = array<i32>} : memref<16x16x64xf32, #tpu.memory_space<vmem>>, vector<4x16x64xf32>,
    %c0_56 = arith.constant 0 : index
    %c0_57 = arith.constant 0 : index
    %c0_58 = arith.constant 0 : index
    %63 = vector.load %arg7[%c0_56, %c0_57, %c0_58] : memref<16x16x64xf32, #tpu.memory_space<vmem>>, vector<4x4x64xf32>
    %64 = vector.extract_strided_slice %1 {offsets = [12, 12, 0], sizes = [4, 4, 64], strides = [1, 1, 1]} : vector<16x16x64xf32> to vector<4x4x64xf32>
    %c8 = arith.constant 8 : index
    %c0_59 = arith.constant 0 : index
    %65 = vector.load %arg2[%c8, %c0_59] : memref<9x64xf32, #tpu.memory_space<vmem>>, vector<1x64xf32>
    %66 = vector.shape_cast %65 : vector<1x64xf32> to vector<1x1x64xf32>
    %67 = vector.broadcast %66 : vector<1x1x64xf32> to vector<4x4x64xf32>
    %68 = arith.mulf %64, %67 : vector<4x4x64xf32>
    %69 = arith.addf %63, %68 : vector<4x4x64xf32>
    %c0_60 = arith.constant 0 : index
    %c0_61 = arith.constant 0 : index
    %c0_62 = arith.constant 0 : index
    %70 = vector.load %arg7[%c0_60, %c0_61, %c0_62] : memref<16x16x64xf32, #tpu.memory_space<vmem>>, vector<4x4x64xf32>
    tpu.vector_store %arg7[%c0_60, %c0_61, %c0_62], %69 {strides = array<i32>} : memref<16x16x64xf32, #tpu.memory_space<vmem>>, vector<4x4x64xf32>,
    %c0_63 = arith.constant 0 : index
    %c0_64 = arith.constant 0 : index
    %c0_65 = arith.constant 0 : index
    %71 = vector.load %arg7[%c0_63, %c0_64, %c0_65] : memref<16x16x64xf32, #tpu.memory_space<vmem>>, vector<16x16x64xf32>
    %c0_66 = arith.constant 0 : index
    %c0_67 = arith.constant 0 : index
    %72 = vector.load %arg3[%c0_66, %c0_67] : memref<1x64xf32, #tpu.memory_space<vmem>>, vector<1x64xf32>
    %73 = vector.shape_cast %72 : vector<1x64xf32> to vector<1x1x64xf32>
    %74 = vector.broadcast %73 : vector<1x1x64xf32> to vector<16x16x64xf32>
    %75 = arith.addf %71, %74 : vector<16x16x64xf32>
    %cst = arith.constant 0.000000e+00 : f32
    %76 = vector.broadcast %cst : f32 to vector<16x16x64xf32>
    %77 = arith.maximumf %75, %76 : vector<16x16x64xf32>
    %78 = vector.shape_cast %77 : vector<16x16x64xf32> to vector<256x64xf32>
    %c0_68 = arith.constant 0 : index
    %c0_69 = arith.constant 0 : index
    %79 = vector.load %arg4[%c0_68, %c0_69] : memref<64x32xf32, #tpu.memory_space<vmem>>, vector<64x32xf32>
    %cst_70 = arith.constant dense<0.000000e+00> : vector<256x32xf32>
    %80 = tpu.matmul %78, %79, %cst_70 {dimension_numbers = #tpu.dot_dimension_numbers<[1], [0], [0], [1], [0, 0, 1, 1], [], []>} : vector<256x64xf32>, vector<64x32xf32>, vector<256x32xf32> -> vector<256x32xf32>
    %c0_71 = arith.constant 0 : index
    %c0_72 = arith.constant 0 : index
    %81 = vector.load %arg5[%c0_71, %c0_72] : memref<1x32xf32, #tpu.memory_space<vmem>>, vector<1x32xf32>
    %82 = vector.broadcast %81 : vector<1x32xf32> to vector<256x32xf32>
    %83 = arith.addf %80, %82 : vector<256x32xf32>
    %cst_73 = arith.constant 0.000000e+00 : f32
    %84 = vector.broadcast %cst_73 : f32 to vector<256x32xf32>
    %85 = arith.maximumf %83, %84 : vector<256x32xf32>
    %86 = vector.shape_cast %85 : vector<256x32xf32> to vector<16x16x32xf32>
    %87 = arith.truncf %86 : vector<16x16x32xf32> to vector<16x16x32xbf16>
    %c0_74 = arith.constant 0 : index
    %c0_75 = arith.constant 0 : index
    %c0_76 = arith.constant 0 : index
    %c0_77 = arith.constant 0 : index
    %88 = vector.load %arg6[%c0_74, %c0_75, %c0_76, %c0_77] : memref<1x16x16x32xbf16, #tpu.memory_space<vmem>>, vector<1x16x16x32xbf16>
    %89 = vector.shape_cast %88 : vector<1x16x16x32xbf16> to vector<16x16x32xbf16>
    %90 = vector.shape_cast %87 : vector<16x16x32xbf16> to vector<1x16x16x32xbf16>
    tpu.vector_store %arg6[%c0_74, %c0_75, %c0_76, %c0_77], %90 {strides = array<i32>} : memref<1x16x16x32xbf16, #tpu.memory_space<vmem>>, vector<1x16x16x32xbf16>,
    return
  }
  func.func @transform_0(%arg0: i32) -> (i32, i32, i32, i32) {
    %c0_i32 = arith.constant 0 : i32
    %c0_i32_0 = arith.constant 0 : i32
    %c0_i32_1 = arith.constant 0 : i32
    %c0_i32_2 = arith.constant 0 : i32
    return %arg0, %c0_i32, %c0_i32_0, %c0_i32_1 : i32, i32, i32, i32
  }
  func.func @transform_1(%arg0: i32) -> (i32, i32) {
    %c0_i32 = arith.constant 0 : i32
    %c0_i32_0 = arith.constant 0 : i32
    %c0_i32_1 = arith.constant 0 : i32
    return %c0_i32, %c0_i32_0 : i32, i32
  }
  func.func @transform_2(%arg0: i32) -> (i32, i32) {
    %c0_i32 = arith.constant 0 : i32
    %c0_i32_0 = arith.constant 0 : i32
    %c0_i32_1 = arith.constant 0 : i32
    return %c0_i32, %c0_i32_0 : i32, i32
  }
  func.func @transform_3(%arg0: i32) -> (i32, i32) {
    %c0_i32 = arith.constant 0 : i32
    %c0_i32_0 = arith.constant 0 : i32
    %c0_i32_1 = arith.constant 0 : i32
    return %c0_i32, %c0_i32_0 : i32, i32
  }
  func.func @transform_4(%arg0: i32) -> (i32, i32) {
    %c0_i32 = arith.constant 0 : i32
    %c0_i32_0 = arith.constant 0 : i32
    %c0_i32_1 = arith.constant 0 : i32
    return %c0_i32, %c0_i32_0 : i32, i32
  }
  func.func @transform_5(%arg0: i32) -> (i32, i32, i32, i32) {
    %c0_i32 = arith.constant 0 : i32
    %c0_i32_0 = arith.constant 0 : i32
    %c0_i32_1 = arith.constant 0 : i32
    %c0_i32_2 = arith.constant 0 : i32
    return %arg0, %c0_i32, %c0_i32_0, %c0_i32_1 : i32, i32, i32, i32
  }
}

module attributes {stable_mosaic.version = 11 : i64} {
  func.func @_pool_branch_kernel(%arg0: i32, %arg1: memref<1x16x16x64xf32, #tpu.memory_space<vmem>>, %arg2: memref<64x32xf32, #tpu.memory_space<vmem>>, %arg3: memref<1x32xf32, #tpu.memory_space<vmem>>, %arg4: memref<32x32xf32, #tpu.memory_space<vmem>>, %arg5: memref<1x1x32xf32, #tpu.memory_space<vmem>>) attributes {dimension_semantics = [#tpu.dimension_semantics<parallel>], iteration_bounds = array<i64: 2>, scalar_prefetch = 0 : i64, scratch_operands = 0 : i64, tpu.core_type = #tpu.core_type<tc>, window_params = [{transform_indices = @transform_0, window_bounds = array<i64: 1, 16, 16, 64>}, {pipeline_mode = #tpu.pipeline_mode<synchronous>, transform_indices = @transform_1, window_bounds = array<i64: 64, 32>}, {pipeline_mode = #tpu.pipeline_mode<synchronous>, transform_indices = @transform_2, window_bounds = array<i64: 1, 32>}, {pipeline_mode = #tpu.pipeline_mode<synchronous>, transform_indices = @transform_3, window_bounds = array<i64: 32, 32>}, {transform_indices = @transform_4, window_bounds = array<i64: 1, 1, 32>}]} {
    %c0 = arith.constant 0 : index
    %c0_0 = arith.constant 0 : index
    %c0_1 = arith.constant 0 : index
    %c0_2 = arith.constant 0 : index
    %0 = vector.load %arg1[%c0, %c0_0, %c0_1, %c0_2] : memref<1x16x16x64xf32, #tpu.memory_space<vmem>>, vector<1x16x16x64xf32>
    %1 = vector.shape_cast %0 : vector<1x16x16x64xf32> to vector<16x16x64xf32>
    %2 = vector.shape_cast %1 : vector<16x16x64xf32> to vector<256x64xf32>
    %cst = arith.constant 3.906250e-03 : f32
    %3 = vector.broadcast %cst : f32 to vector<1x256xf32>
    %cst_3 = arith.constant dense<0.000000e+00> : vector<1x64xf32>
    %4 = tpu.matmul %3, %2, %cst_3 {dimension_numbers = #tpu.dot_dimension_numbers<[1], [0], [0], [1], [0, 0, 1, 1], [], []>} : vector<1x256xf32>, vector<256x64xf32>, vector<1x64xf32> -> vector<1x64xf32>
    %c0_4 = arith.constant 0 : index
    %c0_5 = arith.constant 0 : index
    %5 = vector.load %arg2[%c0_4, %c0_5] : memref<64x32xf32, #tpu.memory_space<vmem>>, vector<64x32xf32>
    %cst_6 = arith.constant dense<0.000000e+00> : vector<1x32xf32>
    %6 = tpu.matmul %4, %5, %cst_6 {dimension_numbers = #tpu.dot_dimension_numbers<[1], [0], [0], [1], [0, 0, 1, 1], [], []>} : vector<1x64xf32>, vector<64x32xf32>, vector<1x32xf32> -> vector<1x32xf32>
    %c0_7 = arith.constant 0 : index
    %c0_8 = arith.constant 0 : index
    %7 = vector.load %arg3[%c0_7, %c0_8] : memref<1x32xf32, #tpu.memory_space<vmem>>, vector<1x32xf32>
    %8 = arith.addf %6, %7 : vector<1x32xf32>
    %cst_9 = arith.constant 0.000000e+00 : f32
    %9 = vector.broadcast %cst_9 : f32 to vector<1x32xf32>
    %10 = arith.maximumf %8, %9 : vector<1x32xf32>
    %c0_10 = arith.constant 0 : index
    %c0_11 = arith.constant 0 : index
    %11 = vector.load %arg4[%c0_10, %c0_11] : memref<32x32xf32, #tpu.memory_space<vmem>>, vector<32x32xf32>
    %cst_12 = arith.constant dense<0.000000e+00> : vector<1x32xf32>
    %12 = tpu.matmul %10, %11, %cst_12 {dimension_numbers = #tpu.dot_dimension_numbers<[1], [0], [0], [1], [0, 0, 1, 1], [], []>} : vector<1x32xf32>, vector<32x32xf32>, vector<1x32xf32> -> vector<1x32xf32>
    %c0_13 = arith.constant 0 : index
    %c0_14 = arith.constant 0 : index
    %c0_15 = arith.constant 0 : index
    %13 = vector.load %arg5[%c0_13, %c0_14, %c0_15] : memref<1x1x32xf32, #tpu.memory_space<vmem>>, vector<1x1x32xf32>
    %14 = vector.shape_cast %13 : vector<1x1x32xf32> to vector<1x32xf32>
    %15 = vector.shape_cast %12 : vector<1x32xf32> to vector<1x1x32xf32>
    tpu.vector_store %arg5[%c0_13, %c0_14, %c0_15], %15 {strides = array<i32>} : memref<1x1x32xf32, #tpu.memory_space<vmem>>, vector<1x1x32xf32>,
    return
  }
  func.func @transform_0(%arg0: i32) -> (i32, i32, i32, i32) {
    %c0_i32 = arith.constant 0 : i32
    %c0_i32_0 = arith.constant 0 : i32
    %c0_i32_1 = arith.constant 0 : i32
    %c0_i32_2 = arith.constant 0 : i32
    return %arg0, %c0_i32, %c0_i32_0, %c0_i32_1 : i32, i32, i32, i32
  }
  func.func @transform_1(%arg0: i32) -> (i32, i32) {
    %c0_i32 = arith.constant 0 : i32
    %c0_i32_0 = arith.constant 0 : i32
    %c0_i32_1 = arith.constant 0 : i32
    return %c0_i32, %c0_i32_0 : i32, i32
  }
  func.func @transform_2(%arg0: i32) -> (i32, i32) {
    %c0_i32 = arith.constant 0 : i32
    %c0_i32_0 = arith.constant 0 : i32
    %c0_i32_1 = arith.constant 0 : i32
    return %c0_i32, %c0_i32_0 : i32, i32
  }
  func.func @transform_3(%arg0: i32) -> (i32, i32) {
    %c0_i32 = arith.constant 0 : i32
    %c0_i32_0 = arith.constant 0 : i32
    %c0_i32_1 = arith.constant 0 : i32
    return %c0_i32, %c0_i32_0 : i32, i32
  }
  func.func @transform_4(%arg0: i32) -> (i32, i32, i32) {
    %c0_i32 = arith.constant 0 : i32
    %c0_i32_0 = arith.constant 0 : i32
    %c0_i32_1 = arith.constant 0 : i32
    return %arg0, %c0_i32, %c0_i32_0 : i32, i32, i32
  }
}

module attributes {stable_mosaic.version = 11 : i64} {
  func.func @_sepconv_kernel(%arg0: i32, %arg1: memref<1x16x16x64xf32, #tpu.memory_space<vmem>>, %arg2: memref<9x64xf32, #tpu.memory_space<vmem>>, %arg3: memref<1x64xf32, #tpu.memory_space<vmem>>, %arg4: memref<64x32xf32, #tpu.memory_space<vmem>>, %arg5: memref<1x32xf32, #tpu.memory_space<vmem>>, %arg6: memref<1x16x16x32xbf16, #tpu.memory_space<vmem>>, %arg7: memref<16x16x64xf32, #tpu.memory_space<vmem>>) attributes {dimension_semantics = [#tpu.dimension_semantics<parallel>], iteration_bounds = array<i64: 2>, scalar_prefetch = 0 : i64, scratch_operands = 1 : i64, tpu.core_type = #tpu.core_type<tc>, window_params = [{transform_indices = @transform_0, window_bounds = array<i64: 1, 16, 16, 64>}, {pipeline_mode = #tpu.pipeline_mode<synchronous>, transform_indices = @transform_1, window_bounds = array<i64: 9, 64>}, {pipeline_mode = #tpu.pipeline_mode<synchronous>, transform_indices = @transform_2, window_bounds = array<i64: 1, 64>}, {pipeline_mode = #tpu.pipeline_mode<synchronous>, transform_indices = @transform_3, window_bounds = array<i64: 64, 32>}, {pipeline_mode = #tpu.pipeline_mode<synchronous>, transform_indices = @transform_4, window_bounds = array<i64: 1, 32>}, {transform_indices = @transform_5, window_bounds = array<i64: 1, 16, 16, 32>}]} {
    %c0 = arith.constant 0 : index
    %c0_0 = arith.constant 0 : index
    %c0_1 = arith.constant 0 : index
    %c0_2 = arith.constant 0 : index
    %0 = vector.load %arg1[%c0, %c0_0, %c0_1, %c0_2] : memref<1x16x16x64xf32, #tpu.memory_space<vmem>>, vector<1x16x16x64xf32>
    %1 = vector.shape_cast %0 : vector<1x16x16x64xf32> to vector<16x16x64xf32>
    %c4 = arith.constant 4 : index
    %c0_3 = arith.constant 0 : index
    %2 = vector.load %arg2[%c4, %c0_3] : memref<9x64xf32, #tpu.memory_space<vmem>>, vector<1x64xf32>
    %3 = vector.shape_cast %2 : vector<1x64xf32> to vector<1x1x64xf32>
    %4 = vector.broadcast %3 : vector<1x1x64xf32> to vector<16x16x64xf32>
    %5 = arith.mulf %1, %4 : vector<16x16x64xf32>
    %c0_4 = arith.constant 0 : index
    %c0_5 = arith.constant 0 : index
    %c0_6 = arith.constant 0 : index
    %6 = vector.load %arg7[%c0_4, %c0_5, %c0_6] : memref<16x16x64xf32, #tpu.memory_space<vmem>>, vector<16x16x64xf32>
    tpu.vector_store %arg7[%c0_4, %c0_5, %c0_6], %5 {strides = array<i32>} : memref<16x16x64xf32, #tpu.memory_space<vmem>>, vector<16x16x64xf32>,
    %c0_7 = arith.constant 0 : index
    %c0_8 = arith.constant 0 : index
    %c0_9 = arith.constant 0 : index
    %7 = vector.load %arg7[%c0_7, %c0_8, %c0_9] : memref<16x16x64xf32, #tpu.memory_space<vmem>>, vector<16x16x64xf32>
    %c0_10 = arith.constant 0 : index
    %c0_11 = arith.constant 0 : index
    %8 = vector.load %arg3[%c0_10, %c0_11] : memref<1x64xf32, #tpu.memory_space<vmem>>, vector<1x64xf32>
    %9 = vector.shape_cast %8 : vector<1x64xf32> to vector<1x1x64xf32>
    %10 = vector.broadcast %9 : vector<1x1x64xf32> to vector<16x16x64xf32>
    %11 = arith.addf %7, %10 : vector<16x16x64xf32>
    %cst = arith.constant 0.000000e+00 : f32
    %12 = vector.broadcast %cst : f32 to vector<16x16x64xf32>
    %13 = arith.maximumf %11, %12 : vector<16x16x64xf32>
    %14 = vector.shape_cast %13 : vector<16x16x64xf32> to vector<256x64xf32>
    %c0_12 = arith.constant 0 : index
    %c0_13 = arith.constant 0 : index
    %15 = vector.load %arg4[%c0_12, %c0_13] : memref<64x32xf32, #tpu.memory_space<vmem>>, vector<64x32xf32>
    %cst_14 = arith.constant dense<0.000000e+00> : vector<256x32xf32>
    %16 = tpu.matmul %14, %15, %cst_14 {dimension_numbers = #tpu.dot_dimension_numbers<[1], [0], [0], [1], [0, 0, 1, 1], [], []>} : vector<256x64xf32>, vector<64x32xf32>, vector<256x32xf32> -> vector<256x32xf32>
    %c0_15 = arith.constant 0 : index
    %c0_16 = arith.constant 0 : index
    %17 = vector.load %arg5[%c0_15, %c0_16] : memref<1x32xf32, #tpu.memory_space<vmem>>, vector<1x32xf32>
    %18 = vector.broadcast %17 : vector<1x32xf32> to vector<256x32xf32>
    %19 = arith.addf %16, %18 : vector<256x32xf32>
    %cst_17 = arith.constant 0.000000e+00 : f32
    %20 = vector.broadcast %cst_17 : f32 to vector<256x32xf32>
    %21 = arith.maximumf %19, %20 : vector<256x32xf32>
    %22 = vector.shape_cast %21 : vector<256x32xf32> to vector<16x16x32xf32>
    %23 = arith.truncf %22 : vector<16x16x32xf32> to vector<16x16x32xbf16>
    %c0_18 = arith.constant 0 : index
    %c0_19 = arith.constant 0 : index
    %c0_20 = arith.constant 0 : index
    %c0_21 = arith.constant 0 : index
    %24 = vector.load %arg6[%c0_18, %c0_19, %c0_20, %c0_21] : memref<1x16x16x32xbf16, #tpu.memory_space<vmem>>, vector<1x16x16x32xbf16>
    %25 = vector.shape_cast %24 : vector<1x16x16x32xbf16> to vector<16x16x32xbf16>
    %26 = vector.shape_cast %23 : vector<16x16x32xbf16> to vector<1x16x16x32xbf16>
    tpu.vector_store %arg6[%c0_18, %c0_19, %c0_20, %c0_21], %26 {strides = array<i32>} : memref<1x16x16x32xbf16, #tpu.memory_space<vmem>>, vector<1x16x16x32xbf16>,
    return
  }
  func.func @transform_0(%arg0: i32) -> (i32, i32, i32, i32) {
    %c0_i32 = arith.constant 0 : i32
    %c0_i32_0 = arith.constant 0 : i32
    %c0_i32_1 = arith.constant 0 : i32
    %c0_i32_2 = arith.constant 0 : i32
    return %arg0, %c0_i32, %c0_i32_0, %c0_i32_1 : i32, i32, i32, i32
  }
  func.func @transform_1(%arg0: i32) -> (i32, i32) {
    %c0_i32 = arith.constant 0 : i32
    %c0_i32_0 = arith.constant 0 : i32
    %c0_i32_1 = arith.constant 0 : i32
    return %c0_i32, %c0_i32_0 : i32, i32
  }
  func.func @transform_2(%arg0: i32) -> (i32, i32) {
    %c0_i32 = arith.constant 0 : i32
    %c0_i32_0 = arith.constant 0 : i32
    %c0_i32_1 = arith.constant 0 : i32
    return %c0_i32, %c0_i32_0 : i32, i32
  }
  func.func @transform_3(%arg0: i32) -> (i32, i32) {
    %c0_i32 = arith.constant 0 : i32
    %c0_i32_0 = arith.constant 0 : i32
    %c0_i32_1 = arith.constant 0 : i32
    return %c0_i32, %c0_i32_0 : i32, i32
  }
  func.func @transform_4(%arg0: i32) -> (i32, i32) {
    %c0_i32 = arith.constant 0 : i32
    %c0_i32_0 = arith.constant 0 : i32
    %c0_i32_1 = arith.constant 0 : i32
    return %c0_i32, %c0_i32_0 : i32, i32
  }
  func.func @transform_5(%arg0: i32) -> (i32, i32, i32, i32) {
    %c0_i32 = arith.constant 0 : i32
    %c0_i32_0 = arith.constant 0 : i32
    %c0_i32_1 = arith.constant 0 : i32
    %c0_i32_2 = arith.constant 0 : i32
    return %arg0, %c0_i32, %c0_i32_0, %c0_i32_1 : i32, i32, i32, i32
  }
}

module attributes {stable_mosaic.version = 11 : i64} {
  func.func @_pw_relu_kernel(%arg0: i32, %arg1: memref<256x64xf32, #tpu.memory_space<vmem>>, %arg2: memref<64x32xf32, #tpu.memory_space<vmem>>, %arg3: memref<1x32xf32, #tpu.memory_space<vmem>>, %arg4: memref<256x32xbf16, #tpu.memory_space<vmem>>) attributes {dimension_semantics = [#tpu.dimension_semantics<parallel>], iteration_bounds = array<i64: 2>, scalar_prefetch = 0 : i64, scratch_operands = 0 : i64, tpu.core_type = #tpu.core_type<tc>, window_params = [{transform_indices = @transform_0, window_bounds = array<i64: 256, 64>}, {pipeline_mode = #tpu.pipeline_mode<synchronous>, transform_indices = @transform_1, window_bounds = array<i64: 64, 32>}, {pipeline_mode = #tpu.pipeline_mode<synchronous>, transform_indices = @transform_2, window_bounds = array<i64: 1, 32>}, {transform_indices = @transform_3, window_bounds = array<i64: 256, 32>}]} {
    %c0 = arith.constant 0 : index
    %c0_0 = arith.constant 0 : index
    %0 = vector.load %arg1[%c0, %c0_0] : memref<256x64xf32, #tpu.memory_space<vmem>>, vector<256x64xf32>
    %c0_1 = arith.constant 0 : index
    %c0_2 = arith.constant 0 : index
    %1 = vector.load %arg2[%c0_1, %c0_2] : memref<64x32xf32, #tpu.memory_space<vmem>>, vector<64x32xf32>
    %cst = arith.constant dense<0.000000e+00> : vector<256x32xf32>
    %2 = tpu.matmul %0, %1, %cst {dimension_numbers = #tpu.dot_dimension_numbers<[1], [0], [0], [1], [0, 0, 1, 1], [], []>} : vector<256x64xf32>, vector<64x32xf32>, vector<256x32xf32> -> vector<256x32xf32>
    %c0_3 = arith.constant 0 : index
    %c0_4 = arith.constant 0 : index
    %3 = vector.load %arg3[%c0_3, %c0_4] : memref<1x32xf32, #tpu.memory_space<vmem>>, vector<1x32xf32>
    %4 = vector.broadcast %3 : vector<1x32xf32> to vector<256x32xf32>
    %5 = arith.addf %2, %4 : vector<256x32xf32>
    %cst_5 = arith.constant 0.000000e+00 : f32
    %6 = vector.broadcast %cst_5 : f32 to vector<256x32xf32>
    %7 = arith.maximumf %5, %6 : vector<256x32xf32>
    %8 = arith.truncf %7 : vector<256x32xf32> to vector<256x32xbf16>
    %c0_6 = arith.constant 0 : index
    %c0_7 = arith.constant 0 : index
    %9 = vector.load %arg4[%c0_6, %c0_7] : memref<256x32xbf16, #tpu.memory_space<vmem>>, vector<256x32xbf16>
    tpu.vector_store %arg4[%c0_6, %c0_7], %8 {strides = array<i32>} : memref<256x32xbf16, #tpu.memory_space<vmem>>, vector<256x32xbf16>,
    return
  }
  func.func @transform_0(%arg0: i32) -> (i32, i32) {
    %c0_i32 = arith.constant 0 : i32
    %c0_i32_0 = arith.constant 0 : i32
    return %arg0, %c0_i32 : i32, i32
  }
  func.func @transform_1(%arg0: i32) -> (i32, i32) {
    %c0_i32 = arith.constant 0 : i32
    %c0_i32_0 = arith.constant 0 : i32
    %c0_i32_1 = arith.constant 0 : i32
    return %c0_i32, %c0_i32_0 : i32, i32
  }
  func.func @transform_2(%arg0: i32) -> (i32, i32) {
    %c0_i32 = arith.constant 0 : i32
    %c0_i32_0 = arith.constant 0 : i32
    %c0_i32_1 = arith.constant 0 : i32
    return %c0_i32, %c0_i32_0 : i32, i32
  }
  func.func @transform_3(%arg0: i32) -> (i32, i32) {
    %c0_i32 = arith.constant 0 : i32
    %c0_i32_0 = arith.constant 0 : i32
    return %arg0, %c0_i32 : i32, i32
  }
}

module attributes {stable_mosaic.version = 11 : i64} {
  func.func @_proj_kernel(%arg0: i32, %arg1: i32, %arg2: memref<1x256x32xbf16, #tpu.memory_space<vmem>>, %arg3: memref<1x256x32xbf16, #tpu.memory_space<vmem>>, %arg4: memref<1x256x32xbf16, #tpu.memory_space<vmem>>, %arg5: memref<1x256x32xbf16, #tpu.memory_space<vmem>>, %arg6: memref<1x1x32xf32, #tpu.memory_space<vmem>>, %arg7: memref<1x32xf32, #tpu.memory_space<vmem>>, %arg8: memref<32x32xbf16, #tpu.memory_space<vmem>>, %arg9: memref<32x32xbf16, #tpu.memory_space<vmem>>, %arg10: memref<32x32xbf16, #tpu.memory_space<vmem>>, %arg11: memref<32x32xbf16, #tpu.memory_space<vmem>>, %arg12: memref<1x256x32xf32, #tpu.memory_space<vmem>>) attributes {dimension_semantics = [#tpu.dimension_semantics<parallel>, #tpu.dimension_semantics<parallel>], iteration_bounds = array<i64: 2, 1>, scalar_prefetch = 0 : i64, scratch_operands = 0 : i64, tpu.core_type = #tpu.core_type<tc>, window_params = [{transform_indices = @transform_0, window_bounds = array<i64: 1, 256, 32>}, {transform_indices = @transform_1, window_bounds = array<i64: 1, 256, 32>}, {transform_indices = @transform_2, window_bounds = array<i64: 1, 256, 32>}, {transform_indices = @transform_3, window_bounds = array<i64: 1, 256, 32>}, {transform_indices = @transform_4, window_bounds = array<i64: 1, 1, 32>}, {pipeline_mode = #tpu.pipeline_mode<synchronous>, transform_indices = @transform_5, window_bounds = array<i64: 1, 32>}, {pipeline_mode = #tpu.pipeline_mode<synchronous>, transform_indices = @transform_6, window_bounds = array<i64: 32, 32>}, {pipeline_mode = #tpu.pipeline_mode<synchronous>, transform_indices = @transform_7, window_bounds = array<i64: 32, 32>}, {pipeline_mode = #tpu.pipeline_mode<synchronous>, transform_indices = @transform_8, window_bounds = array<i64: 32, 32>}, {pipeline_mode = #tpu.pipeline_mode<synchronous>, transform_indices = @transform_9, window_bounds = array<i64: 32, 32>}, {transform_indices = @transform_10, window_bounds = array<i64: 1, 256, 32>}]} {
    %c0 = arith.constant 0 : index
    %c0_0 = arith.constant 0 : index
    %c0_1 = arith.constant 0 : index
    %0 = vector.load %arg2[%c0, %c0_0, %c0_1] : memref<1x256x32xbf16, #tpu.memory_space<vmem>>, vector<1x256x32xbf16>
    %1 = vector.shape_cast %0 : vector<1x256x32xbf16> to vector<256x32xbf16>
    %c0_2 = arith.constant 0 : index
    %c0_3 = arith.constant 0 : index
    %2 = vector.load %arg8[%c0_2, %c0_3] : memref<32x32xbf16, #tpu.memory_space<vmem>>, vector<32x32xbf16>
    %cst = arith.constant dense<0.000000e+00> : vector<256x32xf32>
    %3 = tpu.matmul %1, %2, %cst {dimension_numbers = #tpu.dot_dimension_numbers<[1], [0], [0], [1], [0, 0, 1, 1], [], []>} : vector<256x32xbf16>, vector<32x32xbf16>, vector<256x32xf32> -> vector<256x32xf32>
    %c0_4 = arith.constant 0 : index
    %c0_5 = arith.constant 0 : index
    %c0_6 = arith.constant 0 : index
    %4 = vector.load %arg3[%c0_4, %c0_5, %c0_6] : memref<1x256x32xbf16, #tpu.memory_space<vmem>>, vector<1x256x32xbf16>
    %5 = vector.shape_cast %4 : vector<1x256x32xbf16> to vector<256x32xbf16>
    %c0_7 = arith.constant 0 : index
    %c0_8 = arith.constant 0 : index
    %6 = vector.load %arg9[%c0_7, %c0_8] : memref<32x32xbf16, #tpu.memory_space<vmem>>, vector<32x32xbf16>
    %cst_9 = arith.constant dense<0.000000e+00> : vector<256x32xf32>
    %7 = tpu.matmul %5, %6, %cst_9 {dimension_numbers = #tpu.dot_dimension_numbers<[1], [0], [0], [1], [0, 0, 1, 1], [], []>} : vector<256x32xbf16>, vector<32x32xbf16>, vector<256x32xf32> -> vector<256x32xf32>
    %8 = arith.addf %3, %7 : vector<256x32xf32>
    %c0_10 = arith.constant 0 : index
    %c0_11 = arith.constant 0 : index
    %c0_12 = arith.constant 0 : index
    %9 = vector.load %arg4[%c0_10, %c0_11, %c0_12] : memref<1x256x32xbf16, #tpu.memory_space<vmem>>, vector<1x256x32xbf16>
    %10 = vector.shape_cast %9 : vector<1x256x32xbf16> to vector<256x32xbf16>
    %c0_13 = arith.constant 0 : index
    %c0_14 = arith.constant 0 : index
    %11 = vector.load %arg10[%c0_13, %c0_14] : memref<32x32xbf16, #tpu.memory_space<vmem>>, vector<32x32xbf16>
    %cst_15 = arith.constant dense<0.000000e+00> : vector<256x32xf32>
    %12 = tpu.matmul %10, %11, %cst_15 {dimension_numbers = #tpu.dot_dimension_numbers<[1], [0], [0], [1], [0, 0, 1, 1], [], []>} : vector<256x32xbf16>, vector<32x32xbf16>, vector<256x32xf32> -> vector<256x32xf32>
    %13 = arith.addf %8, %12 : vector<256x32xf32>
    %c0_16 = arith.constant 0 : index
    %c0_17 = arith.constant 0 : index
    %c0_18 = arith.constant 0 : index
    %14 = vector.load %arg5[%c0_16, %c0_17, %c0_18] : memref<1x256x32xbf16, #tpu.memory_space<vmem>>, vector<1x256x32xbf16>
    %15 = vector.shape_cast %14 : vector<1x256x32xbf16> to vector<256x32xbf16>
    %c0_19 = arith.constant 0 : index
    %c0_20 = arith.constant 0 : index
    %16 = vector.load %arg11[%c0_19, %c0_20] : memref<32x32xbf16, #tpu.memory_space<vmem>>, vector<32x32xbf16>
    %cst_21 = arith.constant dense<0.000000e+00> : vector<256x32xf32>
    %17 = tpu.matmul %15, %16, %cst_21 {dimension_numbers = #tpu.dot_dimension_numbers<[1], [0], [0], [1], [0, 0, 1, 1], [], []>} : vector<256x32xbf16>, vector<32x32xbf16>, vector<256x32xf32> -> vector<256x32xf32>
    %18 = arith.addf %13, %17 : vector<256x32xf32>
    %c0_22 = arith.constant 0 : index
    %c0_23 = arith.constant 0 : index
    %c0_24 = arith.constant 0 : index
    %19 = vector.load %arg6[%c0_22, %c0_23, %c0_24] : memref<1x1x32xf32, #tpu.memory_space<vmem>>, vector<1x1x32xf32>
    %20 = vector.shape_cast %19 : vector<1x1x32xf32> to vector<1x32xf32>
    %21 = vector.broadcast %20 : vector<1x32xf32> to vector<256x32xf32>
    %22 = arith.addf %18, %21 : vector<256x32xf32>
    %c0_25 = arith.constant 0 : index
    %c0_26 = arith.constant 0 : index
    %23 = vector.load %arg7[%c0_25, %c0_26] : memref<1x32xf32, #tpu.memory_space<vmem>>, vector<1x32xf32>
    %24 = vector.broadcast %23 : vector<1x32xf32> to vector<256x32xf32>
    %25 = arith.addf %22, %24 : vector<256x32xf32>
    %cst_27 = arith.constant 0.000000e+00 : f32
    %26 = vector.broadcast %cst_27 : f32 to vector<256x32xf32>
    %27 = arith.maximumf %25, %26 : vector<256x32xf32>
    %c0_28 = arith.constant 0 : index
    %c0_29 = arith.constant 0 : index
    %c0_30 = arith.constant 0 : index
    %28 = vector.load %arg12[%c0_28, %c0_29, %c0_30] : memref<1x256x32xf32, #tpu.memory_space<vmem>>, vector<1x256x32xf32>
    %29 = vector.shape_cast %28 : vector<1x256x32xf32> to vector<256x32xf32>
    %30 = vector.shape_cast %27 : vector<256x32xf32> to vector<1x256x32xf32>
    tpu.vector_store %arg12[%c0_28, %c0_29, %c0_30], %30 {strides = array<i32>} : memref<1x256x32xf32, #tpu.memory_space<vmem>>, vector<1x256x32xf32>,
    return
  }
  func.func @transform_0(%arg0: i32, %arg1: i32) -> (i32, i32, i32) {
    %c0_i32 = arith.constant 0 : i32
    %c0_i32_0 = arith.constant 0 : i32
    return %arg0, %arg1, %c0_i32 : i32, i32, i32
  }
  func.func @transform_1(%arg0: i32, %arg1: i32) -> (i32, i32, i32) {
    %c0_i32 = arith.constant 0 : i32
    %c0_i32_0 = arith.constant 0 : i32
    return %arg0, %arg1, %c0_i32 : i32, i32, i32
  }
  func.func @transform_2(%arg0: i32, %arg1: i32) -> (i32, i32, i32) {
    %c0_i32 = arith.constant 0 : i32
    %c0_i32_0 = arith.constant 0 : i32
    return %arg0, %arg1, %c0_i32 : i32, i32, i32
  }
  func.func @transform_3(%arg0: i32, %arg1: i32) -> (i32, i32, i32) {
    %c0_i32 = arith.constant 0 : i32
    %c0_i32_0 = arith.constant 0 : i32
    return %arg0, %arg1, %c0_i32 : i32, i32, i32
  }
  func.func @transform_4(%arg0: i32, %arg1: i32) -> (i32, i32, i32) {
    %c0_i32 = arith.constant 0 : i32
    %c0_i32_0 = arith.constant 0 : i32
    %c0_i32_1 = arith.constant 0 : i32
    return %arg0, %c0_i32, %c0_i32_0 : i32, i32, i32
  }
  func.func @transform_5(%arg0: i32, %arg1: i32) -> (i32, i32) {
    %c0_i32 = arith.constant 0 : i32
    %c0_i32_0 = arith.constant 0 : i32
    %c0_i32_1 = arith.constant 0 : i32
    return %c0_i32, %c0_i32_0 : i32, i32
  }
  func.func @transform_6(%arg0: i32, %arg1: i32) -> (i32, i32) {
    %c0_i32 = arith.constant 0 : i32
    %c0_i32_0 = arith.constant 0 : i32
    %c0_i32_1 = arith.constant 0 : i32
    return %c0_i32, %c0_i32_0 : i32, i32
  }
  func.func @transform_7(%arg0: i32, %arg1: i32) -> (i32, i32) {
    %c0_i32 = arith.constant 0 : i32
    %c0_i32_0 = arith.constant 0 : i32
    %c0_i32_1 = arith.constant 0 : i32
    return %c0_i32, %c0_i32_0 : i32, i32
  }
  func.func @transform_8(%arg0: i32, %arg1: i32) -> (i32, i32) {
    %c0_i32 = arith.constant 0 : i32
    %c0_i32_0 = arith.constant 0 : i32
    %c0_i32_1 = arith.constant 0 : i32
    return %c0_i32, %c0_i32_0 : i32, i32
  }
  func.func @transform_9(%arg0: i32, %arg1: i32) -> (i32, i32) {
    %c0_i32 = arith.constant 0 : i32
    %c0_i32_0 = arith.constant 0 : i32
    %c0_i32_1 = arith.constant 0 : i32
    return %c0_i32, %c0_i32_0 : i32, i32
  }
  func.func @transform_10(%arg0: i32, %arg1: i32) -> (i32, i32, i32) {
    %c0_i32 = arith.constant 0 : i32
    %c0_i32_0 = arith.constant 0 : i32
    return %arg0, %arg1, %c0_i32 : i32, i32, i32
  }
}

</mosaic_0001>

<bundles_post_ra>
// kernel: aspp_forward.6
= control target key start
LH: loop header
LB: loop body
LE: loop exit
PB: predicated region body
PF: predicated region fallthrough
CT: control target
= control target key end

     0   :  { %s697_s15 = smov 0   ;;  %s799_s0 = inlined_call_operand.vmem [shape: f32[2,16,16,64], index: 0, kind: input, shape index: {}]   ;;  %s800_s1 = inlined_call_operand.vmem [shape: f32[64,32], index: 1, kind: input, shape index: {}]   ;;  %s801_s2 = inlined_call_operand.vmem [shape: f32[1,32], index: 2, kind: input, shape index: {}]   ;;  %s802_s3 = inlined_call_operand.vmem [shape: f32[32,32], index: 3, kind: input, shape index: {}]   ;;  %s803_s4 = inlined_call_operand.vmem [shape: f32[2,1,32], index: 4, kind: output, shape index: {}]  }
   0x1 LB: > { %s507_s16 = sadd.s32 4294967295, %s666_s15   ;;  %p511_p0 = scmp.ge.s32.totalorder %s666_s15, 1  ;;  %s666_s15 = sphi %s697_s15, %s14_s15  }
   0x2   : > { %p162_p1 = scmp.lt.s32.totalorder %s666_s15, 3 }
   0x4   : > { %p163_p2 = pnand %p511_p0, %p162_p1 }
   0x5   : > { %p186_p3 = scmp.lt.s32.totalorder (!%p163_p2), %s507_s16, 1  ;;  %v296_v0 = vld [vmem:[%s800_s1] sm:$0xff] (!%p163_p2)  ;;  %v297_v1 = vld [vmem:[%s800_s1 + $0x8] sm:$0xff] (!%p163_p2)  ;;  %v298_v2 = vld [vmem:[%s800_s1 + $0x10] sm:$0xff] (!%p163_p2)  ;;  %v668_v3 = vmov (!%p163_p2), 0.00390625   ;;  %v669_v4 = vmov (!%p163_p2), 0.0|0.0  }
   0x6   : > { %166 = sbr.rel (%p163_p2) target bundleno = 695 (0x2b7), region = 36  ;;  %290 = vmatprep.mubr.f32.mxu0 (!%p163_p2), %v668_v3  ;;  %630 = vmatprep.subr.bf16.mxu1 (!%p163_p2), %v669_v4  ;;  %v631_v5 = vpack.c.bf16 (!%p163_p2), %v297_v1, %v296_v0  ;;  %v299_v6 = vld [vmem:[%s800_s1 + $0x18] sm:$0xff] (!%p163_p2)  ;;  %v300_v8 = vld [vmem:[%s800_s1 + $0x20] sm:$0xff] (!%p163_p2)  ;;  %v301_v9 = vld [vmem:[%s800_s1 + $0x28] sm:$0xff] (!%p163_p2)  ;;  %vm670_vm0 = vmmov (!%p163_p2), 0   ;;  %v671_v62 = vmov (!%p163_p2), 0.0  }
   0x7   : > { %v634_v7 = vpack.c.bf16 (!%p163_p2), %v299_v6, %v298_v2  ;;  %v637_v17 = vpack.c.bf16 (!%p163_p2), %v301_v9, %v300_v8  ;;  %v302_v59 = vld [vmem:[%s800_s1 + $0x30] sm:$0xff] (!%p163_p2)  ;;  %v303_v60 = vld [vmem:[%s800_s1 + $0x38] sm:$0xff] (!%p163_p2)  ;;  %584 = vmatprep.mubr.msk.f32.mxu1 (!%p163_p2), %vm670_vm0, %v671_v62  ;;  %v380_v63 = vld [vmem:[%s802_s3] sm:$0xff] (!%p163_p2)  ;;  %vm305_vm1 = vcmask (!%p163_p2), 523264   ;;  %vm384_vm2 = vcmask (!%p163_p2), 261120  }
   0x8   : > { %632 = vmatpush3.bf16.msra.mxu1 (!%p163_p2), %v631_v5  ;;  %v640_v61 = vpack.c.bf16 (!%p163_p2), %v303_v60, %v302_v59  ;;  %v381_v0 = vld [vmem:[%s802_s3 + $0x8] sm:$0xff] (!%p163_p2)  ;;  %v382_v6 = vld [vmem:[%s802_s3 + $0x10] sm:$0xff] (!%p163_p2)  ;;  %v304_v9 = vld [vmem:[%s801_s2] sm:$0x1] (!%p163_p2)  ;;  %vm458_vm3 = vcmask (!%p163_p2), 253952  }
   0x9   : > { %633 = vmatprep.subr.bf16.mxu1 (!%p163_p2), %v669_v4 }
   0xc   : > { %635 = vmatpush3.bf16.msra.mxu1 (!%p163_p2), %v634_v7  ;;  %v383_v7 = vld [vmem:[%s802_s3 + $0x18] sm:$0xff] (!%p163_p2) }
   0xd   : > { %s805_s16 = smov (!%p186_p3, %s507_s16), 1  ;;  %636 = vmatprep.subr.bf16.mxu1 %v669_v4  ;;  %v646_v8 = vpack.c.bf16 %v383_v7, %v382_v6 }
   0xe   : > { %s518_s25 = sshll.u32 %s805_s16, 8 }
   0xf   : > { %s732_s6 = scalar_lea.vmem %s799_s0, %s518_s25  ;;  %s193_s25 = scalar_lea.vmem %s803_s4, %s805_s16 }
  0x10   : > { %v210_v10 = vld [vmem:[%s732_s6 + $0x80] sm:$0xff]  ;;  %v211_v11 = vld [vmem:[%s732_s6 + $0x88] sm:$0xff]  ;;  %v212_v15 = vld [vmem:[%s732_s6 + $0x90] sm:$0xff]  ;;  %638 = vmatpush3.bf16.msra.mxu1 %v637_v17 }
  0x11   : > { %v194_v12 = vld [vmem:[%s732_s6] sm:$0xff]  ;;  %v598_v13 = vpack.c.bf16 %v211_v11, %v210_v10  ;;  %v195_v14 = vld [vmem:[%s732_s6 + $0x8] sm:$0xff]  ;;  %v213_v16 = vld [vmem:[%s732_s6 + $0x98] sm:$0xff]  ;;  %639 = vmatprep.subr.bf16.mxu1 %v669_v4 }
  0x12   : > { %v600_v18 = vpack.c.bf16 %v195_v14, %v194_v12  ;;  %v602_v19 = vpack.c.bf16 %v213_v16, %v212_v15  ;;  %v196_v20 = vld [vmem:[%s732_s6 + $0x10] sm:$0xff]  ;;  %v197_v21 = vld [vmem:[%s732_s6 + $0x18] sm:$0xff]  ;;  %v214_v22 = vld [vmem:[%s732_s6 + $0xa0] sm:$0xff] }
  0x13   : > { %599 = vmatprep.subr.bf16.mxu0 %v598_v13  ;;  %v215_v23 = vld [vmem:[%s732_s6 + $0xa8] sm:$0xff]  ;;  %v604_v24 = vpack.c.bf16 %v197_v21, %v196_v20  ;;  %v198_v26 = vld [vmem:[%s732_s6 + $0x20] sm:$0xff]  ;;  %v216_v28 = vld [vmem:[%s732_s6 + $0xb0] sm:$0xff] }
  0x14   : > { %601 = vmatpush3.bf16.msra.mxu0 %v600_v18  ;;  %v606_v25 = vpack.c.bf16 %v215_v23, %v214_v22  ;;  %v199_v27 = vld [vmem:[%s732_s6 + $0x28] sm:$0xff]  ;;  %v217_v29 = vld [vmem:[%s732_s6 + $0xb8] sm:$0xff]  ;;  %v200_v32 = vld [vmem:[%s732_s6 + $0x30] sm:$0xff]  ;;  %641 = vmatpush3.bf16.msra.mxu1 %v640_v61 }
  0x15   : > { %603 = vmatprep.subr.bf16.mxu0 %v602_v19  ;;  %v608_v30 = vpack.c.bf16 %v199_v27, %v198_v26  ;;  %v610_v31 = vpack.c.bf16 %v217_v29, %v216_v28  ;;  %v201_v33 = vld [vmem:[%s732_s6 + $0x38] sm:$0xff]  ;;  %v218_v34 = vld [vmem:[%s732_s6 + $0xc0] sm:$0xff]  ;;  %v219_v35 = vld [vmem:[%s732_s6 + $0xc8] sm:$0xff]  ;;  %642 = vmatprep.subr.bf16.mxu1 %v669_v4 }
  0x16   : > { %v612_v36 = vpack.c.bf16 %v201_v33, %v200_v32  ;;  %v614_v37 = vpack.c.bf16 %v219_v35, %v218_v34  ;;  %v202_v38 = vld [vmem:[%s732_s6 + $0x40] sm:$0xff]  ;;  %v203_v39 = vld [vmem:[%s732_s6 + $0x48] sm:$0xff]  ;;  %v220_v40 = vld [vmem:[%s732_s6 + $0xd0] sm:$0xff] }
  0x17   : > { %v221_v41 = vld [vmem:[%s732_s6 + $0xd8] sm:$0xff]  ;;  %v616_v42 = vpack.c.bf16 %v203_v39, %v202_v38  ;;  %v204_v44 = vld [vmem:[%s732_s6 + $0x50] sm:$0xff]  ;;  %v222_v46 = vld [vmem:[%s732_s6 + $0xe0] sm:$0xff] }
  0x18   : > { %605 = vmatpush3.bf16.msra.mxu0 %v604_v24  ;;  %v618_v43 = vpack.c.bf16 %v221_v41, %v220_v40  ;;  %v205_v45 = vld [vmem:[%s732_s6 + $0x58] sm:$0xff]  ;;  %v223_v47 = vld [vmem:[%s732_s6 + $0xe8] sm:$0xff]  ;;  %v206_v50 = vld [vmem:[%s732_s6 + $0x60] sm:$0xff] }
  0x19   : > { %607 = vmatprep.subr.bf16.mxu0 %v606_v25  ;;  %v620_v48 = vpack.c.bf16 %v205_v45, %v204_v44  ;;  %v622_v49 = vpack.c.bf16 %v223_v47, %v222_v46  ;;  %v207_v51 = vld [vmem:[%s732_s6 + $0x68] sm:$0xff]  ;;  %v224_v52 = vld [vmem:[%s732_s6 + $0xf0] sm:$0xff]  ;;  %v225_v53 = vld [vmem:[%s732_s6 + $0xf8] sm:$0xff] }
  0x1a   : > { %v624_v54 = vpack.c.bf16 %v207_v51, %v206_v50  ;;  %v626_v55 = vpack.c.bf16 %v225_v53, %v224_v52  ;;  %v208_v56 = vld [vmem:[%s732_s6 + $0x70] sm:$0xff]  ;;  %v209_v57 = vld [vmem:[%s732_s6 + $0x78] sm:$0xff] }
  0x1b   : > { %v628_v58 = vpack.c.bf16 %v209_v57, %v208_v56 }
  0x1c   : > { %609 = vmatpush3.bf16.msra.mxu0 %v608_v30 }
  0x1d   : > { %611 = vmatprep.subr.bf16.mxu0 %v610_v31 }
  0x20   : > { %613 = vmatpush3.bf16.msra.mxu0 %v612_v36 }
  0x21   : > { %615 = vmatprep.subr.bf16.mxu0 %v614_v37 }
  0x24   : > { %617 = vmatpush3.bf16.msra.mxu0 %v616_v42 }
  0x25   : > { %619 = vmatprep.subr.bf16.mxu0 %v618_v43 }
  0x28   : > { %621 = vmatpush3.bf16.msra.mxu0 %v620_v48 }
  0x29   : > { %623 = vmatprep.subr.bf16.mxu0 %v622_v49 }
  0x2c   : > { %625 = vmatpush3.bf16.msra.mxu0 %v624_v54 }
  0x2d   : > { %627 = vmatprep.subr.bf16.mxu0 %v626_v55 }
  0x30   : > { %629 = vmatpush3.bf16.msra.mxu0 %v628_v58 }
  0x33   : > { %291 = vmatmul.mubr.f32.vlgmr.msra.gmra.mrb[0].mxu0 %v668_v3  ;;  %v643_v3 = vpack.c.bf16 %v381_v0, %v380_v63 }
 0x106   : > { %v551_v1 = vpop.f32.mrb[0].mxu0 }
 0x107   : > { %v552_v2 = vpop.f32.mrb[1].mxu0 }
 0x108   : > { %v553_v5 = vadd.f32 %v552_v2, %v551_v1 }
 0x10a   : > { %585 = vmatmul.mubr.msk.f32.vlgmr.msra.gmra.mrb[0].mxu1 %vm305_vm1, %v553_v5 }
 0x10b   : > { %644 = vmatpush3.bf16.msra.mxu1 %v643_v3  ;;  %595 = vmatprep.mubr.msk.f32.mxu1 %vm670_vm0, %v671_v62 }
 0x10c   : > { %645 = vmatprep.subr.bf16.mxu1 %v669_v4 }
 0x10f   : > { %647 = vmatpush3.bf16.msra.mxu1 %v646_v8 }
 0x1dd   : > { %v375_v10 = vpop.f32.mrb[0].mxu1 }
 0x1de   : > { %v376_v11 = vadd.f32 %v375_v10, %v304_v9  ;;  %v586_v12 = vpop.f32.mrb[1].mxu1 }
 0x1e0   : > { %v379_v13 = vmax.f32 %v376_v11, 0.0 }
 0x1e2   : > { %596 = vmatmul.mubr.msk.f32.vlgmr.msra.gmra.mrb[2].mxu1 %vm384_vm2, %v379_v13 }
 0x2b5   : > { %v454_v4 = vpop.f32.mrb[2].mxu1 }
 0x2b6   : > { %459 = vst.msk [vmem:[%s193_s25] sm:$0x1] %vm458_vm3, %v454_v4  ;;  %v597_v14 = vpop.f32.mrb[3].mxu1 }
 0x2b7 PF: > { %s14_s15 = sadd.s32 1, %s666_s15  }
 0x2b8   : > { %p11_p4 = scmp.ge.s32.totalorder %s14_s15, 4  }
 0x2ba   :  { %13 = sbr.rel (!%p11_p4) target bundleno = 1 (0x1), region = 66 }

// kernel: aspp_forward.10
= control target key start
LH: loop header
LB: loop body
LE: loop exit
PB: predicated region body
PF: predicated region fallthrough
CT: control target
= control target key end

     0   :  { %s1300_s18 = smov 0   ;;  %s1626_s0 = inlined_call_operand.vmem [shape: f32[2,16,16,64], index: 0, kind: input, shape index: {}]   ;;  %s1627_s1 = inlined_call_operand.vmem [shape: f32[9,64], index: 1, kind: input, shape index: {}]   ;;  %s1628_s2 = inlined_call_operand.vmem [shape: f32[1,64], index: 2, kind: input, shape index: {}]   ;;  %s1629_s3 = inlined_call_operand.vmem [shape: f32[64,32], index: 3, kind: input, shape index: {}]   ;;  %s1630_s4 = inlined_call_operand.vmem [shape: f32[1,32], index: 4, kind: input, shape index: {}]   ;;  %s1631_s5 = inlined_call_operand.vmem [shape: bf16[2,16,16,32], index: 5, kind: output, shape index: {}]  }
   0x1 LB: > { %s1014_s19 = sadd.s32 4294967295, %s1268_s18   ;;  %p1018_p0 = scmp.ge.s32.totalorder %s1268_s18, 1  ;;  %s1268_s18 = sphi %s1300_s18, %s15_s18  }
   0x2   : > { %p187_p1 = scmp.lt.s32.totalorder %s1268_s18, 3 }
   0x4   : > { %p188_p2 = pnand %p1018_p0, %p187_p1 }
   0x5   : > { %v430_v0 = vld [vmem:[%s1629_s3] sm:$0xff] (!%p188_p2)  ;;  %v431_v1 = vld [vmem:[%s1629_s3 + $0x8] sm:$0xff] (!%p188_p2)  ;;  %v432_v2 = vld [vmem:[%s1629_s3 + $0x10] sm:$0xff] (!%p188_p2)  ;;  %p215_p3 = scmp.lt.s32.totalorder (!%p188_p2), %s1014_s19, 1  ;;  %vm294_vm0 = vcmask (!%p188_p2), 523264   ;;  %vm926_vm1 = vcmask (!%p188_p2), 257024  }
   0x6   : > { %191 = sbr.rel (%p188_p2) target bundleno = 284 (0x11c), region = 40  ;;  %v1230_v3 = vpack.c.bf16 (!%p188_p2), %v431_v1, %v430_v0  ;;  %v433_v4 = vld [vmem:[%s1629_s3 + $0x18] sm:$0xff] (!%p188_p2)  ;;  %v434_v6 = vld [vmem:[%s1629_s3 + $0x20] sm:$0xff] (!%p188_p2)  ;;  %v435_v7 = vld [vmem:[%s1629_s3 + $0x28] sm:$0xff] (!%p188_p2) }
   0x7   : > { %v1234_v5 = vpack.c.bf16 (!%p188_p2), %v433_v4, %v432_v2  ;;  %v436_v8 = vld [vmem:[%s1629_s3 + $0x30] sm:$0xff] (!%p188_p2)  ;;  %v437_v9 = vld [vmem:[%s1629_s3 + $0x38] sm:$0xff] (!%p188_p2)  ;;  %v1338_v10 = vld [vmem:[%s1627_s1 + $0x4] ss:$0 sm:$0xff] (!%p188_p2)  ;;  %v1238_v11 = vpack.c.bf16 (!%p188_p2), %v435_v7, %v434_v6 }
   0x8   : > { %1231 = vmatprep.subr.bf16.mxu0 (!%p188_p2), %v1230_v3  ;;  %1246 = vmatprep.subr.bf16.mxu1 (!%p188_p2), %v1230_v3  ;;  %v1348_v15 = vpack.c.bf16 (!%p188_p2), %v437_v9, %v436_v8  ;;  %v1392_v46 = vld [vmem:[%s1628_s2] ss:$0 sm:$0xff] (!%p188_p2) }
   0x9   : > { %1233 = vmatpush3.bf16.msra.mxu0 (!%p188_p2), %v1230_v3  ;;  %1250 = vmatpush3.bf16.msra.mxu1 (!%p188_p2), %v1230_v3 }
   0xa   : > { %1235 = vmatprep.subr.bf16.mxu0 (!%p188_p2), %v1234_v5  ;;  %1247 = vmatprep.subr.bf16.mxu1 (!%p188_p2), %v1234_v5 }
   0xd   : > { %s1633_s19 = smov (!%p215_p3, %s1014_s19), 1  ;;  %1237 = vmatpush3.bf16.msra.mxu0 %v1234_v5  ;;  %1251 = vmatpush3.bf16.msra.mxu1 %v1234_v5 }
   0xe   : > { %s1092_s11 = sshll.u32 %s1633_s19, 8  ;;  %1239 = vmatprep.subr.bf16.mxu0 %v1238_v11  ;;  %1248 = vmatprep.subr.bf16.mxu1 %v1238_v11  ;;  %s1093_s23 = sshll.u32 %s1633_s19, 7 }
   0xf   : > { %s1343_s16 = scalar_lea.vmem %s1626_s0, %s1092_s11  ;;  %s1529_s26 = scalar_lea.vmem %s1631_s5, %s1093_s23 }
  0x10   : > { %v225_v12 = vld [vmem:[%s1343_s16] sm:$0xff]  ;;  %v226_v14 = vld [vmem:[%s1343_s16 + $0x8] sm:$0xff]  ;;  %v227_v20 = vld [vmem:[%s1343_s16 + $0x10] sm:$0xff] }
  0x11   : > { %v241_v13 = vld [vmem:[%s1343_s16 + $0x80] sm:$0xff]  ;;  %v262_v16 = vmul.f32 %v1338_v10, %v225_v12  ;;  %v263_v18 = vmul.f32 %v1338_v10, %v226_v14  ;;  %v242_v19 = vld [vmem:[%s1343_s16 + $0x88] sm:$0xff]  ;;  %v243_v21 = vld [vmem:[%s1343_s16 + $0x90] sm:$0xff]  ;;  %v264_v23 = vmul.f32 %v1338_v10, %v227_v20  ;;  %1241 = vmatpush3.bf16.msra.mxu0 %v1238_v11  ;;  %1252 = vmatpush3.bf16.msra.mxu1 %v1238_v11 }
  0x12   : > { %v278_v17 = vmul.f32 %v1338_v10, %v241_v13  ;;  %v279_v22 = vmul.f32 %v1338_v10, %v242_v19  ;;  %v280_v24 = vmul.f32 %v1338_v10, %v243_v21  ;;  %v228_v25 = vld [vmem:[%s1343_s16 + $0x18] sm:$0xff]  ;;  %v229_v27 = vld [vmem:[%s1343_s16 + $0x20] sm:$0xff]  ;;  %v230_v32 = vld [vmem:[%s1343_s16 + $0x28] sm:$0xff]  ;;  %1243 = vmatprep.subr.bf16.mxu0 %v1348_v15  ;;  %1249 = vmatprep.subr.bf16.mxu1 %v1348_v15 }
  0x13   : > { %v244_v26 = vld [vmem:[%s1343_s16 + $0x98] sm:$0xff]  ;;  %295 = vst.msk [vmem:[#allocation2] sm:$0xff] %vm294_vm0, %v262_v16  ;;  %296 = vst.msk [vmem:[#allocation2 + $0x8] sm:$0xff] %vm294_vm0, %v263_v18  ;;  %v265_v28 = vmul.f32 %v1338_v10, %v228_v25  ;;  %v266_v30 = vmul.f32 %v1338_v10, %v229_v27  ;;  %v245_v31 = vld [vmem:[%s1343_s16 + $0xa0] sm:$0xff]  ;;  %v267_v35 = vmul.f32 %v1338_v10, %v230_v32 }
  0x14   : > { %311 = vst.msk [vmem:[#allocation2 + $0x80] sm:$0xff] %vm294_vm0, %v278_v17  ;;  %v281_v29 = vmul.f32 %v1338_v10, %v244_v26  ;;  %v246_v33 = vld [vmem:[%s1343_s16 + $0xa8] sm:$0xff]  ;;  %312 = vst.msk [vmem:[#allocation2 + $0x88] sm:$0xff] %vm294_vm0, %v279_v22  ;;  %v282_v34 = vmul.f32 %v1338_v10, %v245_v31  ;;  %v231_v37 = vld [vmem:[%s1343_s16 + $0x30] sm:$0xff] }
  0x15   : > { %297 = vst.msk [vmem:[#allocation2 + $0x10] sm:$0xff] %vm294_vm0, %v264_v23  ;;  %313 = vst.msk [vmem:[#allocation2 + $0x90] sm:$0xff] %vm294_vm0, %v280_v24  ;;  %v283_v36 = vmul.f32 %v1338_v10, %v246_v33  ;;  %v247_v38 = vld [vmem:[%s1343_s16 + $0xb0] sm:$0xff]  ;;  %v232_v39 = vld [vmem:[%s1343_s16 + $0x38] sm:$0xff]  ;;  %v268_v40 = vmul.f32 %v1338_v10, %v231_v37  ;;  %1245 = vmatpush3.bf16.msra.mxu0 %v1348_v15  ;;  %1253 = vmatpush3.bf16.msra.mxu1 %v1348_v15 }
  0x16   : > { %298 = vst.msk [vmem:[#allocation2 + $0x18] sm:$0xff] %vm294_vm0, %v265_v28  ;;  %314 = vst.msk [vmem:[#allocation2 + $0x98] sm:$0xff] %vm294_vm0, %v281_v29  ;;  %v284_v41 = vmul.f32 %v1338_v10, %v247_v38  ;;  %v269_v42 = vmul.f32 %v1338_v10, %v232_v39  ;;  %v248_v43 = vld [vmem:[%s1343_s16 + $0xb8] sm:$0xff]  ;;  %v233_v44 = vld [vmem:[%s1343_s16 + $0x40] sm:$0xff] }
  0x17   : > { %299 = vst.msk [vmem:[#allocation2 + $0x20] sm:$0xff] %vm294_vm0, %v266_v30  ;;  %v249_v45 = vld [vmem:[%s1343_s16 + $0xc0] sm:$0xff]  ;;  %315 = vst.msk [vmem:[#allocation2 + $0xa0] sm:$0xff] %vm294_vm0, %v282_v34  ;;  %v285_v47 = vmul.f32 %v1338_v10, %v248_v43  ;;  %v270_v48 = vmul.f32 %v1338_v10, %v233_v44  ;;  %v234_v50 = vld [vmem:[%s1343_s16 + $0x48] sm:$0xff] }
  0x18   : > { %300 = vst.msk [vmem:[#allocation2 + $0x28] sm:$0xff] %vm294_vm0, %v267_v35  ;;  %316 = vst.msk [vmem:[#allocation2 + $0xa8] sm:$0xff] %vm294_vm0, %v283_v36  ;;  %v286_v49 = vmul.f32 %v1338_v10, %v249_v45  ;;  %v250_v51 = vld [vmem:[%s1343_s16 + $0xc8] sm:$0xff]  ;;  %v235_v52 = vld [vmem:[%s1343_s16 + $0x50] sm:$0xff]  ;;  %v271_v53 = vmul.f32 %v1338_v10, %v234_v50 }
  0x19   : > { %301 = vst.msk [vmem:[#allocation2 + $0x30] sm:$0xff] %vm294_vm0, %v268_v40  ;;  %317 = vst.msk [vmem:[#allocation2 + $0xb0] sm:$0xff] %vm294_vm0, %v284_v41  ;;  %v287_v54 = vmul.f32 %v1338_v10, %v250_v51  ;;  %v272_v55 = vmul.f32 %v1338_v10, %v235_v52  ;;  %v251_v56 = vld [vmem:[%s1343_s16 + $0xd0] sm:$0xff]  ;;  %v236_v57 = vld [vmem:[%s1343_s16 + $0x58] sm:$0xff] }
  0x1a   : > { %302 = vst.msk [vmem:[#allocation2 + $0x38] sm:$0xff] %vm294_vm0, %v269_v42  ;;  %v252_v58 = vld [vmem:[%s1343_s16 + $0xd8] sm:$0xff]  ;;  %318 = vst.msk [vmem:[#allocation2 + $0xb8] sm:$0xff] %vm294_vm0, %v285_v47  ;;  %v288_v59 = vmul.f32 %v1338_v10, %v251_v56  ;;  %v273_v60 = vmul.f32 %v1338_v10, %v236_v57  ;;  %v237_v62 = vld [vmem:[%s1343_s16 + $0x60] sm:$0xff] }
  0x1b   : > { %303 = vst.msk [vmem:[#allocation2 + $0x40] sm:$0xff] %vm294_vm0, %v270_v48  ;;  %319 = vst.msk [vmem:[#allocation2 + $0xc0] sm:$0xff] %vm294_vm0, %v286_v49  ;;  %v289_v61 = vmul.f32 %v1338_v10, %v252_v58  ;;  %v253_v63 = vld [vmem:[%s1343_s16 + $0xe0] sm:$0xff]  ;;  %v238_v0 = vld [vmem:[%s1343_s16 + $0x68] sm:$0xff]  ;;  %v274_v1 = vmul.f32 %v1338_v10, %v237_v62 }
  0x1c   : > { %304 = vst.msk [vmem:[#allocation2 + $0x48] sm:$0xff] %vm294_vm0, %v271_v53  ;;  %320 = vst.msk [vmem:[#allocation2 + $0xc8] sm:$0xff] %vm294_vm0, %v287_v54  ;;  %v290_v2 = vmul.f32 %v1338_v10, %v253_v63  ;;  %v275_v3 = vmul.f32 %v1338_v10, %v238_v0  ;;  %v254_v4 = vld [vmem:[%s1343_s16 + $0xe8] sm:$0xff]  ;;  %v239_v5 = vld [vmem:[%s1343_s16 + $0x70] sm:$0xff] }
  0x1d   : > { %305 = vst.msk [vmem:[#allocation2 + $0x50] sm:$0xff] %vm294_vm0, %v272_v55  ;;  %v255_v6 = vld [vmem:[%s1343_s16 + $0xf0] sm:$0xff]  ;;  %v327_v7 = vld [vmem:[#allocation2] sm:$0xff]  ;;  %v328_v9 = vld [vmem:[#allocation2 + $0x8] sm:$0xff]  ;;  %v291_v11 = vmul.f32 %v1338_v10, %v254_v4  ;;  %v276_v12 = vmul.f32 %v1338_v10, %v239_v5 }
  0x1e   : > { %v343_v8 = vld [vmem:[#allocation2 + $0x80] sm:$0xff]  ;;  %321 = vst.msk [vmem:[#allocation2 + $0xd0] sm:$0xff] %vm294_vm0, %v288_v59  ;;  %306 = vst.msk [vmem:[#allocation2 + $0x58] sm:$0xff] %vm294_vm0, %v273_v60  ;;  %v292_v13 = vmul.f32 %v1338_v10, %v255_v6  ;;  %v366_v14 = vadd.f32 %v1392_v46, %v327_v7  ;;  %v367_v15 = vadd.f32 %v1392_v46, %v328_v9  ;;  %v344_v17 = vld [vmem:[#allocation2 + $0x88] sm:$0xff] }
  0x1f   : > { %322 = vst.msk [vmem:[#allocation2 + $0xd8] sm:$0xff] %vm294_vm0, %v289_v61  ;;  %v382_v16 = vadd.f32 %v1392_v46, %v343_v8  ;;  %v329_v18 = vld [vmem:[#allocation2 + $0x10] sm:$0xff]  ;;  %307 = vst.msk [vmem:[#allocation2 + $0x60] sm:$0xff] %vm294_vm0, %v274_v1  ;;  %v383_v20 = vadd.f32 %v1392_v46, %v344_v17  ;;  %v330_v23 = vld [vmem:[#allocation2 + $0x18] sm:$0xff] }
  0x20   : > { %v345_v19 = vld [vmem:[#allocation2 + $0x90] sm:$0xff]  ;;  %323 = vst.msk [vmem:[#allocation2 + $0xe0] sm:$0xff] %vm294_vm0, %v290_v2  ;;  %308 = vst.msk [vmem:[#allocation2 + $0x68] sm:$0xff] %vm294_vm0, %v275_v3  ;;  %v368_v21 = vadd.f32 %v1392_v46, %v329_v18  ;;  %v346_v24 = vld [vmem:[#allocation2 + $0x98] sm:$0xff]  ;;  %v398_v26 = vmax.f32 %v366_v14, 0.0  ;;  %v399_v28 = vmax.f32 %v367_v15, 0.0  ;;  %v369_v29 = vadd.f32 %v1392_v46, %v330_v23 }
  0x21   : > { %v384_v22 = vadd.f32 %v1392_v46, %v345_v19  ;;  %v331_v25 = vld [vmem:[#allocation2 + $0x20] sm:$0xff]  ;;  %324 = vst.msk [vmem:[#allocation2 + $0xe8] sm:$0xff] %vm294_vm0, %v291_v11  ;;  %309 = vst.msk [vmem:[#allocation2 + $0x70] sm:$0xff] %vm294_vm0, %v276_v12  ;;  %v414_v27 = vmax.f32 %v382_v16, 0.0  ;;  %v332_v31 = vld [vmem:[#allocation2 + $0x28] sm:$0xff]  ;;  %v415_v33 = vmax.f32 %v383_v20, 0.0  ;;  %v385_v36 = vadd.f32 %v1392_v46, %v346_v24 }
  0x22   : > { %325 = vst.msk [vmem:[#allocation2 + $0xf0] sm:$0xff] %vm294_vm0, %v292_v13  ;;  %v347_v30 = vld [vmem:[#allocation2 + $0xa0] sm:$0xff]  ;;  %v348_v32 = vld [vmem:[#allocation2 + $0xa8] sm:$0xff]  ;;  %v400_v34 = vmax.f32 %v368_v21, 0.0  ;;  %v333_v37 = vld [vmem:[#allocation2 + $0x30] sm:$0xff]  ;;  %1182 = vmatprep.mubr.msk.f32.mxu0 %vm294_vm0, %v398_v26  ;;  %v370_v39 = vadd.f32 %v1392_v46, %v331_v25  ;;  %v401_v41 = vmax.f32 %v369_v29, 0.0  ;;  %v371_v43 = vadd.f32 %v1392_v46, %v332_v31 }
  0x23   : > { %v416_v35 = vmax.f32 %v384_v22, 0.0  ;;  %v349_v38 = vld [vmem:[#allocation2 + $0xb0] sm:$0xff]  ;;  %1206 = vmatprep.mubr.msk.f32.mxu1 %vm294_vm0, %v414_v27  ;;  %v386_v40 = vadd.f32 %v1392_v46, %v347_v30  ;;  %1183 = vmatmul.mubr.msk.f32.vlgmr.msra.gmra.mrb[0].mxu0 %vm294_vm0, %v399_v28  ;;  %v417_v42 = vmax.f32 %v385_v36, 0.0  ;;  %v387_v44 = vadd.f32 %v1392_v46, %v348_v32  ;;  %v334_v45 = vld [vmem:[#allocation2 + $0x38] sm:$0xff]  ;;  %v335_v52 = vld [vmem:[#allocation2 + $0x40] sm:$0xff] }
  0x24   : > { %1207 = vmatmul.mubr.msk.f32.vlgmr.msra.gmra.mrb[0].mxu1 %vm294_vm0, %v415_v33  ;;  %1185 = vmatprep.mubr.msk.f32.mxu0 %vm294_vm0, %v400_v34  ;;  %v402_v47 = vmax.f32 %v370_v39, 0.0  ;;  %v372_v49 = vadd.f32 %v1392_v46, %v333_v37  ;;  %v388_v50 = vadd.f32 %v1392_v46, %v349_v38  ;;  %v350_v51 = vld [vmem:[#allocation2 + $0xb8] sm:$0xff]  ;;  %v351_v53 = vld [vmem:[#allocation2 + $0xc0] sm:$0xff]  ;;  %v373_v54 = vadd.f32 %v1392_v46, %v334_v45  ;;  %v336_v62 = vld [vmem:[#allocation2 + $0x48] sm:$0xff] }
  0x25   : > { %1209 = vmatprep.mubr.msk.f32.mxu1 %vm294_vm0, %v416_v35  ;;  %v418_v48 = vmax.f32 %v386_v40, 0.0  ;;  %v403_v55 = vmax.f32 %v371_v43, 0.0  ;;  %v419_v56 = vmax.f32 %v387_v44, 0.0  ;;  %v389_v57 = vadd.f32 %v1392_v46, %v350_v51  ;;  %v352_v63 = vld [vmem:[#allocation2 + $0xc8] sm:$0xff]  ;;  %v337_v0 = vld [vmem:[#allocation2 + $0x50] sm:$0xff]  ;;  %v240_v2 = vld [vmem:[%s1343_s16 + $0x78] sm:$0xff] }
  0x26   : > { %v404_v58 = vmax.f32 %v372_v49, 0.0  ;;  %v420_v59 = vmax.f32 %v388_v50, 0.0  ;;  %v374_v60 = vadd.f32 %v1392_v46, %v335_v52  ;;  %v390_v61 = vadd.f32 %v1392_v46, %v351_v53  ;;  %v353_v1 = vld [vmem:[#allocation2 + $0xd0] sm:$0xff]  ;;  %v256_v4 = vld [vmem:[%s1343_s16 + $0xf8] sm:$0xff]  ;;  %v339_v15 = vld [vmem:[#allocation2 + $0x60] sm:$0xff] }
  0x27   : > { %1186 = vmatmul.mubr.msk.f32.gmra.mrb[2].mxu0 %vm294_vm0, %v401_v41  ;;  %v405_v3 = vmax.f32 %v373_v54, 0.0  ;;  %v421_v5 = vmax.f32 %v389_v57, 0.0  ;;  %v375_v6 = vadd.f32 %v1392_v46, %v336_v62  ;;  %v391_v7 = vadd.f32 %v1392_v46, %v352_v63  ;;  %v338_v13 = vld [vmem:[#allocation2 + $0x58] sm:$0xff]  ;;  %v355_v17 = vld [vmem:[#allocation2 + $0xe0] sm:$0xff]  ;;  %v340_v26 = vld [vmem:[#allocation2 + $0x68] sm:$0xff] }
  0x28   : > { %1210 = vmatmul.mubr.msk.f32.gmra.mrb[2].mxu1 %vm294_vm0, %v417_v42  ;;  %1188 = vmatprep.mubr.msk.f32.mxu0 %vm294_vm0, %v402_v47  ;;  %v376_v8 = vadd.f32 %v1392_v46, %v337_v0  ;;  %v406_v9 = vmax.f32 %v374_v60, 0.0  ;;  %v422_v11 = vmax.f32 %v390_v61, 0.0  ;;  %v392_v12 = vadd.f32 %v1392_v46, %v353_v1  ;;  %v354_v14 = vld [vmem:[#allocation2 + $0xd8] sm:$0xff]  ;;  %v356_v27 = vld [vmem:[#allocation2 + $0xe8] sm:$0xff]  ;;  %v341_v28 = vld [vmem:[#allocation2 + $0x70] sm:$0xff] }
  0x29   : > { %1212 = vmatprep.mubr.msk.f32.mxu1 %vm294_vm0, %v418_v48  ;;  %v277_v16 = vmul.f32 %v1338_v10, %v240_v2  ;;  %v293_v18 = vmul.f32 %v1338_v10, %v256_v4  ;;  %v407_v19 = vmax.f32 %v375_v6, 0.0  ;;  %v423_v20 = vmax.f32 %v391_v7, 0.0  ;;  %v357_v29 = vld [vmem:[#allocation2 + $0xf0] sm:$0xff] }
  0x2a   : > { %v377_v21 = vadd.f32 %v1392_v46, %v338_v13  ;;  %v393_v22 = vadd.f32 %v1392_v46, %v354_v14  ;;  %v408_v23 = vmax.f32 %v376_v8, 0.0  ;;  %v424_v10 = vmax.f32 %v392_v12, 0.0 }
  0x2b   : > { %1189 = vmatmul.mubr.msk.f32.gmra.mrb[4].mxu0 %vm294_vm0, %v403_v55  ;;  %310 = vst.msk [vmem:[#allocation2 + $0x78] sm:$0xff] %vm294_vm0, %v277_v16  ;;  %326 = vst.msk [vmem:[#allocation2 + $0xf8] sm:$0xff] %vm294_vm0, %v293_v18  ;;  %v378_v24 = vadd.f32 %v1392_v46, %v339_v15  ;;  %v394_v25 = vadd.f32 %v1392_v46, %v355_v17  ;;  %v379_v32 = vadd.f32 %v1392_v46, %v340_v26 }
  0x2c   : > { %1213 = vmatmul.mubr.msk.f32.gmra.mrb[4].mxu1 %vm294_vm0, %v419_v56  ;;  %1191 = vmatprep.mubr.msk.f32.mxu0 %vm294_vm0, %v404_v58  ;;  %v409_v30 = vmax.f32 %v377_v21, 0.0  ;;  %v425_v31 = vmax.f32 %v393_v22, 0.0  ;;  %v395_v33 = vadd.f32 %v1392_v46, %v356_v27  ;;  %v380_v36 = vadd.f32 %v1392_v46, %v341_v28 }
  0x2d   : > { %1215 = vmatprep.mubr.msk.f32.mxu1 %vm294_vm0, %v420_v59  ;;  %v410_v34 = vmax.f32 %v378_v24, 0.0  ;;  %v426_v35 = vmax.f32 %v394_v25, 0.0  ;;  %v396_v37 = vadd.f32 %v1392_v46, %v357_v29  ;;  %v411_v40 = vmax.f32 %v379_v32, 0.0 }
  0x2e   : > { %v427_v41 = vmax.f32 %v395_v33, 0.0  ;;  %v412_v44 = vmax.f32 %v380_v36, 0.0 }
  0x2f   : > { %1192 = vmatmul.mubr.msk.f32.gmra.mrb[6].mxu0 %vm294_vm0, %v405_v3  ;;  %v428_v45 = vmax.f32 %v396_v37, 0.0 }
  0x30   : > { %1216 = vmatmul.mubr.msk.f32.gmra.mrb[6].mxu1 %vm294_vm0, %v421_v5  ;;  %1194 = vmatprep.mubr.msk.f32.mxu0 %vm294_vm0, %v406_v9 }
  0x31   : > { %1218 = vmatprep.mubr.msk.f32.mxu1 %vm294_vm0, %v422_v11 }
  0x32   : > { %v342_v38 = vld [vmem:[#allocation2 + $0x78] sm:$0xff] }
  0x33   : > { %1195 = vmatmul.mubr.msk.f32.gmra.mrb[8].mxu0 %vm294_vm0, %v407_v19  ;;  %v358_v39 = vld [vmem:[#allocation2 + $0xf8] sm:$0xff]  ;;  %v381_v42 = vadd.f32 %v1392_v46, %v342_v38 }
  0x34   : > { %1219 = vmatmul.mubr.msk.f32.gmra.mrb[8].mxu1 %vm294_vm0, %v423_v20  ;;  %1197 = vmatprep.mubr.msk.f32.mxu0 %vm294_vm0, %v408_v23  ;;  %v397_v43 = vadd.f32 %v1392_v46, %v358_v39  ;;  %v1519_v46 = vld [vmem:[%s1630_s4] ss:$0 sm:$0xff] }
  0x35   : > { %1221 = vmatprep.mubr.msk.f32.mxu1 %vm294_vm0, %v424_v10  ;;  %v413_v47 = vmax.f32 %v381_v42, 0.0 }
  0x36   : > { %v429_v48 = vmax.f32 %v397_v43, 0.0 }
  0x37   : > { %1198 = vmatmul.mubr.msk.f32.gmra.mrb[10].mxu0 %vm294_vm0, %v409_v30 }
  0x38   : > { %1222 = vmatmul.mubr.msk.f32.gmra.mrb[10].mxu1 %vm294_vm0, %v425_v31  ;;  %1200 = vmatprep.mubr.msk.f32.mxu0 %vm294_vm0, %v410_v34 }
  0x39   : > { %1224 = vmatprep.mubr.msk.f32.mxu1 %vm294_vm0, %v426_v35 }
  0x3b   : > { %1201 = vmatmul.mubr.msk.f32.gmra.mrb[12].mxu0 %vm294_vm0, %v411_v40 }
  0x3c   : > { %1225 = vmatmul.mubr.msk.f32.gmra.mrb[12].mxu1 %vm294_vm0, %v427_v41  ;;  %1203 = vmatprep.mubr.msk.f32.mxu0 %vm294_vm0, %v412_v44 }
  0x3d   : > { %1227 = vmatprep.mubr.msk.f32.mxu1 %vm294_vm0, %v428_v45 }
  0x3f   : > { %1204 = vmatmul.mubr.msk.f32.gmra.mrb[14].mxu0 %vm294_vm0, %v413_v47 }
  0x40   : > { %1228 = vmatmul.mubr.msk.f32.gmra.mrb[14].mxu1 %vm294_vm0, %v429_v48 }
  0xf6   : > { %v1184_v49 = vpop.f32.mrb[0].mxu0 }
  0xf7   : > { %v1208_v50 = vpop.f32.mrb[0].mxu1  ;;  %v613_v51 = vadd.f32 %v1184_v49, %v1519_v46  ;;  %v607_v53 = vpop.f32.mrb[1].mxu0 }
  0xf8   : > { %v693_v52 = vadd.f32 %v1208_v50, %v1519_v46  ;;  %v687_v54 = vpop.f32.mrb[1].mxu1  ;;  %v608_v55 = vadd.f32 %v1519_v46, %v607_v53 }
  0xf9   : > { %v688_v56 = vadd.f32 %v1519_v46, %v687_v54  ;;  %v767_v57 = vmax.f32 %v613_v51, 0.0 }
  0xfa   : > { %v783_v58 = vmax.f32 %v693_v52, 0.0  ;;  %v766_v59 = vmax.f32 %v608_v55, 0.0  ;;  %v1187_v61 = vpop.f32.mrb[2].mxu0 }
  0xfb   : > { %v782_v60 = vmax.f32 %v688_v56, 0.0  ;;  %v1211_v62 = vpop.f32.mrb[2].mxu1  ;;  %v1095_v63 = vpack.c.bf16 %v767_v57, %v767_v57  ;;  %v623_v1 = vadd.f32 %v1187_v61, %v1519_v46  ;;  %v617_v3 = vpop.f32.mrb[3].mxu0 }
  0xfc   : > { %v1111_v0 = vpack.c.bf16 %v783_v58, %v783_v58  ;;  %v703_v2 = vadd.f32 %v1211_v62, %v1519_v46  ;;  %v697_v4 = vpop.f32.mrb[3].mxu1  ;;  %v1094_v5 = vpack.c.bf16 %v766_v59, %v766_v59  ;;  %v618_v7 = vadd.f32 %v1519_v46, %v617_v3 }
  0xfd   : > { %v1110_v6 = vpack.c.bf16 %v782_v60, %v782_v60  ;;  %v698_v8 = vadd.f32 %v1519_v46, %v697_v4  ;;  %928 = vst.msk [vmem:[%s1529_s26 + $0x4] sm:$0xf] %vm926_vm1, %v1095_v63  ;;  %v769_v9 = vmax.f32 %v623_v1, 0.0 }
  0xfe   : > { %944 = vst.msk [vmem:[%s1529_s26 + $0x44] sm:$0xf] %vm926_vm1, %v1111_v0  ;;  %v785_v11 = vmax.f32 %v703_v2, 0.0  ;;  %927 = vst.msk [vmem:[%s1529_s26] sm:$0xf] %vm926_vm1, %v1094_v5  ;;  %v768_v12 = vmax.f32 %v618_v7, 0.0 }
  0xff   : > { %943 = vst.msk [vmem:[%s1529_s26 + $0x40] sm:$0xf] %vm926_vm1, %v1110_v6  ;;  %v784_v13 = vmax.f32 %v698_v8, 0.0  ;;  %v1190_v14 = vpop.f32.mrb[4].mxu0  ;;  %v1214_v16 = vpop.f32.mrb[4].mxu1  ;;  %v1097_v15 = vpack.c.bf16 %v769_v9, %v769_v9 }
 0x100   : > { %v1113_v17 = vpack.c.bf16 %v785_v11, %v785_v11  ;;  %v633_v18 = vadd.f32 %v1190_v14, %v1519_v46  ;;  %v713_v19 = vadd.f32 %v1214_v16, %v1519_v46  ;;  %v627_v20 = vpop.f32.mrb[5].mxu0  ;;  %v707_v21 = vpop.f32.mrb[5].mxu1  ;;  %v1096_v22 = vpack.c.bf16 %v768_v12, %v768_v12 }
 0x101   : > { %v1112_v23 = vpack.c.bf16 %v784_v13, %v784_v13  ;;  %v628_v10 = vadd.f32 %v1519_v46, %v627_v20  ;;  %v708_v24 = vadd.f32 %v1519_v46, %v707_v21  ;;  %930 = vst.msk [vmem:[%s1529_s26 + $0xc] sm:$0xf] %vm926_vm1, %v1097_v15 }
 0x102   : > { %946 = vst.msk [vmem:[%s1529_s26 + $0x4c] sm:$0xf] %vm926_vm1, %v1113_v17  ;;  %v771_v25 = vmax.f32 %v633_v18, 0.0  ;;  %v787_v26 = vmax.f32 %v713_v19, 0.0  ;;  %929 = vst.msk [vmem:[%s1529_s26 + $0x8] sm:$0xf] %vm926_vm1, %v1096_v22 }
 0x103   : > { %945 = vst.msk [vmem:[%s1529_s26 + $0x48] sm:$0xf] %vm926_vm1, %v1112_v23  ;;  %v770_v27 = vmax.f32 %v628_v10, 0.0  ;;  %v786_v28 = vmax.f32 %v708_v24, 0.0  ;;  %v1193_v29 = vpop.f32.mrb[6].mxu0  ;;  %v1217_v30 = vpop.f32.mrb[6].mxu1 }
 0x104   : > { %v1099_v31 = vpack.c.bf16 %v771_v25, %v771_v25  ;;  %v1115_v32 = vpack.c.bf16 %v787_v26, %v787_v26  ;;  %v643_v33 = vadd.f32 %v1193_v29, %v1519_v46  ;;  %v723_v34 = vadd.f32 %v1217_v30, %v1519_v46  ;;  %v637_v35 = vpop.f32.mrb[7].mxu0  ;;  %v717_v36 = vpop.f32.mrb[7].mxu1 }
 0x105   : > { %v1098_v37 = vpack.c.bf16 %v770_v27, %v770_v27  ;;  %v1114_v38 = vpack.c.bf16 %v786_v28, %v786_v28  ;;  %v638_v39 = vadd.f32 %v1519_v46, %v637_v35  ;;  %v718_v40 = vadd.f32 %v1519_v46, %v717_v36 }
 0x106   : > { %932 = vst.msk [vmem:[%s1529_s26 + $0x14] sm:$0xf] %vm926_vm1, %v1099_v31  ;;  %948 = vst.msk [vmem:[%s1529_s26 + $0x54] sm:$0xf] %vm926_vm1, %v1115_v32  ;;  %v773_v41 = vmax.f32 %v643_v33, 0.0  ;;  %v789_v42 = vmax.f32 %v723_v34, 0.0 }
 0x107   : > { %931 = vst.msk [vmem:[%s1529_s26 + $0x10] sm:$0xf] %vm926_vm1, %v1098_v37  ;;  %947 = vst.msk [vmem:[%s1529_s26 + $0x50] sm:$0xf] %vm926_vm1, %v1114_v38  ;;  %v772_v43 = vmax.f32 %v638_v39, 0.0  ;;  %v788_v44 = vmax.f32 %v718_v40, 0.0 }
 0x108   : > { %v1196_v45 = vpop.f32.mrb[8].mxu0  ;;  %v1220_v47 = vpop.f32.mrb[8].mxu1  ;;  %v1101_v48 = vpack.c.bf16 %v773_v41, %v773_v41  ;;  %v1117_v49 = vpack.c.bf16 %v789_v42, %v789_v42 }
 0x109   : > { %v653_v50 = vadd.f32 %v1196_v45, %v1519_v46  ;;  %v733_v51 = vadd.f32 %v1220_v47, %v1519_v46  ;;  %v647_v52 = vpop.f32.mrb[9].mxu0  ;;  %v727_v53 = vpop.f32.mrb[9].mxu1  ;;  %v1100_v54 = vpack.c.bf16 %v772_v43, %v772_v43  ;;  %v1116_v55 = vpack.c.bf16 %v788_v44, %v788_v44 }
 0x10a   : > { %v648_v56 = vadd.f32 %v1519_v46, %v647_v52  ;;  %v728_v57 = vadd.f32 %v1519_v46, %v727_v53  ;;  %934 = vst.msk [vmem:[%s1529_s26 + $0x1c] sm:$0xf] %vm926_vm1, %v1101_v48  ;;  %950 = vst.msk [vmem:[%s1529_s26 + $0x5c] sm:$0xf] %vm926_vm1, %v1117_v49  ;;  %v1199_v62 = vpop.f32.mrb[10].mxu0 }
 0x10b   : > { %v775_v58 = vmax.f32 %v653_v50, 0.0  ;;  %v791_v59 = vmax.f32 %v733_v51, 0.0  ;;  %933 = vst.msk [vmem:[%s1529_s26 + $0x18] sm:$0xf] %vm926_vm1, %v1100_v54  ;;  %949 = vst.msk [vmem:[%s1529_s26 + $0x58] sm:$0xf] %vm926_vm1, %v1116_v55  ;;  %v663_v2 = vadd.f32 %v1199_v62, %v1519_v46 }
 0x10c   : > { %v774_v60 = vmax.f32 %v648_v56, 0.0  ;;  %v790_v61 = vmax.f32 %v728_v57, 0.0  ;;  %v1223_v63 = vpop.f32.mrb[10].mxu1  ;;  %v657_v4 = vpop.f32.mrb[11].mxu0 }
 0x10d   : > { %v1103_v0 = vpack.c.bf16 %v775_v58, %v775_v58  ;;  %v1119_v1 = vpack.c.bf16 %v791_v59, %v791_v59  ;;  %v743_v3 = vadd.f32 %v1223_v63, %v1519_v46  ;;  %v737_v5 = vpop.f32.mrb[11].mxu1  ;;  %v658_v8 = vadd.f32 %v1519_v46, %v657_v4 }
 0x10e   : > { %v1102_v6 = vpack.c.bf16 %v774_v60, %v774_v60  ;;  %v1118_v7 = vpack.c.bf16 %v790_v61, %v790_v61  ;;  %v738_v9 = vadd.f32 %v1519_v46, %v737_v5  ;;  %v777_v11 = vmax.f32 %v663_v2, 0.0  ;;  %v1202_v16 = vpop.f32.mrb[12].mxu0 }
 0x10f   : > { %936 = vst.msk [vmem:[%s1529_s26 + $0x24] sm:$0xf] %vm926_vm1, %v1103_v0  ;;  %952 = vst.msk [vmem:[%s1529_s26 + $0x64] sm:$0xf] %vm926_vm1, %v1119_v1  ;;  %v793_v12 = vmax.f32 %v743_v3, 0.0  ;;  %v776_v13 = vmax.f32 %v658_v8, 0.0  ;;  %v673_v19 = vadd.f32 %v1202_v16, %v1519_v46 }
 0x110   : > { %935 = vst.msk [vmem:[%s1529_s26 + $0x20] sm:$0xf] %vm926_vm1, %v1102_v6  ;;  %951 = vst.msk [vmem:[%s1529_s26 + $0x60] sm:$0xf] %vm926_vm1, %v1118_v7  ;;  %v792_v14 = vmax.f32 %v738_v9, 0.0  ;;  %v1226_v15 = vpop.f32.mrb[12].mxu1  ;;  %v1105_v17 = vpack.c.bf16 %v777_v11, %v777_v11 }
 0x111   : > { %v1121_v18 = vpack.c.bf16 %v793_v12, %v793_v12  ;;  %v753_v20 = vadd.f32 %v1226_v15, %v1519_v46  ;;  %v667_v21 = vpop.f32.mrb[13].mxu0  ;;  %v747_v22 = vpop.f32.mrb[13].mxu1  ;;  %v1104_v23 = vpack.c.bf16 %v776_v13, %v776_v13  ;;  %v779_v26 = vmax.f32 %v673_v19, 0.0 }
 0x112   : > { %v1120_v10 = vpack.c.bf16 %v792_v14, %v792_v14  ;;  %v668_v24 = vadd.f32 %v1519_v46, %v667_v21  ;;  %v748_v25 = vadd.f32 %v1519_v46, %v747_v22  ;;  %938 = vst.msk [vmem:[%s1529_s26 + $0x2c] sm:$0xf] %vm926_vm1, %v1105_v17  ;;  %v1205_v30 = vpop.f32.mrb[14].mxu0 }
 0x113   : > { %954 = vst.msk [vmem:[%s1529_s26 + $0x6c] sm:$0xf] %vm926_vm1, %v1121_v18  ;;  %v795_v27 = vmax.f32 %v753_v20, 0.0  ;;  %937 = vst.msk [vmem:[%s1529_s26 + $0x28] sm:$0xf] %vm926_vm1, %v1104_v23  ;;  %v1229_v31 = vpop.f32.mrb[14].mxu1  ;;  %v1107_v32 = vpack.c.bf16 %v779_v26, %v779_v26  ;;  %v683_v34 = vadd.f32 %v1205_v30, %v1519_v46 }
 0x114   : > { %953 = vst.msk [vmem:[%s1529_s26 + $0x68] sm:$0xf] %vm926_vm1, %v1120_v10  ;;  %v778_v28 = vmax.f32 %v668_v24, 0.0  ;;  %v794_v29 = vmax.f32 %v748_v25, 0.0  ;;  %v763_v35 = vadd.f32 %v1229_v31, %v1519_v46  ;;  %v677_v36 = vpop.f32.mrb[15].mxu0  ;;  %v757_v37 = vpop.f32.mrb[15].mxu1 }
 0x115   : > { %v1123_v33 = vpack.c.bf16 %v795_v27, %v795_v27  ;;  %v678_v40 = vadd.f32 %v1519_v46, %v677_v36  ;;  %v758_v41 = vadd.f32 %v1519_v46, %v757_v37  ;;  %940 = vst.msk [vmem:[%s1529_s26 + $0x34] sm:$0xf] %vm926_vm1, %v1107_v32  ;;  %v781_v42 = vmax.f32 %v683_v34, 0.0 }
 0x116   : > { %v1106_v38 = vpack.c.bf16 %v778_v28, %v778_v28  ;;  %v1122_v39 = vpack.c.bf16 %v794_v29, %v794_v29  ;;  %v797_v43 = vmax.f32 %v763_v35, 0.0 }
 0x117   : > { %956 = vst.msk [vmem:[%s1529_s26 + $0x74] sm:$0xf] %vm926_vm1, %v1123_v33  ;;  %v780_v44 = vmax.f32 %v678_v40, 0.0  ;;  %v796_v45 = vmax.f32 %v758_v41, 0.0  ;;  %v1109_v47 = vpack.c.bf16 %v781_v42, %v781_v42 }
 0x118   : > { %939 = vst.msk [vmem:[%s1529_s26 + $0x30] sm:$0xf] %vm926_vm1, %v1106_v38  ;;  %955 = vst.msk [vmem:[%s1529_s26 + $0x70] sm:$0xf] %vm926_vm1, %v1122_v39  ;;  %v1125_v48 = vpack.c.bf16 %v797_v43, %v797_v43 }
 0x119   : > { %v1108_v49 = vpack.c.bf16 %v780_v44, %v780_v44  ;;  %v1124_v50 = vpack.c.bf16 %v796_v45, %v796_v45  ;;  %942 = vst.msk [vmem:[%s1529_s26 + $0x3c] sm:$0xf] %vm926_vm1, %v1109_v47 }
 0x11a   : > { %958 = vst.msk [vmem:[%s1529_s26 + $0x7c] sm:$0xf] %vm926_vm1, %v1125_v48 }
 0x11b   : > { %941 = vst.msk [vmem:[%s1529_s26 + $0x38] sm:$0xf] %vm926_vm1, %v1108_v49  ;;  %957 = vst.msk [vmem:[%s1529_s26 + $0x78] sm:$0xf] %vm926_vm1, %v1124_v50 }
 0x11c PF: > { %s15_s18 = sadd.s32 1, %s1268_s18  }
 0x11d   : > { %p12_p4 = scmp.ge.s32.totalorder %s15_s18, 4  }
 0x11f   :  { %14 = sbr.rel (!%p12_p4) target bundleno = 1 (0x1), region = 70 }

// kernel: aspp_forward.8
= control target key start
LH: loop header
LB: loop body
LE: loop exit
PB: predicated region body
PF: predicated region fallthrough
CT: control target
= control target key end

     0   :  { %s1678_s18 = smov 0   ;;  %s2354_s0 = inlined_call_operand.vmem [shape: f32[2,16,16,64], index: 0, kind: input, shape index: {}]   ;;  %s2355_s1 = inlined_call_operand.vmem [shape: f32[9,64], index: 1, kind: input, shape index: {}]   ;;  %s2356_s2 = inlined_call_operand.vmem [shape: f32[1,64], index: 2, kind: input, shape index: {}]   ;;  %s2357_s3 = inlined_call_operand.vmem [shape: f32[64,32], index: 3, kind: input, shape index: {}]   ;;  %s2358_s4 = inlined_call_operand.vmem [shape: f32[1,32], index: 4, kind: input, shape index: {}]   ;;  %s2359_s5 = inlined_call_operand.vmem [shape: bf16[2,16,16,32], index: 5, kind: output, shape index: {}]  }
   0x1 LB: > { %s1384_s19 = sadd.s32 4294967295, %s1646_s18   ;;  %p1388_p0 = scmp.ge.s32.totalorder %s1646_s18, 1  ;;  %s1646_s18 = sphi %s1678_s18, %s15_s18  }
   0x2   : > { %p187_p1 = scmp.lt.s32.totalorder %s1646_s18, 3 }
   0x4   : > { %p188_p2 = pnand %p1388_p0, %p187_p1 }
   0x5   : > { %v800_v0 = vld [vmem:[%s2357_s3] sm:$0xff] (!%p188_p2)  ;;  %v801_v1 = vld [vmem:[%s2357_s3 + $0x8] sm:$0xff] (!%p188_p2)  ;;  %v802_v2 = vld [vmem:[%s2357_s3 + $0x10] sm:$0xff] (!%p188_p2)  ;;  %p215_p3 = scmp.lt.s32.totalorder (!%p188_p2), %s1384_s19, 1  ;;  %vm294_vm0 = vcmask (!%p188_p2), 523264   ;;  %vm345_vm1 = vcmask (!%p188_p2), 519168  }
   0x6   : > { %191 = sbr.rel (%p188_p2) target bundleno = 330 (0x14a), region = 40  ;;  %v1608_v3 = vpack.c.bf16 (!%p188_p2), %v801_v1, %v800_v0  ;;  %v803_v4 = vld [vmem:[%s2357_s3 + $0x18] sm:$0xff] (!%p188_p2)  ;;  %v804_v6 = vld [vmem:[%s2357_s3 + $0x20] sm:$0xff] (!%p188_p2)  ;;  %v805_v7 = vld [vmem:[%s2357_s3 + $0x28] sm:$0xff] (!%p188_p2)  ;;  %vm1296_vm2 = vcmask (!%p188_p2), 257024  }
   0x7   : > { %v1612_v5 = vpack.c.bf16 (!%p188_p2), %v803_v4, %v802_v2  ;;  %v1616_v8 = vpack.c.bf16 (!%p188_p2), %v805_v7, %v804_v6  ;;  %v806_v9 = vld [vmem:[%s2357_s3 + $0x30] sm:$0xff] (!%p188_p2)  ;;  %v807_v10 = vld [vmem:[%s2357_s3 + $0x38] sm:$0xff] (!%p188_p2)  ;;  %v1721_v11 = vld [vmem:[%s2355_s1 + $0x4] ss:$0 sm:$0xff] (!%p188_p2) }
   0x8   : > { %1624 = vmatprep.subr.bf16.mxu1 (!%p188_p2), %v1608_v3  ;;  %1609 = vmatprep.subr.bf16.mxu0 (!%p188_p2), %v1608_v3  ;;  %v1733_v17 = vld [vmem:[%s2355_s1 + $0x5] ss:$0 sm:$0xff] (!%p188_p2)  ;;  %v1620_v24 = vpack.c.bf16 (!%p188_p2), %v807_v10, %v806_v9  ;;  %v1768_v30 = vld [vmem:[%s2355_s1 + $0x3] ss:$0 sm:$0xff] (!%p188_p2)  ;;  %v1784_v37 = vld [vmem:[%s2355_s1 + $0x6] ss:$0 sm:$0xff] (!%p188_p2) }
   0x9   : > { %1628 = vmatpush3.bf16.msra.mxu1 (!%p188_p2), %v1608_v3  ;;  %1611 = vmatpush3.bf16.msra.mxu0 (!%p188_p2), %v1608_v3  ;;  %v1789_v38 = vld [vmem:[%s2355_s1 + $0x8] ss:$0 sm:$0xff] (!%p188_p2)  ;;  %v1813_v47 = vld [vmem:[%s2355_s1 + $0x7] ss:$0 sm:$0xff] (!%p188_p2) }
   0xa   : > { %1625 = vmatprep.subr.bf16.mxu1 (!%p188_p2), %v1612_v5  ;;  %1613 = vmatprep.subr.bf16.mxu0 (!%p188_p2), %v1612_v5 }
   0xd   : > { %s2361_s19 = smov (!%p215_p3, %s1384_s19), 1  ;;  %1629 = vmatpush3.bf16.msra.mxu1 %v1612_v5  ;;  %1615 = vmatpush3.bf16.msra.mxu0 %v1612_v5 }
   0xe   : > { %s1470_s7 = sshll.u32 %s2361_s19, 8  ;;  %1626 = vmatprep.subr.bf16.mxu1 %v1616_v8  ;;  %1617 = vmatprep.subr.bf16.mxu0 %v1616_v8 }
   0xf   : > { %s1716_s14 = scalar_lea.vmem %s2354_s0, %s1470_s7 }
  0x10   : > { %v241_v12 = vld [vmem:[%s1716_s14 + $0x80] sm:$0xff]  ;;  %v242_v13 = vld [vmem:[%s1716_s14 + $0x88] sm:$0xff]  ;;  %v1748_v23 = vld [vmem:[%s1716_s14 + $0x90] sm:$0xff] }
  0x11   : > { %v1726_v14 = vld [vmem:[%s1716_s14] sm:$0xff]  ;;  %v278_v15 = vmul.f32 %v1721_v11, %v241_v12  ;;  %v279_v16 = vmul.f32 %v1721_v11, %v242_v13  ;;  %v1736_v18 = vld [vmem:[%s1716_s14 + $0x8] sm:$0xff]  ;;  %v518_v25 = vmul.f32 %v1733_v17, %v242_v13  ;;  %v1754_v26 = vld [vmem:[%s1716_s14 + $0x10] sm:$0xff]  ;;  %v280_v31 = vmul.f32 %v1721_v11, %v1748_v23  ;;  %1630 = vmatpush3.bf16.msra.mxu1 %v1616_v8 }
  0x12   : > { %v1739_v19 = vld [vmem:[%s1716_s14 + $0xc8] sm:$0xff]  ;;  %v262_v20 = vmul.f32 %v1721_v11, %v1726_v14  ;;  %v263_v21 = vmul.f32 %v1721_v11, %v1736_v18  ;;  %v510_v27 = vmul.f32 %v1733_v17, %v1736_v18  ;;  %v244_v28 = vld [vmem:[%s1716_s14 + $0x98] sm:$0xff]  ;;  %1619 = vmatpush3.bf16.msra.mxu0 %v1616_v8  ;;  %v264_v33 = vmul.f32 %v1721_v11, %v1754_v26  ;;  %v1778_v34 = vld [vmem:[%s1716_s14 + $0xa0] sm:$0xff] }
  0x13   : > { %v287_v22 = vmul.f32 %v1721_v11, %v1739_v19  ;;  %311 = vst.msk [vmem:[#allocation2 + $0x80] sm:$0xff] %vm294_vm0, %v278_v15  ;;  %312 = vst.msk [vmem:[#allocation2 + $0x88] sm:$0xff] %vm294_vm0, %v279_v16  ;;  %v1763_v29 = vld [vmem:[%s1716_s14 + $0x18] sm:$0xff]  ;;  %v1773_v32 = vmul.f32 %v1733_v17, %v244_v28  ;;  %1627 = vmatprep.subr.bf16.mxu1 %v1620_v24  ;;  %1621 = vmatprep.subr.bf16.mxu0 %v1620_v24  ;;  %v550_v36 = vrot.slane %v518_v25, 4  ;;  %v1796_v41 = vld [vmem:[%s1716_s14 + $0x20] sm:$0xff] }
  0x14   : > { %295 = vst.msk [vmem:[#allocation2] sm:$0xff] %vm294_vm0, %v262_v20  ;;  %296 = vst.msk [vmem:[#allocation2 + $0x8] sm:$0xff] %vm294_vm0, %v263_v21  ;;  %v449_v35 = vmul.f32 %v1768_v30, %v241_v12  ;;  %v281_v39 = vmul.f32 %v1721_v11, %v244_v28  ;;  %v265_v40 = vmul.f32 %v1721_v11, %v1763_v29  ;;  %v542_v43 = vrot.slane %v510_v27, 4  ;;  %v1804_v45 = vld [vmem:[%s1716_s14 + $0xc0] sm:$0xff]  ;;  %v246_v48 = vld [vmem:[%s1716_s14 + $0xa8] sm:$0xff] }
  0x15   : > { %320 = vst.msk [vmem:[#allocation2 + $0xc8] sm:$0xff] %vm294_vm0, %v287_v22  ;;  %313 = vst.msk [vmem:[#allocation2 + $0x90] sm:$0xff] %vm294_vm0, %v280_v31  ;;  %v441_v42 = vmul.f32 %v1768_v30, %v1726_v14  ;;  %v511_v44 = vmul.f32 %v1733_v17, %v1763_v29  ;;  %v1808_v46 = vmul.f32 %v1733_v17, %v1739_v19  ;;  %1631 = vmatpush3.bf16.msra.mxu1 %v1620_v24  ;;  %v1830_v55 = vld [vmem:[%s1716_s14 + $0x28] sm:$0xff]  ;;  %v247_v63 = vld [vmem:[%s1716_s14 + $0xb0] sm:$0xff] }
  0x16   : > { %297 = vst.msk [vmem:[#allocation2 + $0x10] sm:$0xff] %vm294_vm0, %v264_v33  ;;  %314 = vst.msk [vmem:[#allocation2 + $0x98] sm:$0xff] %vm294_vm0, %v281_v39  ;;  %v282_v49 = vmul.f32 %v1721_v11, %v1778_v34  ;;  %1623 = vmatpush3.bf16.msra.mxu0 %v1620_v24  ;;  %v1822_v52 = vmul.f32 %v1784_v37, %v1804_v45  ;;  %v1826_v53 = vmul.f32 %v1789_v38, %v1739_v19  ;;  %v1844_v4 = vld [vmem:[%s1716_s14 + $0x30] sm:$0xff]  ;;  %v248_v10 = vld [vmem:[%s1716_s14 + $0xb8] sm:$0xff] }
  0x17   : > { %298 = vst.msk [vmem:[#allocation2 + $0x18] sm:$0xff] %vm294_vm0, %v265_v40  ;;  %v551_v54 = vrot.slane %v1773_v32, 4  ;;  %v266_v56 = vmul.f32 %v1721_v11, %v1796_v41  ;;  %v520_v61 = vmul.f32 %v1733_v17, %v246_v48  ;;  %v1838_v62 = vmul.f32 %v1733_v17, %v1830_v55  ;;  %v1855_v7 = vld [vmem:[%s1716_s14 + $0xd0] sm:$0xff]  ;;  %v1876_v21 = vld [vmem:[%s1716_s14 + $0x38] sm:$0xff] }
  0x18   : > { %315 = vst.msk [vmem:[#allocation2 + $0xa0] sm:$0xff] %vm294_vm0, %v282_v49  ;;  %v543_v2 = vrot.slane %v511_v44, 4  ;;  %v283_v3 = vmul.f32 %v1721_v11, %v246_v48  ;;  %v1850_v5 = vmul.f32 %v1813_v47, %v1804_v45  ;;  %v450_v6 = vmul.f32 %v1768_v30, %v1748_v23  ;;  %v1883_v27 = vld [vmem:[%s1716_s14 + $0xd8] sm:$0xff]  ;;  %v1906_v48 = vld [vmem:[%s1716_s14 + $0x40] sm:$0xff] }
  0x19   : > { %299 = vst.msk [vmem:[#allocation2 + $0x20] sm:$0xff] %vm294_vm0, %v266_v56  ;;  %v442_v8 = vmul.f32 %v1768_v30, %v1754_v26  ;;  %v267_v9 = vmul.f32 %v1721_v11, %v1830_v55  ;;  %v1866_v12 = vmul.f32 %v1813_v47, %v1739_v19  ;;  %v681_v13 = vrot.slane %v1826_v53, 4  ;;  %v1911_v49 = vld [vmem:[%s2356_s2] ss:$0 sm:$0xff] }
  0x1a   : > { %v428_v50 = vld [vmem:[#allocation2 + $0x8c] sm:$0xf]  ;;  %v497_v51 = vld [vmem:[#allocation2 + $0x80] sm:$0xf]  ;;  %v1871_v16 = vmul.f32 %v1813_v47, %v1855_v7  ;;  %316 = vst.msk [vmem:[#allocation2 + $0xa8] sm:$0xff] %vm294_vm0, %v283_v3  ;;  %v284_v20 = vmul.f32 %v1721_v11, %v247_v63  ;;  %v552_v24 = vrot.slane %v520_v61, 4  ;;  %v268_v25 = vmul.f32 %v1721_v11, %v1844_v4 }
  0x1b   : > { %v465_v57 = vadd.f32 %v449_v35, %v428_v50  ;;  %v582_v58 = vadd.f32 %v550_v36, %v497_v51  ;;  %v420_v59 = vld [vmem:[#allocation2 + $0xc] sm:$0xf]  ;;  %v489_v60 = vld [vmem:[#allocation2] sm:$0xf]  ;;  %v544_v19 = vrot.slane %v1838_v62, 4  ;;  %300 = vst.msk [vmem:[#allocation2 + $0x28] sm:$0xff] %vm294_vm0, %v267_v9  ;;  %v1887_v33 = vmul.f32 %v1733_v17, %v248_v10 }
  0x1c   : > { %v457_v0 = vadd.f32 %v441_v42, %v420_v59  ;;  %v574_v1 = vadd.f32 %v542_v43, %v489_v60  ;;  %v498_v15 = vld [vmem:[#allocation2 + $0x90] sm:$0xf]  ;;  %317 = vst.msk [vmem:[#allocation2 + $0xb0] sm:$0xff] %vm294_vm0, %v284_v20  ;;  %v1891_v35 = vmul.f32 %v1733_v17, %v1876_v21  ;;  %v285_v36 = vmul.f32 %v1721_v11, %v248_v10  ;;  %v1900_v43 = vld [vmem:[%s1716_s14 + $0xe8] sm:$0xff] }
  0x1d   : > { %598 = vst.msk [vmem:[#allocation2 + $0x80] sm:$0xf] %vm345_vm1, %v582_v58  ;;  %481 = vst.msk [vmem:[#allocation2 + $0x8c] sm:$0xf] %vm345_vm1, %v465_v57  ;;  %v583_v22 = vadd.f32 %v551_v54, %v498_v15  ;;  %v490_v23 = vld [vmem:[#allocation2 + $0x10] sm:$0xf]  ;;  %v1897_v39 = vmul.f32 %v1789_v38, %v1883_v27  ;;  %v269_v44 = vmul.f32 %v1721_v11, %v1876_v21 }
  0x1e   : > { %473 = vst.msk [vmem:[#allocation2 + $0xc] sm:$0xf] %vm345_vm1, %v457_v0  ;;  %590 = vst.msk [vmem:[#allocation2] sm:$0xf] %vm345_vm1, %v574_v1  ;;  %v575_v28 = vadd.f32 %v543_v2, %v490_v23  ;;  %v429_v31 = vld [vmem:[#allocation2 + $0x9c] sm:$0xf]  ;;  %v1916_v50 = vmul.f32 %v1784_v37, %v1855_v7  ;;  %v1920_v51 = vmul.f32 %v1813_v47, %v1883_v27 }
  0x1f   : > { %v421_v32 = vld [vmem:[#allocation2 + $0x1c] sm:$0xf]  ;;  %599 = vst.msk [vmem:[#allocation2 + $0x90] sm:$0xf] %vm345_vm1, %v583_v22  ;;  %v466_v40 = vadd.f32 %v450_v6, %v429_v31  ;;  %v451_v54 = vmul.f32 %v1768_v30, %v1778_v34  ;;  %v499_v56 = vld [vmem:[#allocation2 + $0xa0] sm:$0xf]  ;;  %v1926_v57 = vmul.f32 %v1789_v38, %v1900_v43  ;;  %v443_v34 = vmul.f32 %v1768_v30, %v1796_v41 }
  0x20   : > { %v458_v42 = vadd.f32 %v442_v8, %v421_v32  ;;  %301 = vst.msk [vmem:[#allocation2 + $0x30] sm:$0xff] %vm294_vm0, %v268_v25  ;;  %318 = vst.msk [vmem:[#allocation2 + $0xb8] sm:$0xff] %vm294_vm0, %v285_v36  ;;  %v1932_v58 = vld [vmem:[%s2355_s1] ss:$0 sm:$0xff]  ;;  %v584_v59 = vadd.f32 %v552_v24, %v499_v56  ;;  %v452_v61 = vmul.f32 %v1768_v30, %v247_v63  ;;  %v234_v0 = vld [vmem:[%s1716_s14 + $0x48] sm:$0xff]  ;;  %v553_v6 = vrot.slane %v1887_v33, 4 }
  0x21   : > { %591 = vst.msk [vmem:[#allocation2 + $0x10] sm:$0xf] %vm345_vm1, %v575_v28  ;;  %482 = vst.msk [vmem:[#allocation2 + $0x9c] sm:$0xf] %vm345_vm1, %v466_v40  ;;  %v491_v60 = vld [vmem:[#allocation2 + $0x20] sm:$0xf]  ;;  %v286_v62 = vmul.f32 %v1721_v11, %v1804_v45  ;;  %v270_v9 = vmul.f32 %v1721_v11, %v1906_v48  ;;  %v444_v24 = vmul.f32 %v1768_v30, %v1844_v4 }
  0x22   : > { %474 = vst.msk [vmem:[#allocation2 + $0x1c] sm:$0xf] %vm345_vm1, %v458_v42  ;;  %v576_v3 = vadd.f32 %v544_v19, %v491_v60  ;;  %v545_v8 = vrot.slane %v1891_v35, 4  ;;  %v328_v10 = vld [vmem:[#allocation2 + $0xcc] sm:$0xf]  ;;  %v337_v19 = vmul.f32 %v1932_v58, %v1726_v14  ;;  %v1965_v35 = vmul.f32 %v1733_v17, %v234_v0  ;;  %v1971_v56 = vld [vmem:[%s1716_s14 + $0xe0] sm:$0xff] }
  0x23   : > { %302 = vst.msk [vmem:[#allocation2 + $0x38] sm:$0xff] %vm294_vm0, %v269_v44  ;;  %v430_v23 = vld [vmem:[#allocation2 + $0xac] sm:$0xf]  ;;  %319 = vst.msk [vmem:[#allocation2 + $0xc0] sm:$0xff] %vm294_vm0, %v286_v62  ;;  %v1961_v33 = vld [vmem:[%s2355_s1 + $0x1] ss:$0 sm:$0xff] }
  0x24   : > { %v713_v1 = vld [vmem:[#allocation2 + $0x80] sm:$0xff]  ;;  %v714_v2 = vld [vmem:[#allocation2 + $0x88] sm:$0xff]  ;;  %600 = vst.msk [vmem:[#allocation2 + $0xa0] sm:$0xf] %vm345_vm1, %v584_v59  ;;  %592 = vst.msk [vmem:[#allocation2 + $0x20] sm:$0xf] %vm345_vm1, %v576_v3  ;;  %v467_v31 = vadd.f32 %v451_v54, %v430_v23 }
  0x25   : > { %v752_v15 = vadd.f32 %v1911_v49, %v713_v1  ;;  %v606_v63 = vld [vmem:[#allocation2 + $0xc] sm:$0xf]  ;;  %v627_v20 = vld [vmem:[#allocation2] sm:$0xff]  ;;  %v753_v22 = vadd.f32 %v1911_v49, %v714_v2  ;;  %303 = vst.msk [vmem:[#allocation2 + $0x40] sm:$0xff] %vm294_vm0, %v270_v9  ;;  %v500_v42 = vld [vmem:[#allocation2 + $0xb0] sm:$0xf] }
  0x26   : > { %v619_v25 = vadd.f32 %v1822_v52, %v606_v63  ;;  %v648_v28 = vadd.f32 %v1850_v5, %v627_v20  ;;  %v422_v32 = vld [vmem:[#allocation2 + $0x2c] sm:$0xf]  ;;  %v341_v5 = vadd.f32 %v337_v19, %v328_v10  ;;  %v715_v44 = vld [vmem:[#allocation2 + $0x90] sm:$0xff]  ;;  %v682_v54 = vrot.slane %v1897_v39, 4  ;;  %483 = vst.msk [vmem:[#allocation2 + $0xac] sm:$0xf] %vm345_vm1, %v467_v31 }
  0x27   : > { %v784_v36 = vmax.f32 %v752_v15, 0.0  ;;  %v785_v40 = vmax.f32 %v753_v22, 0.0  ;;  %v459_v52 = vadd.f32 %v443_v34, %v422_v32  ;;  %v683_v59 = vrot.slane %v1926_v57, 4  ;;  %v492_v62 = vld [vmem:[#allocation2 + $0x30] sm:$0xf] }
  0x28   : > { %623 = vst.msk [vmem:[#allocation2 + $0xc] sm:$0xf] %vm345_vm1, %v619_v25  ;;  %v585_v60 = vadd.f32 %v553_v6, %v500_v42  ;;  %v271_v34 = vmul.f32 %v1721_v11, %v234_v0  ;;  %v754_v1 = vadd.f32 %v1911_v49, %v715_v44  ;;  %v629_v2 = vld [vmem:[#allocation2 + $0x10] sm:$0xff]  ;;  %v577_v3 = vadd.f32 %v545_v8, %v492_v62  ;;  %v431_v9 = vld [vmem:[#allocation2 + $0xbc] sm:$0xf] }
  0x29   : > { %656 = vst.msk [vmem:[#allocation2] sm:$0xff] %vm294_vm0, %v648_v28  ;;  %1584 = vmatprep.mubr.msk.f32.mxu1 %vm294_vm0, %v784_v36  ;;  %v363_v10 = vmul.f32 %v1961_v33, %v1726_v14  ;;  %v288_v6 = vmul.f32 %v1721_v11, %v1855_v7  ;;  %v1985_v15 = vld [vmem:[%s1716_s14 + $0x50] sm:$0xff]  ;;  %v650_v0 = vadd.f32 %v1871_v16, %v629_v2  ;;  %v716_v63 = vld [vmem:[#allocation2 + $0x98] sm:$0xff]  ;;  %v546_v23 = vrot.slane %v1965_v35, 4 }
  0x2a   : > { %475 = vst.msk [vmem:[#allocation2 + $0x2c] sm:$0xf] %vm345_vm1, %v459_v52  ;;  %346 = vst.msk [vmem:[#allocation2 + $0xcc] sm:$0xf] %vm345_vm1, %v341_v5  ;;  %1585 = vmatmul.mubr.msk.f32.vlgmr.msra.gmra.mrb[0].mxu1 %vm294_vm0, %v785_v40  ;;  %v607_v20 = vld [vmem:[#allocation2 + $0x1c] sm:$0xf]  ;;  %v644_v8 = vmul.f32 %v1813_v47, %v1971_v56  ;;  %v468_v14 = vadd.f32 %v452_v61, %v431_v9  ;;  %v755_v25 = vadd.f32 %v1911_v49, %v716_v63 }
  0x2b   : > { %601 = vst.msk [vmem:[#allocation2 + $0xb0] sm:$0xf] %vm345_vm1, %v585_v60  ;;  %v423_v22 = vld [vmem:[#allocation2 + $0x3c] sm:$0xf]  ;;  %v786_v19 = vmax.f32 %v754_v1, 0.0  ;;  %v620_v28 = vadd.f32 %v1916_v50, %v607_v20  ;;  %v1997_v31 = vld [vmem:[%s1716_s14 + $0xf0] sm:$0xff]  ;;  %v617_v32 = vmul.f32 %v1784_v37, %v1971_v56  ;;  %v445_v36 = vmul.f32 %v1768_v30, %v1906_v48 }
  0x2c   : > { %304 = vst.msk [vmem:[#allocation2 + $0x48] sm:$0xff] %vm294_vm0, %v271_v34  ;;  %v460_v16 = vadd.f32 %v444_v24, %v423_v22  ;;  %321 = vst.msk [vmem:[#allocation2 + $0xd0] sm:$0xff] %vm294_vm0, %v288_v6  ;;  %v717_v61 = vld [vmem:[#allocation2 + $0xa0] sm:$0xff]  ;;  %v646_v35 = vmul.f32 %v1813_v47, %v1997_v31  ;;  %v272_v40 = vmul.f32 %v1721_v11, %v1985_v15  ;;  %v787_v52 = vmax.f32 %v755_v25, 0.0  ;;  %v236_v34 = vld [vmem:[%s1716_s14 + $0x58] sm:$0xff] }
  0x2d   : > { %593 = vst.msk [vmem:[#allocation2 + $0x30] sm:$0xf] %vm345_vm1, %v577_v3  ;;  %484 = vst.msk [vmem:[#allocation2 + $0xbc] sm:$0xf] %vm345_vm1, %v468_v14  ;;  %v350_v50 = vld [vmem:[#allocation2 + $0xc0] sm:$0xff]  ;;  %1587 = vmatprep.mubr.msk.f32.mxu1 %vm294_vm0, %v786_v19  ;;  %v756_v42 = vadd.f32 %v1911_v49, %v717_v61  ;;  %v364_v62 = vmul.f32 %v1961_v33, %v1736_v18  ;;  %v2024_v1 = vld [vmem:[%s1716_s14 + $0xf8] sm:$0xff]  ;;  %v2028_v3 = vmul.f32 %v1733_v17, %v236_v34 }
  0x2e   : > { %658 = vst.msk [vmem:[#allocation2 + $0x10] sm:$0xff] %vm294_vm0, %v650_v0  ;;  %v2010_v24 = vld [vmem:[%s2355_s1 + $0x2] ss:$0 sm:$0xff]  ;;  %v371_v44 = vadd.f32 %v363_v10, %v350_v50  ;;  %305 = vst.msk [vmem:[#allocation2 + $0x50] sm:$0xff] %vm294_vm0, %v272_v40  ;;  %v289_v9 = vmul.f32 %v1721_v11, %v1883_v27  ;;  %1588 = vmatmul.mubr.msk.f32.gmra.mrb[2].mxu1 %vm294_vm0, %v787_v52  ;;  %v718_v63 = vld [vmem:[#allocation2 + $0xa8] sm:$0xff]  ;;  %v2035_v20 = vmul.f32 %v1789_v38, %v2024_v1 }
  0x2f   : > { %624 = vst.msk [vmem:[#allocation2 + $0x1c] sm:$0xf] %vm345_vm1, %v620_v28  ;;  %v631_v5 = vld [vmem:[#allocation2 + $0x20] sm:$0xff]  ;;  %476 = vst.msk [vmem:[#allocation2 + $0x3c] sm:$0xf] %vm345_vm1, %v460_v16  ;;  %v628_v6 = vld [vmem:[#allocation2 + $0x8] sm:$0xff]  ;;  %v365_v14 = vmul.f32 %v1961_v33, %v1754_v26  ;;  %v757_v19 = vadd.f32 %v1911_v49, %v718_v63  ;;  %v618_v53 = vmul.f32 %v1784_v37, %v1997_v31 }
  0x30   : > { %v493_v60 = vld [vmem:[#allocation2 + $0x40] sm:$0xf]  ;;  %v652_v48 = vadd.f32 %v644_v8, %v631_v5  ;;  %v788_v10 = vmax.f32 %v756_v42, 0.0  ;;  %379 = vst.msk [vmem:[#allocation2 + $0xc0] sm:$0xff] %vm294_vm0, %v371_v44  ;;  %v2040_v8 = vmul.f32 %v2010_v24, %v1736_v18  ;;  %v649_v22 = vadd.f32 %v1866_v12, %v628_v6  ;;  %322 = vst.msk [vmem:[#allocation2 + $0xd8] sm:$0xff] %vm294_vm0, %v289_v9 }
  0x31   : > { %v578_v2 = vadd.f32 %v546_v23, %v493_v60  ;;  %v664_v0 = vld [vmem:[#allocation2] sm:$0xf]  ;;  %v608_v38 = vld [vmem:[#allocation2 + $0x2c] sm:$0xf]  ;;  %v273_v18 = vmul.f32 %v1721_v11, %v236_v34  ;;  %v290_v50 = vmul.f32 %v1721_v11, %v1971_v56  ;;  %v789_v40 = vmax.f32 %v757_v19, 0.0 }
  0x32   : > { %v689_v23 = vadd.f32 %v681_v13, %v664_v0  ;;  %660 = vst.msk [vmem:[#allocation2 + $0x20] sm:$0xff] %vm294_vm0, %v652_v48  ;;  %v351_v25 = vld [vmem:[#allocation2 + $0xc8] sm:$0xff]  ;;  %v2053_v28 = vld [vmem:[%s1716_s14 + $0x60] sm:$0xff]  ;;  %1590 = vmatprep.mubr.msk.f32.mxu1 %vm294_vm0, %v788_v10  ;;  %v621_v12 = vadd.f32 %v617_v32, %v608_v38  ;;  %v719_v16 = vld [vmem:[#allocation2 + $0xb0] sm:$0xff]  ;;  %v547_v32 = vrot.slane %v2028_v3, 4  ;;  %v404_v34 = vrot.slane %v2040_v8, 4 }
  0x33   : > { %594 = vst.msk [vmem:[#allocation2 + $0x40] sm:$0xf] %vm345_vm1, %v578_v2  ;;  %v372_v13 = vadd.f32 %v364_v62, %v351_v25  ;;  %v424_v61 = vld [vmem:[#allocation2 + $0x4c] sm:$0xf]  ;;  %v758_v52 = vadd.f32 %v1911_v49, %v719_v16  ;;  %v352_v44 = vld [vmem:[#allocation2 + $0xd0] sm:$0xff]  ;;  %1591 = vmatmul.mubr.msk.f32.gmra.mrb[4].mxu1 %vm294_vm0, %v789_v40  ;;  %v338_v0 = vmul.f32 %v1932_v58, %v1754_v26 }
  0x34   : > { %693 = vst.msk [vmem:[#allocation2] sm:$0xf] %vm345_vm1, %v689_v23  ;;  %v633_v42 = vld [vmem:[#allocation2 + $0x30] sm:$0xff]  ;;  %v461_v5 = vadd.f32 %v445_v36, %v424_v61  ;;  %625 = vst.msk [vmem:[#allocation2 + $0x2c] sm:$0xf] %vm345_vm1, %v621_v12  ;;  %v720_v62 = vld [vmem:[#allocation2 + $0xb8] sm:$0xff]  ;;  %v373_v48 = vadd.f32 %v365_v14, %v352_v44  ;;  %v274_v36 = vmul.f32 %v1721_v11, %v2053_v28 }
  0x35   : > { %657 = vst.msk [vmem:[#allocation2 + $0x8] sm:$0xff] %vm294_vm0, %v649_v22  ;;  %306 = vst.msk [vmem:[#allocation2 + $0x58] sm:$0xff] %vm294_vm0, %v273_v18  ;;  %v665_v37 = vld [vmem:[#allocation2 + $0x10] sm:$0xf]  ;;  %v654_v60 = vadd.f32 %v646_v35, %v633_v42  ;;  %v790_v9 = vmax.f32 %v758_v52, 0.0  ;;  %v759_v35 = vadd.f32 %v1911_v49, %v720_v62  ;;  %v397_v39 = vmul.f32 %v2010_v24, %v1763_v29  ;;  %v238_v14 = vld [vmem:[%s1716_s14 + $0x68] sm:$0xff] }
  0x36   : > { %380 = vst.msk [vmem:[#allocation2 + $0xc8] sm:$0xff] %vm294_vm0, %v372_v13  ;;  %323 = vst.msk [vmem:[#allocation2 + $0xe0] sm:$0xff] %vm294_vm0, %v290_v50  ;;  %v690_v2 = vadd.f32 %v682_v54, %v665_v37  ;;  %v630_v3 = vld [vmem:[#allocation2 + $0x18] sm:$0xff]  ;;  %v446_v54 = vmul.f32 %v1768_v30, %v1985_v15  ;;  %v494_v8 = vld [vmem:[#allocation2 + $0x50] sm:$0xf]  ;;  %v2090_v23 = vmul.f32 %v1733_v17, %v238_v14  ;;  %v554_v13 = vrot.slane %v1808_v46, 4 }
  0x37   : > { %v609_v6 = vld [vmem:[#allocation2 + $0x3c] sm:$0xf]  ;;  %477 = vst.msk [vmem:[#allocation2 + $0x4c] sm:$0xf] %vm345_vm1, %v461_v5  ;;  %v651_v10 = vadd.f32 %v1920_v51, %v630_v3  ;;  %1593 = vmatprep.mubr.msk.f32.mxu1 %vm294_vm0, %v790_v9  ;;  %v791_v26 = vmax.f32 %v759_v35, 0.0  ;;  %v579_v22 = vadd.f32 %v547_v32, %v494_v8  ;;  %v291_v19 = vmul.f32 %v1721_v11, %v1900_v43  ;;  %v2109_v50 = vld [vmem:[%s1716_s14 + $0x70] sm:$0xff] }
  0x38   : > { %662 = vst.msk [vmem:[#allocation2 + $0x30] sm:$0xff] %vm294_vm0, %v654_v60  ;;  %v622_v63 = vadd.f32 %v618_v53, %v609_v6  ;;  %381 = vst.msk [vmem:[#allocation2 + $0xd0] sm:$0xff] %vm294_vm0, %v373_v48  ;;  %v387_v51 = vld [vmem:[#allocation2 + $0xc0] sm:$0xf]  ;;  %v645_v38 = vmul.f32 %v1813_v47, %v1900_v43  ;;  %v453_v18 = vmul.f32 %v1768_v30, %v1804_v45  ;;  %v329_v12 = vld [vmem:[#allocation2 + $0xdc] sm:$0xf] }
  0x39   : > { %307 = vst.msk [vmem:[#allocation2 + $0x60] sm:$0xff] %vm294_vm0, %v274_v36  ;;  %659 = vst.msk [vmem:[#allocation2 + $0x18] sm:$0xff] %vm294_vm0, %v651_v10  ;;  %v666_v15 = vld [vmem:[#allocation2 + $0x20] sm:$0xf]  ;;  %v412_v25 = vadd.f32 %v404_v34, %v387_v51  ;;  %v367_v16 = vmul.f32 %v1961_v33, %v1796_v41  ;;  %1594 = vmatmul.mubr.msk.f32.gmra.mrb[6].mxu1 %vm294_vm0, %v791_v26  ;;  %v342_v61 = vadd.f32 %v338_v0, %v329_v12  ;;  %v240_v12 = vld [vmem:[%s1716_s14 + $0x78] sm:$0xff]  ;;  %s1471_s14 = sshll.u32 %s2361_s19, 7 }
  0x3a   : > { %694 = vst.msk [vmem:[#allocation2 + $0x10] sm:$0xf] %vm345_vm1, %v690_v2  ;;  %626 = vst.msk [vmem:[#allocation2 + $0x3c] sm:$0xf] %vm345_vm1, %v622_v63  ;;  %v691_v53 = vadd.f32 %v683_v59, %v666_v15  ;;  %v684_v52 = vrot.slane %v2035_v20, 4  ;;  %v405_v42 = vrot.slane %v397_v39, 4  ;;  %v275_v59 = vmul.f32 %v1721_v11, %v238_v14  ;;  %s2255_s17 = scalar_lea.vmem %s2359_s5, %s1471_s14 }
  0x3b   : > { %595 = vst.msk [vmem:[#allocation2 + $0x50] sm:$0xf] %vm345_vm1, %v579_v22  ;;  %v697_v40 = vld [vmem:[#allocation2] sm:$0xff]  ;;  %416 = vst.msk [vmem:[#allocation2 + $0xc0] sm:$0xf] %vm345_vm1, %v412_v25  ;;  %v292_v5 = vmul.f32 %v1721_v11, %v1997_v31  ;;  %v632_v37 = vld [vmem:[#allocation2 + $0x28] sm:$0xff]  ;;  %v647_v36 = vmul.f32 %v1813_v47, %v2024_v1  ;;  %v2127_v10 = vmul.f32 %v1733_v17, %v1883_v27 }
  0x3c   : > { %324 = vst.msk [vmem:[#allocation2 + $0xe8] sm:$0xff] %vm294_vm0, %v291_v19  ;;  %v698_v45 = vld [vmem:[#allocation2 + $0x8] sm:$0xff]  ;;  %v425_v57 = vld [vmem:[#allocation2 + $0x5c] sm:$0xf]  ;;  %v736_v44 = vadd.f32 %v1911_v49, %v697_v40  ;;  %v548_v34 = vrot.slane %v2090_v23, 4  ;;  %v653_v48 = vadd.f32 %v645_v38, %v632_v37  ;;  %308 = vst.msk [vmem:[#allocation2 + $0x68] sm:$0xff] %vm294_vm0, %v275_v59  ;;  %v339_v63 = vmul.f32 %v1932_v58, %v1796_v41 }
  0x3d   : > { %v737_v32 = vadd.f32 %v1911_v49, %v698_v45  ;;  %695 = vst.msk [vmem:[#allocation2 + $0x20] sm:$0xf] %vm345_vm1, %v691_v53  ;;  %v432_v60 = vld [vmem:[#allocation2 + $0xcc] sm:$0xf]  ;;  %347 = vst.msk [vmem:[#allocation2 + $0xdc] sm:$0xf] %vm345_vm1, %v342_v61  ;;  %v462_v20 = vadd.f32 %v446_v54, %v425_v57  ;;  %v398_v8 = vmul.f32 %v2010_v24, %v1830_v55 }
  0x3e   : > { %v354_v62 = vld [vmem:[#allocation2 + $0xe0] sm:$0xff]  ;;  %v469_v2 = vadd.f32 %v453_v18, %v432_v60  ;;  %325 = vst.msk [vmem:[#allocation2 + $0xf0] sm:$0xff] %vm294_vm0, %v292_v5  ;;  %v768_v9 = vmax.f32 %v736_v44, 0.0  ;;  %661 = vst.msk [vmem:[#allocation2 + $0x28] sm:$0xff] %vm294_vm0, %v653_v48  ;;  %v276_v27 = vmul.f32 %v1721_v11, %v2109_v50  ;;  %v366_v22 = vmul.f32 %v1961_v33, %v1763_v29 }
  0x3f   : > { %v375_v3 = vadd.f32 %v367_v16, %v354_v62  ;;  %v769_v35 = vmax.f32 %v737_v32, 0.0  ;;  %v667_v6 = vld [vmem:[#allocation2 + $0x30] sm:$0xf]  ;;  %478 = vst.msk [vmem:[#allocation2 + $0x5c] sm:$0xf] %vm345_vm1, %v462_v20  ;;  %v447_v23 = vmul.f32 %v1768_v30, %v2053_v28  ;;  %v369_v18 = vmul.f32 %v1961_v33, %v1844_v4  ;;  %v705_v37 = vld [vmem:[#allocation2 + $0x40] sm:$0xff] }
  0x40   : > { %v388_v0 = vld [vmem:[#allocation2 + $0xd0] sm:$0xf]  ;;  %v692_v39 = vadd.f32 %v684_v52, %v667_v6  ;;  %485 = vst.msk [vmem:[#allocation2 + $0xcc] sm:$0xf] %vm345_vm1, %v469_v2  ;;  %v495_v14 = vld [vmem:[#allocation2 + $0x60] sm:$0xf]  ;;  %1560 = vmatprep.mubr.msk.f32.mxu0 %vm294_vm0, %v768_v9  ;;  %v293_v29 = vmul.f32 %v1721_v11, %v2024_v1  ;;  %v517_v61 = vmul.f32 %v1733_v17, %v240_v12 }
  0x41   : > { %v699_v47 = vld [vmem:[#allocation2 + $0x10] sm:$0xff]  ;;  %v413_v54 = vadd.f32 %v405_v42, %v388_v0  ;;  %383 = vst.msk [vmem:[#allocation2 + $0xe0] sm:$0xff] %vm294_vm0, %v375_v3  ;;  %v700_v26 = vld [vmem:[#allocation2 + $0x18] sm:$0xff]  ;;  %v580_v19 = vadd.f32 %v548_v34, %v495_v14  ;;  %1561 = vmatmul.mubr.msk.f32.vlgmr.msra.gmra.mrb[0].mxu0 %vm294_vm0, %v769_v35  ;;  %309 = vst.msk [vmem:[#allocation2 + $0x70] sm:$0xff] %vm294_vm0, %v276_v27  ;;  %v406_v57 = vrot.slane %v398_v8, 4  ;;  %v555_v46 = vrot.slane %v2127_v10, 4 }
  0x42   : > { %v738_v41 = vadd.f32 %v1911_v49, %v699_v47  ;;  %v634_v51 = vld [vmem:[#allocation2 + $0x38] sm:$0xff]  ;;  %v739_v15 = vadd.f32 %v1911_v49, %v700_v26  ;;  %696 = vst.msk [vmem:[#allocation2 + $0x30] sm:$0xf] %vm345_vm1, %v692_v39  ;;  %v501_v16 = vld [vmem:[#allocation2 + $0xc0] sm:$0xf]  ;;  %v277_v20 = vmul.f32 %v1721_v11, %v240_v12  ;;  %v549_v2 = vrot.slane %v517_v61, 4 }
  0x43   : > { %v655_v38 = vadd.f32 %v647_v36, %v634_v51  ;;  %417 = vst.msk [vmem:[#allocation2 + $0xd0] sm:$0xf] %vm345_vm1, %v413_v54  ;;  %v330_v25 = vld [vmem:[#allocation2 + $0xec] sm:$0xf]  ;;  %596 = vst.msk [vmem:[#allocation2 + $0x60] sm:$0xf] %vm345_vm1, %v580_v19  ;;  %v586_v52 = vadd.f32 %v554_v13, %v501_v16  ;;  %v399_v36 = vmul.f32 %v2010_v24, %v1876_v21 }
  0x44   : > { %v770_v28 = vmax.f32 %v738_v41, 0.0  ;;  %v343_v53 = vadd.f32 %v339_v63, %v330_v25  ;;  %v771_v40 = vmax.f32 %v739_v15, 0.0  ;;  %v701_v45 = vld [vmem:[#allocation2 + $0x20] sm:$0xff]  ;;  %v353_v42 = vld [vmem:[#allocation2 + $0xd8] sm:$0xff]  ;;  %326 = vst.msk [vmem:[#allocation2 + $0xf8] sm:$0xff] %vm294_vm0, %v293_v29  ;;  %v706_v35 = vld [vmem:[#allocation2 + $0x48] sm:$0xff]  ;;  %v340_v11 = vmul.f32 %v1932_v58, %v1844_v4 }
  0x45   : > { %663 = vst.msk [vmem:[#allocation2 + $0x38] sm:$0xff] %vm294_vm0, %v655_v38  ;;  %v740_v59 = vadd.f32 %v1911_v49, %v701_v45  ;;  %v374_v5 = vadd.f32 %v366_v22, %v353_v42  ;;  %v426_v44 = vld [vmem:[#allocation2 + $0x6c] sm:$0xf]  ;;  %v356_v32 = vld [vmem:[#allocation2 + $0xf0] sm:$0xff]  ;;  %310 = vst.msk [vmem:[#allocation2 + $0x78] sm:$0xff] %vm294_vm0, %v277_v20  ;;  %v744_v24 = vadd.f32 %v1911_v49, %v705_v37 }
  0x46   : > { %1563 = vmatprep.mubr.msk.f32.mxu0 %vm294_vm0, %v770_v28  ;;  %348 = vst.msk [vmem:[#allocation2 + $0xec] sm:$0xf] %vm345_vm1, %v343_v53  ;;  %602 = vst.msk [vmem:[#allocation2 + $0xc0] sm:$0xf] %vm345_vm1, %v586_v52  ;;  %v463_v13 = vadd.f32 %v447_v23, %v426_v44  ;;  %v377_v60 = vadd.f32 %v369_v18, %v356_v32  ;;  %v702_v34 = vld [vmem:[#allocation2 + $0x28] sm:$0xff]  ;;  %v454_v63 = vmul.f32 %v1768_v30, %v1855_v7  ;;  %v707_v4 = vld [vmem:[#allocation2 + $0x50] sm:$0xff] }
  0x47   : > { %1564 = vmatmul.mubr.msk.f32.gmra.mrb[2].mxu0 %vm294_vm0, %v771_v40  ;;  %v772_v62 = vmax.f32 %v740_v59, 0.0  ;;  %382 = vst.msk [vmem:[#allocation2 + $0xd8] sm:$0xff] %vm294_vm0, %v374_v5  ;;  %v741_v3 = vadd.f32 %v1911_v49, %v702_v34  ;;  %v722_v9 = vld [vmem:[#allocation2 + $0xc8] sm:$0xff]  ;;  %v368_v47 = vmul.f32 %v1961_v33, %v1830_v55  ;;  %v524_v58 = vmul.f32 %v1733_v17, %v1900_v43  ;;  %v708_v12 = vld [vmem:[#allocation2 + $0x58] sm:$0xff] }
  0x48   : > { %v389_v48 = vld [vmem:[#allocation2 + $0xe0] sm:$0xf]  ;;  %479 = vst.msk [vmem:[#allocation2 + $0x6c] sm:$0xf] %vm345_vm1, %v463_v13  ;;  %v496_v39 = vld [vmem:[#allocation2 + $0x70] sm:$0xf]  ;;  %v761_v41 = vadd.f32 %v1911_v49, %v722_v9  ;;  %v745_v26 = vadd.f32 %v1911_v49, %v706_v35  ;;  %v448_v15 = vmul.f32 %v1768_v30, %v2109_v50  ;;  %v746_v18 = vadd.f32 %v1911_v49, %v707_v4 }
  0x49   : > { %v414_v6 = vadd.f32 %v406_v57, %v389_v48  ;;  %385 = vst.msk [vmem:[#allocation2 + $0xf0] sm:$0xff] %vm294_vm0, %v377_v60  ;;  %1566 = vmatprep.mubr.msk.f32.mxu0 %vm294_vm0, %v772_v62  ;;  %v703_v0 = vld [vmem:[#allocation2 + $0x30] sm:$0xff]  ;;  %v773_v54 = vmax.f32 %v741_v3, 0.0  ;;  %v407_v7 = vrot.slane %v399_v36, 4  ;;  %v581_v51 = vadd.f32 %v549_v2, %v496_v39 }
  0x4a   : > { %v502_v10 = vld [vmem:[#allocation2 + $0xd0] sm:$0xf]  ;;  %v742_v8 = vadd.f32 %v1911_v49, %v703_v0  ;;  %v776_v25 = vmax.f32 %v744_v24, 0.0  ;;  %v556_v61 = vrot.slane %v524_v58, 4  ;;  %v709_v40 = vld [vmem:[#allocation2 + $0x60] sm:$0xff]  ;;  %v793_v50 = vmax.f32 %v761_v41, 0.0 }
  0x4b   : > { %v587_v14 = vadd.f32 %v555_v46, %v502_v10  ;;  %418 = vst.msk [vmem:[#allocation2 + $0xe0] sm:$0xf] %vm345_vm1, %v414_v6  ;;  %v331_v22 = vld [vmem:[#allocation2 + $0xfc] sm:$0xf]  ;;  %1567 = vmatmul.mubr.msk.f32.gmra.mrb[4].mxu0 %vm294_vm0, %v773_v54  ;;  %597 = vst.msk [vmem:[#allocation2 + $0x70] sm:$0xf] %vm345_vm1, %v581_v51  ;;  %v747_v5 = vadd.f32 %v1911_v49, %v708_v12  ;;  %v748_v13 = vadd.f32 %v1911_v49, %v709_v40 }
  0x4c   : > { %v704_v27 = vld [vmem:[#allocation2 + $0x38] sm:$0xff]  ;;  %v774_v55 = vmax.f32 %v742_v8, 0.0  ;;  %v344_v43 = vadd.f32 %v340_v11, %v331_v22  ;;  %v777_v45 = vmax.f32 %v745_v26, 0.0  ;;  %v778_v37 = vmax.f32 %v746_v18, 0.0  ;;  %v2247_v18 = vld [vmem:[%s2358_s4] ss:$0 sm:$0xff] }
  0x4d   : > { %v743_v23 = vadd.f32 %v1911_v49, %v704_v27  ;;  %603 = vst.msk [vmem:[#allocation2 + $0xd0] sm:$0xf] %vm345_vm1, %v587_v14  ;;  %v355_v19 = vld [vmem:[#allocation2 + $0xe8] sm:$0xff]  ;;  %v721_v38 = vld [vmem:[#allocation2 + $0xc0] sm:$0xff]  ;;  %v427_v57 = vld [vmem:[#allocation2 + $0x7c] sm:$0xf]  ;;  %v525_v62 = vmul.f32 %v1733_v17, %v2024_v1  ;;  %v370_v34 = vmul.f32 %v1961_v33, %v1876_v21  ;;  %v455_v36 = vmul.f32 %v1768_v30, %v1971_v56 }
  0x4e   : > { %v376_v29 = vadd.f32 %v368_v47, %v355_v19  ;;  %1569 = vmatprep.mubr.msk.f32.mxu0 %vm294_vm0, %v774_v55  ;;  %v760_v16 = vadd.f32 %v1911_v49, %v721_v38  ;;  %v433_v53 = vld [vmem:[#allocation2 + $0xdc] sm:$0xf]  ;;  %349 = vst.msk [vmem:[#allocation2 + $0xfc] sm:$0xf] %vm345_vm1, %v344_v43  ;;  %v464_v32 = vadd.f32 %v448_v15, %v427_v57  ;;  %v779_v3 = vmax.f32 %v747_v5, 0.0 }
  0x4f   : > { %v775_v28 = vmax.f32 %v743_v23, 0.0  ;;  %v470_v52 = vadd.f32 %v454_v63, %v433_v53  ;;  %v710_v60 = vld [vmem:[#allocation2 + $0x68] sm:$0xff]  ;;  %v780_v21 = vmax.f32 %v748_v13, 0.0  ;;  %v557_v11 = vrot.slane %v525_v62, 4 }
  0x50   : > { %384 = vst.msk [vmem:[#allocation2 + $0xe8] sm:$0xff] %vm294_vm0, %v376_v29  ;;  %v390_v42 = vld [vmem:[#allocation2 + $0xf0] sm:$0xf]  ;;  %v792_v59 = vmax.f32 %v760_v16, 0.0  ;;  %v749_v17 = vadd.f32 %v1911_v49, %v710_v60  ;;  %v456_v41 = vmul.f32 %v1768_v30, %v1997_v31 }
  0x51   : > { %1570 = vmatmul.mubr.msk.f32.gmra.mrb[6].mxu0 %vm294_vm0, %v775_v28  ;;  %v415_v44 = vadd.f32 %v407_v7, %v390_v42  ;;  %486 = vst.msk [vmem:[#allocation2 + $0xdc] sm:$0xf] %vm345_vm1, %v470_v52  ;;  %480 = vst.msk [vmem:[#allocation2 + $0x7c] sm:$0xf] %vm345_vm1, %v464_v32 }
  0x52   : > { %1572 = vmatprep.mubr.msk.f32.mxu0 %vm294_vm0, %v776_v25  ;;  %v503_v46 = vld [vmem:[#allocation2 + $0xe0] sm:$0xf]  ;;  %1596 = vmatprep.mubr.msk.f32.mxu1 %vm294_vm0, %v792_v59  ;;  %v711_v1 = vld [vmem:[#allocation2 + $0x70] sm:$0xff]  ;;  %v781_v10 = vmax.f32 %v749_v17, 0.0 }
  0x53   : > { %v588_v20 = vadd.f32 %v556_v61, %v503_v46  ;;  %419 = vst.msk [vmem:[#allocation2 + $0xf0] sm:$0xf] %vm345_vm1, %v415_v44  ;;  %1597 = vmatmul.mubr.msk.f32.gmra.mrb[8].mxu1 %vm294_vm0, %v793_v50  ;;  %v750_v33 = vadd.f32 %v1911_v49, %v711_v1 }
  0x54   : > { %v723_v48 = vld [vmem:[#allocation2 + $0xd0] sm:$0xff] }
  0x55   : > { %1573 = vmatmul.mubr.msk.f32.gmra.mrb[8].mxu0 %vm294_vm0, %v777_v45  ;;  %v762_v2 = vadd.f32 %v1911_v49, %v723_v48  ;;  %604 = vst.msk [vmem:[#allocation2 + $0xe0] sm:$0xf] %vm345_vm1, %v588_v20  ;;  %v357_v9 = vld [vmem:[#allocation2 + $0xf8] sm:$0xff]  ;;  %v782_v39 = vmax.f32 %v750_v33, 0.0 }
  0x56   : > { %1575 = vmatprep.mubr.msk.f32.mxu0 %vm294_vm0, %v778_v37  ;;  %v378_v56 = vadd.f32 %v370_v34, %v357_v9 }
  0x57   : > { %v794_v35 = vmax.f32 %v762_v2, 0.0  ;;  %v434_v6 = vld [vmem:[#allocation2 + $0xec] sm:$0xf] }
  0x58   : > { %v471_v0 = vadd.f32 %v455_v36, %v434_v6  ;;  %v724_v24 = vld [vmem:[#allocation2 + $0xd8] sm:$0xff]  ;;  %386 = vst.msk [vmem:[#allocation2 + $0xf8] sm:$0xff] %vm294_vm0, %v378_v56 }
  0x59   : > { %1599 = vmatprep.mubr.msk.f32.mxu1 %vm294_vm0, %v794_v35  ;;  %1576 = vmatmul.mubr.msk.f32.gmra.mrb[10].mxu0 %vm294_vm0, %v779_v3  ;;  %v763_v63 = vadd.f32 %v1911_v49, %v724_v24  ;;  %v712_v54 = vld [vmem:[#allocation2 + $0x78] sm:$0xff] }
  0x5a   : > { %1578 = vmatprep.mubr.msk.f32.mxu0 %vm294_vm0, %v780_v21  ;;  %487 = vst.msk [vmem:[#allocation2 + $0xec] sm:$0xf] %vm345_vm1, %v471_v0  ;;  %v504_v47 = vld [vmem:[#allocation2 + $0xf0] sm:$0xf]  ;;  %v751_v14 = vadd.f32 %v1911_v49, %v712_v54 }
  0x5b   : > { %v589_v8 = vadd.f32 %v557_v11, %v504_v47  ;;  %v795_v4 = vmax.f32 %v763_v63, 0.0 }
  0x5c   : > { %v725_v58 = vld [vmem:[#allocation2 + $0xe0] sm:$0xff]  ;;  %v783_v26 = vmax.f32 %v751_v14, 0.0 }
  0x5d   : > { %v764_v27 = vadd.f32 %v1911_v49, %v725_v58  ;;  %1579 = vmatmul.mubr.msk.f32.gmra.mrb[12].mxu0 %vm294_vm0, %v781_v10  ;;  %605 = vst.msk [vmem:[#allocation2 + $0xf0] sm:$0xf] %vm345_vm1, %v589_v8  ;;  %1600 = vmatmul.mubr.msk.f32.gmra.mrb[10].mxu1 %vm294_vm0, %v795_v4 }
  0x5e   : > { %1581 = vmatprep.mubr.msk.f32.mxu0 %vm294_vm0, %v782_v39 }
  0x5f   : > { %v796_v7 = vmax.f32 %v764_v27, 0.0  ;;  %v435_v51 = vld [vmem:[#allocation2 + $0xfc] sm:$0xf] }
  0x60   : > { %v472_v55 = vadd.f32 %v456_v41, %v435_v51 }
  0x61   : > { %1602 = vmatprep.mubr.msk.f32.mxu1 %vm294_vm0, %v796_v7  ;;  %v726_v22 = vld [vmem:[#allocation2 + $0xe8] sm:$0xff]  ;;  %1582 = vmatmul.mubr.msk.f32.gmra.mrb[14].mxu0 %vm294_vm0, %v783_v26 }
  0x62   : > { %v765_v23 = vadd.f32 %v1911_v49, %v726_v22  ;;  %488 = vst.msk [vmem:[#allocation2 + $0xfc] sm:$0xf] %vm345_vm1, %v472_v55 }
  0x64   : > { %v797_v19 = vmax.f32 %v765_v23, 0.0  ;;  %v727_v30 = vld [vmem:[#allocation2 + $0xf0] sm:$0xff] }
  0x65   : > { %v766_v31 = vadd.f32 %v1911_v49, %v727_v30 }
  0x66   : > { %1603 = vmatmul.mubr.msk.f32.gmra.mrb[12].mxu1 %vm294_vm0, %v797_v19 }
  0x67   : > { %v798_v15 = vmax.f32 %v766_v31, 0.0 }
  0x69   : > { %1605 = vmatprep.mubr.msk.f32.mxu1 %vm294_vm0, %v798_v15  ;;  %v728_v43 = vld [vmem:[#allocation2 + $0xf8] sm:$0xff] }
  0x6a   : > { %v767_v38 = vadd.f32 %v1911_v49, %v728_v43 }
  0x6c   : > { %v799_v25 = vmax.f32 %v767_v38, 0.0 }
  0x6e   : > { %1606 = vmatmul.mubr.msk.f32.gmra.mrb[14].mxu1 %vm294_vm0, %v799_v25 }
  0xfd   : > { %v1586_v12 = vpop.f32.mrb[0].mxu1 }
  0xfe   : > { %v1063_v29 = vadd.f32 %v1586_v12, %v2247_v18  ;;  %v1057_v28 = vpop.f32.mrb[1].mxu1 }
  0xff   : > { %v1058_v16 = vadd.f32 %v2247_v18, %v1057_v28 }
 0x100   : > { %v1153_v53 = vmax.f32 %v1063_v29, 0.0 }
 0x101   : > { %v1152_v49 = vmax.f32 %v1058_v16, 0.0  ;;  %v1589_v40 = vpop.f32.mrb[2].mxu1 }
 0x102   : > { %v1489_v61 = vpack.c.bf16 %v1153_v53, %v1153_v53  ;;  %v1073_v45 = vadd.f32 %v1589_v40, %v2247_v18  ;;  %v1067_v52 = vpop.f32.mrb[3].mxu1 }
 0x103   : > { %v1488_v50 = vpack.c.bf16 %v1152_v49, %v1152_v49  ;;  %v1068_v42 = vadd.f32 %v2247_v18, %v1067_v52 }
 0x104   : > { %1314 = vst.msk [vmem:[%s2255_s17 + $0x44] sm:$0xf] %vm1296_vm2, %v1489_v61  ;;  %v1155_v57 = vmax.f32 %v1073_v45, 0.0 }
 0x105   : > { %1313 = vst.msk [vmem:[%s2255_s17 + $0x40] sm:$0xf] %vm1296_vm2, %v1488_v50  ;;  %v1154_v59 = vmax.f32 %v1068_v42, 0.0 }
 0x106   : > { %v1491_v5 = vpack.c.bf16 %v1155_v57, %v1155_v57  ;;  %v1592_v44 = vpop.f32.mrb[4].mxu1 }
 0x107   : > { %v1490_v32 = vpack.c.bf16 %v1154_v59, %v1154_v59  ;;  %v1083_v37 = vadd.f32 %v1592_v44, %v2247_v18  ;;  %v1077_v46 = vpop.f32.mrb[5].mxu1 }
 0x108   : > { %1316 = vst.msk [vmem:[%s2255_s17 + $0x4c] sm:$0xf] %vm1296_vm2, %v1491_v5  ;;  %v1078_v13 = vadd.f32 %v2247_v18, %v1077_v46 }
 0x109   : > { %1315 = vst.msk [vmem:[%s2255_s17 + $0x48] sm:$0xf] %vm1296_vm2, %v1490_v32  ;;  %v1157_v60 = vmax.f32 %v1083_v37, 0.0 }
 0x10a   : > { %v1156_v20 = vmax.f32 %v1078_v13, 0.0 }
 0x10b   : > { %v1493_v34 = vpack.c.bf16 %v1157_v60, %v1157_v60 }
 0x10c   : > { %v1595_v62 = vpop.f32.mrb[6].mxu1  ;;  %v1492_v2 = vpack.c.bf16 %v1156_v20, %v1156_v20 }
 0x10d   : > { %v1093_v48 = vadd.f32 %v1595_v62, %v2247_v18  ;;  %v1087_v36 = vpop.f32.mrb[7].mxu1  ;;  %1318 = vst.msk [vmem:[%s2255_s17 + $0x54] sm:$0xf] %vm1296_vm2, %v1493_v34 }
 0x10e   : > { %v1088_v3 = vadd.f32 %v2247_v18, %v1087_v36  ;;  %1317 = vst.msk [vmem:[%s2255_s17 + $0x50] sm:$0xf] %vm1296_vm2, %v1492_v2 }
 0x10f   : > { %v1159_v17 = vmax.f32 %v1093_v48, 0.0 }
 0x110   : > { %v1158_v1 = vmax.f32 %v1088_v3, 0.0 }
 0x111   : > { %v1495_v21 = vpack.c.bf16 %v1159_v17, %v1159_v17 }
 0x112   : > { %v1494_v33 = vpack.c.bf16 %v1158_v1, %v1158_v1 }
 0x113   : > { %1320 = vst.msk [vmem:[%s2255_s17 + $0x5c] sm:$0xf] %vm1296_vm2, %v1495_v21 }
 0x114   : > { %v1562_v9 = vpop.f32.mrb[0].mxu0  ;;  %1319 = vst.msk [vmem:[%s2255_s17 + $0x58] sm:$0xf] %vm1296_vm2, %v1494_v33 }
 0x115   : > { %v983_v35 = vadd.f32 %v1562_v9, %v2247_v18  ;;  %v977_v6 = vpop.f32.mrb[1].mxu0 }
 0x116   : > { %v978_v11 = vadd.f32 %v2247_v18, %v977_v6 }
 0x117   : > { %v1137_v56 = vmax.f32 %v983_v35, 0.0 }
 0x118   : > { %v1136_v0 = vmax.f32 %v978_v11, 0.0 }
 0x119   : > { %v1473_v10 = vpack.c.bf16 %v1137_v56, %v1137_v56 }
 0x11a   : > { %v1565_v24 = vpop.f32.mrb[2].mxu0  ;;  %v1472_v39 = vpack.c.bf16 %v1136_v0, %v1136_v0 }
 0x11b   : > { %v993_v63 = vadd.f32 %v1565_v24, %v2247_v18  ;;  %v987_v47 = vpop.f32.mrb[3].mxu0  ;;  %1298 = vst.msk [vmem:[%s2255_s17 + $0x4] sm:$0xf] %vm1296_vm2, %v1473_v10 }
 0x11c   : > { %v988_v54 = vadd.f32 %v2247_v18, %v987_v47  ;;  %1297 = vst.msk [vmem:[%s2255_s17] sm:$0xf] %vm1296_vm2, %v1472_v39 }
 0x11d   : > { %v1139_v8 = vmax.f32 %v993_v63, 0.0 }
 0x11e   : > { %v1138_v14 = vmax.f32 %v988_v54, 0.0  ;;  %v1568_v27 = vpop.f32.mrb[4].mxu0 }
 0x11f   : > { %v1475_v4 = vpack.c.bf16 %v1139_v8, %v1139_v8  ;;  %v1003_v41 = vadd.f32 %v1568_v27, %v2247_v18  ;;  %v997_v26 = vpop.f32.mrb[5].mxu0 }
 0x120   : > { %v1474_v58 = vpack.c.bf16 %v1138_v14, %v1138_v14  ;;  %v998_v7 = vadd.f32 %v2247_v18, %v997_v26 }
 0x121   : > { %1300 = vst.msk [vmem:[%s2255_s17 + $0xc] sm:$0xf] %vm1296_vm2, %v1475_v4  ;;  %v1141_v51 = vmax.f32 %v1003_v41, 0.0 }
 0x122   : > { %1299 = vst.msk [vmem:[%s2255_s17 + $0x8] sm:$0xf] %vm1296_vm2, %v1474_v58  ;;  %v1140_v22 = vmax.f32 %v998_v7, 0.0 }
 0x123   : > { %v1477_v23 = vpack.c.bf16 %v1141_v51, %v1141_v51 }
 0x124   : > { %v1571_v55 = vpop.f32.mrb[6].mxu0  ;;  %v1476_v31 = vpack.c.bf16 %v1140_v22, %v1140_v22 }
 0x125   : > { %v1013_v19 = vadd.f32 %v1571_v55, %v2247_v18  ;;  %v1007_v30 = vpop.f32.mrb[7].mxu0  ;;  %1302 = vst.msk [vmem:[%s2255_s17 + $0x14] sm:$0xf] %vm1296_vm2, %v1477_v23 }
 0x126   : > { %v1008_v15 = vadd.f32 %v2247_v18, %v1007_v30  ;;  %v1598_v38 = vpop.f32.mrb[8].mxu1  ;;  %1301 = vst.msk [vmem:[%s2255_s17 + $0x10] sm:$0xf] %vm1296_vm2, %v1476_v31 }
 0x127   : > { %v1143_v43 = vmax.f32 %v1013_v19, 0.0  ;;  %v1103_v12 = vadd.f32 %v1598_v38, %v2247_v18  ;;  %v1097_v28 = vpop.f32.mrb[9].mxu1 }
 0x128   : > { %v1142_v25 = vmax.f32 %v1008_v15, 0.0  ;;  %v1574_v29 = vpop.f32.mrb[8].mxu0  ;;  %v1098_v49 = vadd.f32 %v2247_v18, %v1097_v28 }
 0x129   : > { %v1479_v16 = vpack.c.bf16 %v1143_v43, %v1143_v43  ;;  %v1023_v53 = vadd.f32 %v1574_v29, %v2247_v18  ;;  %v1017_v61 = vpop.f32.mrb[9].mxu0  ;;  %v1161_v50 = vmax.f32 %v1103_v12, 0.0 }
 0x12a   : > { %v1478_v40 = vpack.c.bf16 %v1142_v25, %v1142_v25  ;;  %v1018_v45 = vadd.f32 %v2247_v18, %v1017_v61  ;;  %v1160_v42 = vmax.f32 %v1098_v49, 0.0 }
 0x12b   : > { %1304 = vst.msk [vmem:[%s2255_s17 + $0x1c] sm:$0xf] %vm1296_vm2, %v1479_v16  ;;  %v1145_v52 = vmax.f32 %v1023_v53, 0.0  ;;  %v1497_v57 = vpack.c.bf16 %v1161_v50, %v1161_v50 }
 0x12c   : > { %1303 = vst.msk [vmem:[%s2255_s17 + $0x18] sm:$0xf] %vm1296_vm2, %v1478_v40  ;;  %v1144_v59 = vmax.f32 %v1018_v45, 0.0  ;;  %v1577_v5 = vpop.f32.mrb[10].mxu0  ;;  %v1496_v32 = vpack.c.bf16 %v1160_v42, %v1160_v42 }
 0x12d   : > { %v1481_v44 = vpack.c.bf16 %v1145_v52, %v1145_v52  ;;  %v1033_v37 = vadd.f32 %v1577_v5, %v2247_v18  ;;  %v1027_v46 = vpop.f32.mrb[11].mxu0  ;;  %1322 = vst.msk [vmem:[%s2255_s17 + $0x64] sm:$0xf] %vm1296_vm2, %v1497_v57 }
 0x12e   : > { %v1480_v13 = vpack.c.bf16 %v1144_v59, %v1144_v59  ;;  %v1028_v60 = vadd.f32 %v2247_v18, %v1027_v46  ;;  %1321 = vst.msk [vmem:[%s2255_s17 + $0x60] sm:$0xf] %vm1296_vm2, %v1496_v32 }
 0x12f   : > { %1306 = vst.msk [vmem:[%s2255_s17 + $0x24] sm:$0xf] %vm1296_vm2, %v1481_v44  ;;  %v1147_v20 = vmax.f32 %v1033_v37, 0.0 }
 0x130   : > { %1305 = vst.msk [vmem:[%s2255_s17 + $0x20] sm:$0xf] %vm1296_vm2, %v1480_v13  ;;  %v1146_v62 = vmax.f32 %v1028_v60, 0.0  ;;  %v1580_v34 = vpop.f32.mrb[12].mxu0  ;;  %v1601_v48 = vpop.f32.mrb[10].mxu1 }
 0x131   : > { %v1483_v36 = vpack.c.bf16 %v1147_v20, %v1147_v20  ;;  %v1043_v2 = vadd.f32 %v1580_v34, %v2247_v18  ;;  %v1037_v3 = vpop.f32.mrb[13].mxu0  ;;  %v1113_v17 = vadd.f32 %v1601_v48, %v2247_v18  ;;  %v1107_v1 = vpop.f32.mrb[11].mxu1 }
 0x132   : > { %v1482_v21 = vpack.c.bf16 %v1146_v62, %v1146_v62  ;;  %v1038_v33 = vadd.f32 %v2247_v18, %v1037_v3  ;;  %v1108_v9 = vadd.f32 %v2247_v18, %v1107_v1 }
 0x133   : > { %1308 = vst.msk [vmem:[%s2255_s17 + $0x2c] sm:$0xf] %vm1296_vm2, %v1483_v36  ;;  %v1149_v35 = vmax.f32 %v1043_v2, 0.0  ;;  %v1163_v6 = vmax.f32 %v1113_v17, 0.0 }
 0x134   : > { %1307 = vst.msk [vmem:[%s2255_s17 + $0x28] sm:$0xf] %vm1296_vm2, %v1482_v21  ;;  %v1148_v11 = vmax.f32 %v1038_v33, 0.0  ;;  %v1583_v56 = vpop.f32.mrb[14].mxu0  ;;  %v1162_v0 = vmax.f32 %v1108_v9, 0.0 }
 0x135   : > { %v1485_v24 = vpack.c.bf16 %v1149_v35, %v1149_v35  ;;  %v1053_v10 = vadd.f32 %v1583_v56, %v2247_v18  ;;  %v1047_v63 = vpop.f32.mrb[15].mxu0  ;;  %v1499_v47 = vpack.c.bf16 %v1163_v6, %v1163_v6 }
 0x136   : > { %v1484_v39 = vpack.c.bf16 %v1148_v11, %v1148_v11  ;;  %v1048_v54 = vadd.f32 %v2247_v18, %v1047_v63  ;;  %v1498_v8 = vpack.c.bf16 %v1162_v0, %v1162_v0 }
 0x137   : > { %1310 = vst.msk [vmem:[%s2255_s17 + $0x34] sm:$0xf] %vm1296_vm2, %v1485_v24  ;;  %v1151_v14 = vmax.f32 %v1053_v10, 0.0  ;;  %1324 = vst.msk [vmem:[%s2255_s17 + $0x6c] sm:$0xf] %vm1296_vm2, %v1499_v47 }
 0x138   : > { %1309 = vst.msk [vmem:[%s2255_s17 + $0x30] sm:$0xf] %vm1296_vm2, %v1484_v39  ;;  %v1150_v4 = vmax.f32 %v1048_v54, 0.0  ;;  %1323 = vst.msk [vmem:[%s2255_s17 + $0x68] sm:$0xf] %vm1296_vm2, %v1498_v8 }
 0x139   : > { %v1604_v58 = vpop.f32.mrb[12].mxu1  ;;  %v1487_v27 = vpack.c.bf16 %v1151_v14, %v1151_v14 }
 0x13a   : > { %v1123_v41 = vadd.f32 %v1604_v58, %v2247_v18  ;;  %v1117_v26 = vpop.f32.mrb[13].mxu1  ;;  %v1486_v7 = vpack.c.bf16 %v1150_v4, %v1150_v4 }
 0x13b   : > { %v1118_v51 = vadd.f32 %v2247_v18, %v1117_v26  ;;  %1312 = vst.msk [vmem:[%s2255_s17 + $0x3c] sm:$0xf] %vm1296_vm2, %v1487_v27 }
 0x13c   : > { %v1165_v22 = vmax.f32 %v1123_v41, 0.0  ;;  %1311 = vst.msk [vmem:[%s2255_s17 + $0x38] sm:$0xf] %vm1296_vm2, %v1486_v7 }
 0x13d   : > { %v1164_v55 = vmax.f32 %v1118_v51, 0.0 }
 0x13e   : > { %v1501_v23 = vpack.c.bf16 %v1165_v22, %v1165_v22 }
 0x13f   : > { %v1500_v19 = vpack.c.bf16 %v1164_v55, %v1164_v55 }
 0x140   : > { %1326 = vst.msk [vmem:[%s2255_s17 + $0x74] sm:$0xf] %vm1296_vm2, %v1501_v23 }
 0x141   : > { %1325 = vst.msk [vmem:[%s2255_s17 + $0x70] sm:$0xf] %vm1296_vm2, %v1500_v19  ;;  %v1607_v30 = vpop.f32.mrb[14].mxu1 }
 0x142   : > { %v1133_v31 = vadd.f32 %v1607_v30, %v2247_v18  ;;  %v1127_v15 = vpop.f32.mrb[15].mxu1 }
 0x143   : > { %v1128_v43 = vadd.f32 %v2247_v18, %v1127_v15 }
 0x144   : > { %v1167_v38 = vmax.f32 %v1133_v31, 0.0 }
 0x145   : > { %v1166_v25 = vmax.f32 %v1128_v43, 0.0 }
 0x146   : > { %v1503_v12 = vpack.c.bf16 %v1167_v38, %v1167_v38 }
 0x147   : > { %v1502_v29 = vpack.c.bf16 %v1166_v25, %v1166_v25 }
 0x148   : > { %1328 = vst.msk [vmem:[%s2255_s17 + $0x7c] sm:$0xf] %vm1296_vm2, %v1503_v12 }
 0x149   : > { %1327 = vst.msk [vmem:[%s2255_s17 + $0x78] sm:$0xf] %vm1296_vm2, %v1502_v29 }
 0x14a PF: > { %s15_s18 = sadd.s32 1, %s1646_s18  }
 0x14b   : > { %p12_p4 = scmp.ge.s32.totalorder %s15_s18, 4  }
 0x14d   :  { %14 = sbr.rel (!%p12_p4) target bundleno = 1 (0x1), region = 71 }

// kernel: aspp_forward.7
= control target key start
LH: loop header
LB: loop body
LE: loop exit
PB: predicated region body
PF: predicated region fallthrough
CT: control target
= control target key end

     0   :  { %s1064_s12 = smov 0   ;;  %s1278_s0 = inlined_call_operand.vmem [shape: f32[512,64], index: 0, kind: input, shape index: {}]   ;;  %s1279_s1 = inlined_call_operand.vmem [shape: f32[64,32], index: 1, kind: input, shape index: {}]   ;;  %s1280_s2 = inlined_call_operand.vmem [shape: f32[1,32], index: 2, kind: input, shape index: {}]   ;;  %s1281_s3 = inlined_call_operand.vmem [shape: bf16[512,32], index: 3, kind: output, shape index: {}]  }
   0x1 LB: > { %s792_s13 = sadd.s32 4294967295, %s1042_s12   ;;  %p796_p0 = scmp.ge.s32.totalorder %s1042_s12, 1  ;;  %s1042_s12 = sphi %s1064_s12, %s13_s12  }
   0x2   : > { %p138_p1 = scmp.lt.s32.totalorder %s1042_s12, 3 }
   0x4   : > { %p139_p2 = pnand %p796_p0, %p138_p1 }
   0x5   : > { %v206_v0 = vld [vmem:[%s1279_s1] sm:$0xff] (!%p139_p2)  ;;  %v207_v1 = vld [vmem:[%s1279_s1 + $0x8] sm:$0xff] (!%p139_p2)  ;;  %v208_v2 = vld [vmem:[%s1279_s1 + $0x10] sm:$0xff] (!%p139_p2)  ;;  %s797_s20 = sshll.u32 (!%p139_p2), %s792_s13, 5  ;;  %vm221_vm0 = vcmask (!%p139_p2), 523264   ;;  %vm703_vm1 = vcmask (!%p139_p2), 257024  }
   0x6   : > { %142 = sbr.rel (%p139_p2) target bundleno = 273 (0x111), region = 32  ;;  %v1004_v3 = vpack.c.bf16 (!%p139_p2), %v207_v1, %v206_v0  ;;  %v209_v4 = vld [vmem:[%s1279_s1 + $0x18] sm:$0xff] (!%p139_p2)  ;;  %p163_p3 = scmp.lt.s32.totalorder (!%p139_p2), %s797_s20, 63  ;;  %v210_v6 = vld [vmem:[%s1279_s1 + $0x20] sm:$0xff] (!%p139_p2)  ;;  %v211_v7 = vld [vmem:[%s1279_s1 + $0x28] sm:$0xff] (!%p139_p2) }
   0x7   : > { %v1008_v5 = vpack.c.bf16 (!%p139_p2), %v209_v4, %v208_v2  ;;  %v1012_v8 = vpack.c.bf16 (!%p139_p2), %v211_v7, %v210_v6  ;;  %v212_v9 = vld [vmem:[%s1279_s1 + $0x30] sm:$0xff] (!%p139_p2)  ;;  %v213_v10 = vld [vmem:[%s1279_s1 + $0x38] sm:$0xff] (!%p139_p2)  ;;  %v1171_v44 = vld [vmem:[%s1280_s2] ss:$0 sm:$0xff] (!%p139_p2) }
   0x8   : > { %1005 = vmatprep.subr.bf16.mxu0 (!%p139_p2), %v1004_v3  ;;  %1020 = vmatprep.subr.bf16.mxu1 (!%p139_p2), %v1004_v3  ;;  %v1016_v13 = vpack.c.bf16 (!%p139_p2), %v213_v10, %v212_v9 }
   0x9   : > { %1007 = vmatpush3.bf16.msra.mxu0 (!%p139_p2), %v1004_v3  ;;  %1024 = vmatpush3.bf16.msra.mxu1 (!%p139_p2), %v1004_v3 }
   0xa   : > { %1009 = vmatprep.subr.bf16.mxu0 (!%p139_p2), %v1008_v5  ;;  %1021 = vmatprep.subr.bf16.mxu1 (!%p139_p2), %v1008_v5 }
   0xd   : > { %s1283_s20 = smov (!%p163_p3, %s797_s20), 63  ;;  %1011 = vmatpush3.bf16.msra.mxu0 %v1008_v5  ;;  %1025 = vmatpush3.bf16.msra.mxu1 %v1008_v5 }
   0xe   : > { %s798_s27 = sshll.u32 %s1283_s20, 3  ;;  %1013 = vmatprep.subr.bf16.mxu0 %v1012_v8  ;;  %1022 = vmatprep.subr.bf16.mxu1 %v1012_v8  ;;  %s800_s10 = sshll.u32 %s1283_s20, 2 }
   0xf   : > { %s1102_s7 = scalar_lea.vmem %s1278_s0, %s798_s27  ;;  %s1181_s14 = scalar_lea.vmem %s1281_s3, %s800_s10 }
  0x10   : > { %v174_v11 = vld [vmem:[%s1102_s7] sm:$0xff]  ;;  %v175_v14 = vld [vmem:[%s1102_s7 + $0x8] sm:$0xff]  ;;  %v176_v16 = vld [vmem:[%s1102_s7 + $0x10] sm:$0xff] }
  0x11   : > { %v190_v12 = vld [vmem:[%s1102_s7 + $0x80] sm:$0xff]  ;;  %956 = vmatprep.mubr.msk.f32.mxu0 %vm221_vm0, %v174_v11  ;;  %1015 = vmatpush3.bf16.msra.mxu0 %v1012_v8  ;;  %v191_v15 = vld [vmem:[%s1102_s7 + $0x88] sm:$0xff]  ;;  %v192_v17 = vld [vmem:[%s1102_s7 + $0x90] sm:$0xff] }
  0x12   : > { %980 = vmatprep.mubr.msk.f32.mxu1 %vm221_vm0, %v190_v12  ;;  %1026 = vmatpush3.bf16.msra.mxu1 %v1012_v8  ;;  %v177_v18 = vld [vmem:[%s1102_s7 + $0x18] sm:$0xff]  ;;  %v178_v20 = vld [vmem:[%s1102_s7 + $0x20] sm:$0xff]  ;;  %v179_v22 = vld [vmem:[%s1102_s7 + $0x28] sm:$0xff] }
  0x13   : > { %1017 = vmatprep.subr.bf16.mxu0 %v1016_v13  ;;  %1023 = vmatprep.subr.bf16.mxu1 %v1016_v13  ;;  %v193_v19 = vld [vmem:[%s1102_s7 + $0x98] sm:$0xff]  ;;  %v194_v21 = vld [vmem:[%s1102_s7 + $0xa0] sm:$0xff]  ;;  %v195_v23 = vld [vmem:[%s1102_s7 + $0xa8] sm:$0xff] }
  0x14   : > { %v180_v24 = vld [vmem:[%s1102_s7 + $0x30] sm:$0xff]  ;;  %v181_v26 = vld [vmem:[%s1102_s7 + $0x38] sm:$0xff]  ;;  %v182_v28 = vld [vmem:[%s1102_s7 + $0x40] sm:$0xff] }
  0x15   : > { %1019 = vmatpush3.bf16.msra.mxu0 %v1016_v13  ;;  %v196_v25 = vld [vmem:[%s1102_s7 + $0xb0] sm:$0xff]  ;;  %v197_v27 = vld [vmem:[%s1102_s7 + $0xb8] sm:$0xff]  ;;  %v198_v29 = vld [vmem:[%s1102_s7 + $0xc0] sm:$0xff] }
  0x16   : > { %1027 = vmatpush3.bf16.msra.mxu1 %v1016_v13  ;;  %v183_v30 = vld [vmem:[%s1102_s7 + $0x48] sm:$0xff]  ;;  %v184_v32 = vld [vmem:[%s1102_s7 + $0x50] sm:$0xff]  ;;  %v185_v34 = vld [vmem:[%s1102_s7 + $0x58] sm:$0xff] }
  0x17   : > { %v199_v31 = vld [vmem:[%s1102_s7 + $0xc8] sm:$0xff]  ;;  %v200_v33 = vld [vmem:[%s1102_s7 + $0xd0] sm:$0xff]  ;;  %v201_v35 = vld [vmem:[%s1102_s7 + $0xd8] sm:$0xff] }
  0x18   : > { %957 = vmatmul.mubr.msk.f32.vlgmr.msra.gmra.mrb[0].mxu0 %vm221_vm0, %v175_v14  ;;  %v186_v36 = vld [vmem:[%s1102_s7 + $0x60] sm:$0xff]  ;;  %v187_v38 = vld [vmem:[%s1102_s7 + $0x68] sm:$0xff]  ;;  %v188_v40 = vld [vmem:[%s1102_s7 + $0x70] sm:$0xff] }
  0x19   : > { %981 = vmatmul.mubr.msk.f32.vlgmr.msra.gmra.mrb[0].mxu1 %vm221_vm0, %v191_v15  ;;  %959 = vmatprep.mubr.msk.f32.mxu0 %vm221_vm0, %v176_v16  ;;  %v202_v37 = vld [vmem:[%s1102_s7 + $0xe0] sm:$0xff]  ;;  %v203_v39 = vld [vmem:[%s1102_s7 + $0xe8] sm:$0xff]  ;;  %v204_v41 = vld [vmem:[%s1102_s7 + $0xf0] sm:$0xff] }
  0x1a   : > { %983 = vmatprep.mubr.msk.f32.mxu1 %vm221_vm0, %v192_v17  ;;  %v189_v42 = vld [vmem:[%s1102_s7 + $0x78] sm:$0xff] }
  0x1b   : > { %v205_v43 = vld [vmem:[%s1102_s7 + $0xf8] sm:$0xff] }
  0x1c   : > { %960 = vmatmul.mubr.msk.f32.gmra.mrb[2].mxu0 %vm221_vm0, %v177_v18 }
  0x1d   : > { %984 = vmatmul.mubr.msk.f32.gmra.mrb[2].mxu1 %vm221_vm0, %v193_v19  ;;  %962 = vmatprep.mubr.msk.f32.mxu0 %vm221_vm0, %v178_v20 }
  0x1e   : > { %986 = vmatprep.mubr.msk.f32.mxu1 %vm221_vm0, %v194_v21 }
  0x20   : > { %963 = vmatmul.mubr.msk.f32.gmra.mrb[4].mxu0 %vm221_vm0, %v179_v22 }
  0x21   : > { %987 = vmatmul.mubr.msk.f32.gmra.mrb[4].mxu1 %vm221_vm0, %v195_v23  ;;  %965 = vmatprep.mubr.msk.f32.mxu0 %vm221_vm0, %v180_v24 }
  0x22   : > { %989 = vmatprep.mubr.msk.f32.mxu1 %vm221_vm0, %v196_v25 }
  0x24   : > { %966 = vmatmul.mubr.msk.f32.gmra.mrb[6].mxu0 %vm221_vm0, %v181_v26 }
  0x25   : > { %990 = vmatmul.mubr.msk.f32.gmra.mrb[6].mxu1 %vm221_vm0, %v197_v27  ;;  %968 = vmatprep.mubr.msk.f32.mxu0 %vm221_vm0, %v182_v28 }
  0x26   : > { %992 = vmatprep.mubr.msk.f32.mxu1 %vm221_vm0, %v198_v29 }
  0x28   : > { %969 = vmatmul.mubr.msk.f32.gmra.mrb[8].mxu0 %vm221_vm0, %v183_v30 }
  0x29   : > { %993 = vmatmul.mubr.msk.f32.gmra.mrb[8].mxu1 %vm221_vm0, %v199_v31  ;;  %971 = vmatprep.mubr.msk.f32.mxu0 %vm221_vm0, %v184_v32 }
  0x2a   : > { %995 = vmatprep.mubr.msk.f32.mxu1 %vm221_vm0, %v200_v33 }
  0x2c   : > { %972 = vmatmul.mubr.msk.f32.gmra.mrb[10].mxu0 %vm221_vm0, %v185_v34 }
  0x2d   : > { %996 = vmatmul.mubr.msk.f32.gmra.mrb[10].mxu1 %vm221_vm0, %v201_v35  ;;  %974 = vmatprep.mubr.msk.f32.mxu0 %vm221_vm0, %v186_v36 }
  0x2e   : > { %998 = vmatprep.mubr.msk.f32.mxu1 %vm221_vm0, %v202_v37 }
  0x30   : > { %975 = vmatmul.mubr.msk.f32.gmra.mrb[12].mxu0 %vm221_vm0, %v187_v38 }
  0x31   : > { %999 = vmatmul.mubr.msk.f32.gmra.mrb[12].mxu1 %vm221_vm0, %v203_v39  ;;  %977 = vmatprep.mubr.msk.f32.mxu0 %vm221_vm0, %v188_v40 }
  0x32   : > { %1001 = vmatprep.mubr.msk.f32.mxu1 %vm221_vm0, %v204_v41 }
  0x34   : > { %978 = vmatmul.mubr.msk.f32.gmra.mrb[14].mxu0 %vm221_vm0, %v189_v42 }
  0x35   : > { %1002 = vmatmul.mubr.msk.f32.gmra.mrb[14].mxu1 %vm221_vm0, %v205_v43 }
  0xeb   : > { %v958_v45 = vpop.f32.mrb[0].mxu0 }
  0xec   : > { %v982_v46 = vpop.f32.mrb[0].mxu1  ;;  %v390_v47 = vadd.f32 %v958_v45, %v1171_v44  ;;  %v384_v49 = vpop.f32.mrb[1].mxu0 }
  0xed   : > { %v470_v48 = vadd.f32 %v982_v46, %v1171_v44  ;;  %v464_v50 = vpop.f32.mrb[1].mxu1  ;;  %v385_v51 = vadd.f32 %v1171_v44, %v384_v49 }
  0xee   : > { %v465_v52 = vadd.f32 %v1171_v44, %v464_v50  ;;  %v544_v53 = vmax.f32 %v390_v47, 0.0 }
  0xef   : > { %v560_v54 = vmax.f32 %v470_v48, 0.0  ;;  %v543_v55 = vmax.f32 %v385_v51, 0.0  ;;  %v961_v57 = vpop.f32.mrb[2].mxu0 }
  0xf0   : > { %v559_v56 = vmax.f32 %v465_v52, 0.0  ;;  %v985_v58 = vpop.f32.mrb[2].mxu1  ;;  %v869_v59 = vpack.c.bf16 %v544_v53, %v544_v53  ;;  %v400_v61 = vadd.f32 %v961_v57, %v1171_v44  ;;  %v394_v63 = vpop.f32.mrb[3].mxu0 }
  0xf1   : > { %v885_v60 = vpack.c.bf16 %v560_v54, %v560_v54  ;;  %v480_v62 = vadd.f32 %v985_v58, %v1171_v44  ;;  %v474_v0 = vpop.f32.mrb[3].mxu1  ;;  %v868_v1 = vpack.c.bf16 %v543_v55, %v543_v55  ;;  %v395_v3 = vadd.f32 %v1171_v44, %v394_v63 }
  0xf2   : > { %v884_v2 = vpack.c.bf16 %v559_v56, %v559_v56  ;;  %v475_v4 = vadd.f32 %v1171_v44, %v474_v0  ;;  %705 = vst.msk [vmem:[%s1181_s14 + $0x4] sm:$0xf] %vm703_vm1, %v869_v59  ;;  %v546_v5 = vmax.f32 %v400_v61, 0.0 }
  0xf3   : > { %721 = vst.msk [vmem:[%s1181_s14 + $0x44] sm:$0xf] %vm703_vm1, %v885_v60  ;;  %v562_v6 = vmax.f32 %v480_v62, 0.0  ;;  %704 = vst.msk [vmem:[%s1181_s14] sm:$0xf] %vm703_vm1, %v868_v1  ;;  %v545_v7 = vmax.f32 %v395_v3, 0.0 }
  0xf4   : > { %720 = vst.msk [vmem:[%s1181_s14 + $0x40] sm:$0xf] %vm703_vm1, %v884_v2  ;;  %v561_v8 = vmax.f32 %v475_v4, 0.0  ;;  %v964_v9 = vpop.f32.mrb[4].mxu0  ;;  %v988_v10 = vpop.f32.mrb[4].mxu1  ;;  %v871_v11 = vpack.c.bf16 %v546_v5, %v546_v5 }
  0xf5   : > { %v887_v12 = vpack.c.bf16 %v562_v6, %v562_v6  ;;  %v410_v13 = vadd.f32 %v964_v9, %v1171_v44  ;;  %v490_v14 = vadd.f32 %v988_v10, %v1171_v44  ;;  %v404_v15 = vpop.f32.mrb[5].mxu0  ;;  %v484_v16 = vpop.f32.mrb[5].mxu1  ;;  %v870_v17 = vpack.c.bf16 %v545_v7, %v545_v7 }
  0xf6   : > { %v886_v18 = vpack.c.bf16 %v561_v8, %v561_v8  ;;  %v405_v19 = vadd.f32 %v1171_v44, %v404_v15  ;;  %v485_v20 = vadd.f32 %v1171_v44, %v484_v16  ;;  %707 = vst.msk [vmem:[%s1181_s14 + $0xc] sm:$0xf] %vm703_vm1, %v871_v11 }
  0xf7   : > { %723 = vst.msk [vmem:[%s1181_s14 + $0x4c] sm:$0xf] %vm703_vm1, %v887_v12  ;;  %v548_v21 = vmax.f32 %v410_v13, 0.0  ;;  %v564_v22 = vmax.f32 %v490_v14, 0.0  ;;  %706 = vst.msk [vmem:[%s1181_s14 + $0x8] sm:$0xf] %vm703_vm1, %v870_v17 }
  0xf8   : > { %722 = vst.msk [vmem:[%s1181_s14 + $0x48] sm:$0xf] %vm703_vm1, %v886_v18  ;;  %v547_v23 = vmax.f32 %v405_v19, 0.0  ;;  %v563_v24 = vmax.f32 %v485_v20, 0.0  ;;  %v967_v25 = vpop.f32.mrb[6].mxu0  ;;  %v991_v26 = vpop.f32.mrb[6].mxu1 }
  0xf9   : > { %v873_v27 = vpack.c.bf16 %v548_v21, %v548_v21  ;;  %v889_v28 = vpack.c.bf16 %v564_v22, %v564_v22  ;;  %v420_v29 = vadd.f32 %v967_v25, %v1171_v44  ;;  %v500_v30 = vadd.f32 %v991_v26, %v1171_v44  ;;  %v414_v31 = vpop.f32.mrb[7].mxu0  ;;  %v494_v32 = vpop.f32.mrb[7].mxu1 }
  0xfa   : > { %v872_v33 = vpack.c.bf16 %v547_v23, %v547_v23  ;;  %v888_v34 = vpack.c.bf16 %v563_v24, %v563_v24  ;;  %v415_v35 = vadd.f32 %v1171_v44, %v414_v31  ;;  %v495_v36 = vadd.f32 %v1171_v44, %v494_v32 }
  0xfb   : > { %709 = vst.msk [vmem:[%s1181_s14 + $0x14] sm:$0xf] %vm703_vm1, %v873_v27  ;;  %725 = vst.msk [vmem:[%s1181_s14 + $0x54] sm:$0xf] %vm703_vm1, %v889_v28  ;;  %v550_v37 = vmax.f32 %v420_v29, 0.0  ;;  %v566_v38 = vmax.f32 %v500_v30, 0.0 }
  0xfc   : > { %708 = vst.msk [vmem:[%s1181_s14 + $0x10] sm:$0xf] %vm703_vm1, %v872_v33  ;;  %724 = vst.msk [vmem:[%s1181_s14 + $0x50] sm:$0xf] %vm703_vm1, %v888_v34  ;;  %v549_v39 = vmax.f32 %v415_v35, 0.0  ;;  %v565_v40 = vmax.f32 %v495_v36, 0.0 }
  0xfd   : > { %v970_v41 = vpop.f32.mrb[8].mxu0  ;;  %v994_v42 = vpop.f32.mrb[8].mxu1  ;;  %v875_v43 = vpack.c.bf16 %v550_v37, %v550_v37  ;;  %v891_v45 = vpack.c.bf16 %v566_v38, %v566_v38 }
  0xfe   : > { %v430_v46 = vadd.f32 %v970_v41, %v1171_v44  ;;  %v510_v47 = vadd.f32 %v994_v42, %v1171_v44  ;;  %v424_v48 = vpop.f32.mrb[9].mxu0  ;;  %v504_v49 = vpop.f32.mrb[9].mxu1  ;;  %v874_v50 = vpack.c.bf16 %v549_v39, %v549_v39  ;;  %v890_v51 = vpack.c.bf16 %v565_v40, %v565_v40 }
  0xff   : > { %v425_v52 = vadd.f32 %v1171_v44, %v424_v48  ;;  %v505_v53 = vadd.f32 %v1171_v44, %v504_v49  ;;  %711 = vst.msk [vmem:[%s1181_s14 + $0x1c] sm:$0xf] %vm703_vm1, %v875_v43  ;;  %727 = vst.msk [vmem:[%s1181_s14 + $0x5c] sm:$0xf] %vm703_vm1, %v891_v45  ;;  %v973_v58 = vpop.f32.mrb[10].mxu0 }
 0x100   : > { %v552_v54 = vmax.f32 %v430_v46, 0.0  ;;  %v568_v55 = vmax.f32 %v510_v47, 0.0  ;;  %710 = vst.msk [vmem:[%s1181_s14 + $0x18] sm:$0xf] %vm703_vm1, %v874_v50  ;;  %726 = vst.msk [vmem:[%s1181_s14 + $0x58] sm:$0xf] %vm703_vm1, %v890_v51  ;;  %v440_v62 = vadd.f32 %v973_v58, %v1171_v44 }
 0x101   : > { %v551_v56 = vmax.f32 %v425_v52, 0.0  ;;  %v567_v57 = vmax.f32 %v505_v53, 0.0  ;;  %v997_v59 = vpop.f32.mrb[10].mxu1  ;;  %v434_v0 = vpop.f32.mrb[11].mxu0 }
 0x102   : > { %v877_v60 = vpack.c.bf16 %v552_v54, %v552_v54  ;;  %v893_v61 = vpack.c.bf16 %v568_v55, %v568_v55  ;;  %v520_v63 = vadd.f32 %v997_v59, %v1171_v44  ;;  %v514_v1 = vpop.f32.mrb[11].mxu1  ;;  %v435_v4 = vadd.f32 %v1171_v44, %v434_v0 }
 0x103   : > { %v876_v2 = vpack.c.bf16 %v551_v56, %v551_v56  ;;  %v892_v3 = vpack.c.bf16 %v567_v57, %v567_v57  ;;  %v515_v5 = vadd.f32 %v1171_v44, %v514_v1  ;;  %v554_v6 = vmax.f32 %v440_v62, 0.0  ;;  %v976_v10 = vpop.f32.mrb[12].mxu0 }
 0x104   : > { %713 = vst.msk [vmem:[%s1181_s14 + $0x24] sm:$0xf] %vm703_vm1, %v877_v60  ;;  %729 = vst.msk [vmem:[%s1181_s14 + $0x64] sm:$0xf] %vm703_vm1, %v893_v61  ;;  %v570_v7 = vmax.f32 %v520_v63, 0.0  ;;  %v553_v8 = vmax.f32 %v435_v4, 0.0  ;;  %v450_v14 = vadd.f32 %v976_v10, %v1171_v44 }
 0x105   : > { %712 = vst.msk [vmem:[%s1181_s14 + $0x20] sm:$0xf] %vm703_vm1, %v876_v2  ;;  %728 = vst.msk [vmem:[%s1181_s14 + $0x60] sm:$0xf] %vm703_vm1, %v892_v3  ;;  %v569_v9 = vmax.f32 %v515_v5, 0.0  ;;  %v1000_v11 = vpop.f32.mrb[12].mxu1  ;;  %v879_v12 = vpack.c.bf16 %v554_v6, %v554_v6 }
 0x106   : > { %v895_v13 = vpack.c.bf16 %v570_v7, %v570_v7  ;;  %v530_v15 = vadd.f32 %v1000_v11, %v1171_v44  ;;  %v444_v16 = vpop.f32.mrb[13].mxu0  ;;  %v524_v17 = vpop.f32.mrb[13].mxu1  ;;  %v878_v18 = vpack.c.bf16 %v553_v8, %v553_v8  ;;  %v556_v22 = vmax.f32 %v450_v14, 0.0 }
 0x107   : > { %v894_v19 = vpack.c.bf16 %v569_v9, %v569_v9  ;;  %v445_v20 = vadd.f32 %v1171_v44, %v444_v16  ;;  %v525_v21 = vadd.f32 %v1171_v44, %v524_v17  ;;  %715 = vst.msk [vmem:[%s1181_s14 + $0x2c] sm:$0xf] %vm703_vm1, %v879_v12  ;;  %v979_v26 = vpop.f32.mrb[14].mxu0 }
 0x108   : > { %731 = vst.msk [vmem:[%s1181_s14 + $0x6c] sm:$0xf] %vm703_vm1, %v895_v13  ;;  %v572_v23 = vmax.f32 %v530_v15, 0.0  ;;  %714 = vst.msk [vmem:[%s1181_s14 + $0x28] sm:$0xf] %vm703_vm1, %v878_v18  ;;  %v1003_v27 = vpop.f32.mrb[14].mxu1  ;;  %v881_v28 = vpack.c.bf16 %v556_v22, %v556_v22  ;;  %v460_v30 = vadd.f32 %v979_v26, %v1171_v44 }
 0x109   : > { %730 = vst.msk [vmem:[%s1181_s14 + $0x68] sm:$0xf] %vm703_vm1, %v894_v19  ;;  %v555_v24 = vmax.f32 %v445_v20, 0.0  ;;  %v571_v25 = vmax.f32 %v525_v21, 0.0  ;;  %v540_v31 = vadd.f32 %v1003_v27, %v1171_v44  ;;  %v454_v32 = vpop.f32.mrb[15].mxu0  ;;  %v534_v33 = vpop.f32.mrb[15].mxu1 }
 0x10a   : > { %v897_v29 = vpack.c.bf16 %v572_v23, %v572_v23  ;;  %v455_v36 = vadd.f32 %v1171_v44, %v454_v32  ;;  %v535_v37 = vadd.f32 %v1171_v44, %v534_v33  ;;  %717 = vst.msk [vmem:[%s1181_s14 + $0x34] sm:$0xf] %vm703_vm1, %v881_v28  ;;  %v558_v38 = vmax.f32 %v460_v30, 0.0 }
 0x10b   : > { %v880_v34 = vpack.c.bf16 %v555_v24, %v555_v24  ;;  %v896_v35 = vpack.c.bf16 %v571_v25, %v571_v25  ;;  %v574_v39 = vmax.f32 %v540_v31, 0.0 }
 0x10c   : > { %733 = vst.msk [vmem:[%s1181_s14 + $0x74] sm:$0xf] %vm703_vm1, %v897_v29  ;;  %v557_v40 = vmax.f32 %v455_v36, 0.0  ;;  %v573_v41 = vmax.f32 %v535_v37, 0.0  ;;  %v883_v42 = vpack.c.bf16 %v558_v38, %v558_v38 }
 0x10d   : > { %716 = vst.msk [vmem:[%s1181_s14 + $0x30] sm:$0xf] %vm703_vm1, %v880_v34  ;;  %732 = vst.msk [vmem:[%s1181_s14 + $0x70] sm:$0xf] %vm703_vm1, %v896_v35  ;;  %v899_v43 = vpack.c.bf16 %v574_v39, %v574_v39 }
 0x10e   : > { %v882_v45 = vpack.c.bf16 %v557_v40, %v557_v40  ;;  %v898_v46 = vpack.c.bf16 %v573_v41, %v573_v41  ;;  %719 = vst.msk [vmem:[%s1181_s14 + $0x3c] sm:$0xf] %vm703_vm1, %v883_v42 }
 0x10f   : > { %735 = vst.msk [vmem:[%s1181_s14 + $0x7c] sm:$0xf] %vm703_vm1, %v899_v43 }
 0x110   : > { %718 = vst.msk [vmem:[%s1181_s14 + $0x38] sm:$0xf] %vm703_vm1, %v882_v45  ;;  %734 = vst.msk [vmem:[%s1181_s14 + $0x78] sm:$0xf] %vm703_vm1, %v898_v46 }
 0x111 PF: > { %s13_s12 = sadd.s32 1, %s1042_s12  }
 0x112   : > { %p10_p4 = scmp.ge.s32.totalorder %s13_s12, 4  }
 0x114   :  { %12 = sbr.rel (!%p10_p4) target bundleno = 1 (0x1), region = 62 }

// kernel: aspp_forward.11
= control target key start
LH: loop header
LB: loop body
LE: loop exit
PB: predicated region body
PF: predicated region fallthrough
CT: control target
= control target key end

     0   :  { %s3405_s0 = inlined_call_operand.vmem [shape: bf16[2,256,32], index: 0, kind: input, shape index: {}]   ;;  %s3406_s1 = inlined_call_operand.vmem [shape: bf16[2,256,32], index: 1, kind: input, shape index: {}]   ;;  %s3407_s2 = inlined_call_operand.vmem [shape: bf16[2,256,32], index: 2, kind: input, shape index: {}]   ;;  %s3408_s3 = inlined_call_operand.vmem [shape: bf16[2,256,32], index: 3, kind: input, shape index: {}]   ;;  %s3409_s4 = inlined_call_operand.vmem [shape: f32[2,1,32], index: 4, kind: input, shape index: {}]   ;;  %s3410_s5 = inlined_call_operand.vmem [shape: f32[1,32], index: 5, kind: input, shape index: {}]   ;;  %s3411_s6 = inlined_call_operand.vmem [shape: bf16[32,32], index: 6, kind: input, shape index: {}]   ;;  %s3412_s7 = inlined_call_operand.vmem [shape: bf16[32,32], index: 7, kind: input, shape index: {}]   ;;  %s3413_s8 = inlined_call_operand.vmem [shape: bf16[32,32], index: 8, kind: input, shape index: {}]   ;;  %s3414_s9 = inlined_call_operand.vmem [shape: bf16[32,32], index: 9, kind: input, shape index: {}]   ;;  %s3415_s10 = inlined_call_operand.hbm [shape: f32[2,256,32], index: 10, kind: output, shape index: {}]  }
   0x1   :  { %3416 = sst [smem:[#allocation5_spill]] %s3412_s7 }
   0x2   :  { %15 = vsyncpa [#allocation3], 0 }
   0x3   :  { %17 = vsyncpa [#allocation3 + $0x1], 0  ;;  %s2966_s13 = smov 0   ;;  %s2968_s14 = smov 0  }
   0x4   :  { %s2970_s15 = smov 0   ;;  %s2972_s16 = smov 0  }
   0x5   :  { %s2974_s17 = smov 0   ;;  %s2976_s18 = smov 0  }
   0x6 LB: > { %s2225_s19 = sadd.s32 4294967295, %s2906_s18   ;;  %s2226_s20 = sadd.s32 4294967294, %s2906_s18   ;;  %s2906_s18 = sphi %s2976_s18, %s23_s18   ;;  %s2902_s17 = sphi %s2974_s17, %s3424_s17   ;;  %s2898_s16 = sphi %s2972_s16, %s3423_s16   ;;  %s2894_s15 = sphi %s2970_s15, %s3422_s15   ;;  %s2890_s14 = sphi %s2968_s14, %s3421_s14   ;;  %s2886_s13 = sphi %s2966_s13, %s3420_s13  }
   0x7   : > { %s35_s21 = sadd.s32 1, %s2902_s17  ;;  %s287_s22 = sadd.s32 1, %s2894_s15 }
   0x8   : > { %p37_p0 = scmp.ge.s32.totalorder %s35_s21, 2  ;;  %p297_p1 = scmp.ne.s32.totalorder %s2894_s15, %s2890_s14 }
   0x9   : > { %p298_p2 = scmp.eq.s32.totalorder %s2225_s19, 1  ;;  %p303_p3 = scmp.ne.s32.totalorder %s2890_s14, %s2886_s13 }
   0xa   : > { %s3426_s21 = smov (%p37_p0, %s35_s21), 0  ;;  %p304_p5 = scmp.eq.s32.totalorder %s2226_s20, 1 }
   0xb   : > { %p3006_p4 = por %p298_p2, %p297_p1  ;;  %s282_s24 = ssub.s32 %s2902_s17, %s3426_s21 }
   0xc   : > { %p2229_p6 = scmp.ge.s32.totalorder %s2906_s18, 1  ;;  %p285_p7 = scmp.eq.s32.totalorder %s282_s24, 0 }
   0xd   : > { %p3013_p8 = por %p304_p5, %p303_p3  ;;  %p395_p9 = scmp.lt.s32.totalorder %s2906_s18, 3 }
   0xe   : > { %s3019_s26 = scalar_select %p285_p7, %s2894_s15, %s287_s22  }
   0xf   : > { %p396_p10 = pnand %p2229_p6, %p395_p9 }
  0x10   : > { %s3419_s7 = sld [smem:[#allocation5_spill]] (!%p396_p10)  ;;  %p468_p11 = scmp.lt.s32.totalorder (!%p396_p10), %s2898_s16, 1  ;;  %v2757_v1 = vld [vmem:[%s3413_s8] sm:$0xff] (!%p396_p10)   ;;  %v2759_v3 = vld [vmem:[%s3413_s8 + $0x8] sm:$0xff] (!%p396_p10)   ;;  %vm676_vm0 = vcmask (!%p396_p10), 261120  }
  0x11   : > { %399 = sbr.rel (%p396_p10) target bundleno = 389 (0x185), region = 60  ;;  %2531 = vmatprep.subr.bf16.mxu0 (!%p396_p10), %v2757_v1  ;;  %v2763_v4 = vld [vmem:[%s3411_s6] sm:$0xff] (!%p396_p10)   ;;  %v2781_v20 = vld [vmem:[%s3411_s6 + $0x8] sm:$0xff] (!%p396_p10)   ;;  %s464_s30 = sand.u32 (!%p396_p10), 1, %s2890_s14  }
  0x12   : > { %2532 = vmatpush3.bf16.msra.mxu0 (!%p396_p10), %v2757_v1  ;;  %v2765_v5 = vld [vmem:[%s3414_s9] sm:$0xff] (!%p396_p10)   ;;  %v2783_v21 = vld [vmem:[%s3414_s9 + $0x8] sm:$0xff] (!%p396_p10)   ;;  %s2908_s12 = smov (!%p396_p10), [#allocation2]  }
  0x13   : > { %2533 = vmatprep.subr.bf16.mxu0 (!%p396_p10), %v2759_v3  ;;  %s2832_s20 = sshll.u32 (!%p396_p10), %s2908_s12, 4  ;;  %s2833_s20 = int_to_ptr.vmem [resolvable:$false] %s2832_s20 }
  0x16   : > { %v2756_v0 = vld [vmem:[%s3419_s7] sm:$0xff] (!%p396_p10)   ;;  %v2758_v2 = vld [vmem:[%s3419_s7 + $0x8] sm:$0xff] (!%p396_p10)   ;;  %2534 = vmatpush3.bf16.msra.mxu0 (!%p396_p10), %v2759_v3  ;;  %s2386_s7 = sshll.u32 (!%p396_p10), %s2898_s16, 12 }
  0x17   : > { %2459 = vmatprep.subr.bf16.mxu1 (!%p396_p10), %v2756_v0  ;;  %2567 = vmatprep.subr.bf16.mxu0 (!%p396_p10), %v2765_v5 }
  0x18   : > { %s3032_s19 = scalar_select %p468_p11, %s2898_s16, 1  ;;  %2460 = vmatpush3.bf16.msra.mxu1 %v2756_v0 }
  0x19   : > { %2461 = vmatprep.subr.bf16.mxu1 %v2758_v2  ;;  %s3359_s16 = scalar_lea.sflag [#allocation3], %s464_s30 }
  0x1a   : > { %s3038_s24 = sshll.u32 %s3032_s19, 7 }
  0x1b   : > { %s3047_s11 = scalar_lea.vmem %s3406_s1, %s3038_s24  ;;  %s3053_s22 = scalar_lea.vmem %s3407_s2, %s3038_s24 }
  0x1c   : > { %v2760_v6 = vld [vmem:[%s3047_s11] sm:$0xff]   ;;  %2462 = vmatpush3.bf16.msra.mxu1 %v2758_v2  ;;  %v2762_v8 = vld [vmem:[%s3047_s11 + $0x8] sm:$0xff]   ;;  %v2766_v10 = vld [vmem:[%s3047_s11 + $0x10] sm:$0xff]   ;;  %s3107_s27 = scalar_lea.vmem %s3405_s0, %s3038_s24  ;;  %s3114_s29 = scalar_lea.vmem %s3408_s3, %s3038_s24 }
  0x1d   : > { %v2761_v7 = vld [vmem:[%s3053_s22] sm:$0xff]   ;;  %2463 = vmatprep.mubr.msk.bf16.mxu1 %vm676_vm0, %v2760_v6  ;;  %2495 = vmatprep.subr.bf16.mxu1 %v2763_v4  ;;  %v2764_v9 = vld [vmem:[%s3053_s22 + $0x8] sm:$0xff]   ;;  %v2767_v11 = vld [vmem:[%s3053_s22 + $0x10] sm:$0xff]  }
  0x1e   : > { %2535 = vmatprep.mubr.msk.bf16.mxu0 %vm676_vm0, %v2761_v7  ;;  %v2768_v12 = vld [vmem:[%s3047_s11 + $0x18] sm:$0xff]   ;;  %v2770_v14 = vld [vmem:[%s3047_s11 + $0x20] sm:$0xff]   ;;  %v2772_v16 = vld [vmem:[%s3047_s11 + $0x28] sm:$0xff]  }
  0x1f   : > { %2464 = vmatmul.mubr.msk.bf16.vlgmr.msra.gmra.mrb[0].mxu1 %vm676_vm0, %v2762_v8  ;;  %2536 = vmatmul.mubr.msk.bf16.vlgmr.msra.gmra.mrb[0].mxu0 %vm676_vm0, %v2764_v9  ;;  %v2769_v13 = vld [vmem:[%s3053_s22 + $0x18] sm:$0xff]   ;;  %v2771_v15 = vld [vmem:[%s3053_s22 + $0x20] sm:$0xff]   ;;  %v2773_v17 = vld [vmem:[%s3053_s22 + $0x28] sm:$0xff]  }
  0x20   : > { %2496 = vmatpush3.bf16.msra.mxu1 %v2763_v4  ;;  %2568 = vmatpush3.bf16.msra.mxu0 %v2765_v5  ;;  %v2774_v18 = vld [vmem:[%s3047_s11 + $0x30] sm:$0xff]   ;;  %v2776_v22 = vld [vmem:[%s3047_s11 + $0x38] sm:$0xff]   ;;  %v2778_v24 = vld [vmem:[%s3047_s11 + $0x40] sm:$0xff]  }
  0x21   : > { %2467 = vmatprep.mubr.msk.bf16.mxu1 %vm676_vm0, %v2766_v10  ;;  %2539 = vmatprep.mubr.msk.bf16.mxu0 %vm676_vm0, %v2767_v11  ;;  %v2775_v19 = vld [vmem:[%s3053_s22 + $0x30] sm:$0xff]   ;;  %v2777_v23 = vld [vmem:[%s3053_s22 + $0x38] sm:$0xff]   ;;  %v2779_v25 = vld [vmem:[%s3053_s22 + $0x40] sm:$0xff]  }
  0x22   : > { %2497 = vmatprep.subr.bf16.mxu1 %v2781_v20  ;;  %2569 = vmatprep.subr.bf16.mxu0 %v2783_v21  ;;  %v2780_v26 = vld [vmem:[%s3047_s11 + $0x48] sm:$0xff]   ;;  %v2784_v28 = vld [vmem:[%s3047_s11 + $0x50] sm:$0xff]   ;;  %v2786_v30 = vld [vmem:[%s3047_s11 + $0x58] sm:$0xff]  }
  0x23   : > { %v2782_v27 = vld [vmem:[%s3053_s22 + $0x48] sm:$0xff]   ;;  %v2785_v29 = vld [vmem:[%s3053_s22 + $0x50] sm:$0xff]   ;;  %v2787_v31 = vld [vmem:[%s3053_s22 + $0x58] sm:$0xff]  }
  0x24   : > { %2498 = vmatpush3.bf16.msra.mxu1 %v2781_v20  ;;  %2570 = vmatpush3.bf16.msra.mxu0 %v2783_v21  ;;  %v2788_v32 = vld [vmem:[%s3047_s11 + $0x60] sm:$0xff]   ;;  %v2790_v34 = vld [vmem:[%s3047_s11 + $0x68] sm:$0xff]   ;;  %v2792_v36 = vld [vmem:[%s3047_s11 + $0x70] sm:$0xff]  }
  0x25   : > { %v2789_v33 = vld [vmem:[%s3053_s22 + $0x60] sm:$0xff]   ;;  %v2791_v35 = vld [vmem:[%s3053_s22 + $0x68] sm:$0xff]   ;;  %v2793_v37 = vld [vmem:[%s3053_s22 + $0x70] sm:$0xff]  }
  0x26   : > { %v2794_v38 = vld [vmem:[%s3047_s11 + $0x78] sm:$0xff]   ;;  %v2796_v40 = vld [vmem:[%s3107_s27] sm:$0xff]   ;;  %v2798_v42 = vld [vmem:[%s3107_s27 + $0x8] sm:$0xff]   ;;  %s3347_s11 = scalar_lea.hbm %s3415_s10, %s2386_s7 }
  0x27   : > { %2468 = vmatmul.mubr.msk.bf16.gmra.mrb[4].mxu1 %vm676_vm0, %v2768_v12  ;;  %2540 = vmatmul.mubr.msk.bf16.gmra.mrb[4].mxu0 %vm676_vm0, %v2769_v13  ;;  %v2795_v39 = vld [vmem:[%s3053_s22 + $0x78] sm:$0xff]   ;;  %v2797_v41 = vld [vmem:[%s3114_s29] sm:$0xff]   ;;  %v2799_v43 = vld [vmem:[%s3114_s29 + $0x8] sm:$0xff]   ;;  %s509_s22 = scalar_lea.vmem %s3409_s4, %s3032_s19 }
  0x28   : > { %2471 = vmatprep.mubr.msk.bf16.mxu1 %vm676_vm0, %v2770_v14  ;;  %2543 = vmatprep.mubr.msk.bf16.mxu0 %vm676_vm0, %v2771_v15  ;;  %v2800_v44 = vld [vmem:[%s3107_s27 + $0x10] sm:$0xff]   ;;  %v2802_v46 = vld [vmem:[%s3107_s27 + $0x18] sm:$0xff]   ;;  %v2804_v48 = vld [vmem:[%s3107_s27 + $0x20] sm:$0xff]  }
  0x29   : > { %v2801_v45 = vld [vmem:[%s3114_s29 + $0x10] sm:$0xff]   ;;  %v2803_v47 = vld [vmem:[%s3114_s29 + $0x18] sm:$0xff]   ;;  %v2805_v49 = vld [vmem:[%s3114_s29 + $0x20] sm:$0xff]  }
  0x2a   : > { %v2806_v50 = vld [vmem:[%s3107_s27 + $0x28] sm:$0xff]   ;;  %v2808_v52 = vld [vmem:[%s3107_s27 + $0x30] sm:$0xff]   ;;  %v2810_v54 = vld [vmem:[%s3107_s27 + $0x38] sm:$0xff]  }
  0x2b   : > { %v2807_v51 = vld [vmem:[%s3114_s29 + $0x28] sm:$0xff]   ;;  %v2809_v53 = vld [vmem:[%s3114_s29 + $0x30] sm:$0xff]   ;;  %v2811_v55 = vld [vmem:[%s3114_s29 + $0x38] sm:$0xff]  }
  0x2c   : > { %v2812_v56 = vld [vmem:[%s3107_s27 + $0x40] sm:$0xff]   ;;  %v2814_v58 = vld [vmem:[%s3107_s27 + $0x48] sm:$0xff]   ;;  %v2816_v60 = vld [vmem:[%s3107_s27 + $0x50] sm:$0xff]  }
  0x2d   : > { %v2813_v57 = vld [vmem:[%s3114_s29 + $0x40] sm:$0xff]   ;;  %v2815_v59 = vld [vmem:[%s3114_s29 + $0x48] sm:$0xff]   ;;  %v2817_v61 = vld [vmem:[%s3114_s29 + $0x50] sm:$0xff]  }
  0x2e   : > { %v2818_v62 = vld [vmem:[%s3107_s27 + $0x58] sm:$0xff]   ;;  %v2820_v0 = vld [vmem:[%s3107_s27 + $0x60] sm:$0xff]   ;;  %v2822_v2 = vld [vmem:[%s3107_s27 + $0x68] sm:$0xff]  }
  0x2f   : > { %2472 = vmatmul.mubr.msk.bf16.gmra.mrb[8].mxu1 %vm676_vm0, %v2772_v16  ;;  %2544 = vmatmul.mubr.msk.bf16.gmra.mrb[8].mxu0 %vm676_vm0, %v2773_v17  ;;  %v2819_v63 = vld [vmem:[%s3114_s29 + $0x58] sm:$0xff]   ;;  %v2821_v1 = vld [vmem:[%s3114_s29 + $0x60] sm:$0xff]   ;;  %v2823_v3 = vld [vmem:[%s3114_s29 + $0x68] sm:$0xff]  }
  0x30   : > { %2475 = vmatprep.mubr.msk.bf16.mxu1 %vm676_vm0, %v2774_v18  ;;  %2547 = vmatprep.mubr.msk.bf16.mxu0 %vm676_vm0, %v2775_v19  ;;  %v2824_v4 = vld [vmem:[%s3107_s27 + $0x70] sm:$0xff]   ;;  %v2826_v6 = vld [vmem:[%s3107_s27 + $0x78] sm:$0xff]   ;;  %v3209_v10 = vld [vmem:[%s509_s22] ss:$0 sm:$0xff]  ;;  %s2230_s27 = sshll.u32 %s464_s30, 8 }
  0x31   : > { %v2825_v5 = vld [vmem:[%s3114_s29 + $0x70] sm:$0xff]   ;;  %v2827_v7 = vld [vmem:[%s3114_s29 + $0x78] sm:$0xff]   ;;  %v3214_v15 = vld [vmem:[%s3410_s5] ss:$0 sm:$0xff]  ;;  %s3226_s19 = scalar_lea.vmem [#allocation2], %s2230_s27  ;;  %s2834_s27 = scalar_lea.vmem %s2833_s20, 8192 }
  0x32   : > { %s2083_s28 = sshll.u32 %s3226_s19, 4  ;;  %s3349_s28 = int_to_ptr.vmem [resolvable:$true] %s2083_s28 }
  0x33   : > { %s2828_s22 = scalar_lea.vmem %s3349_s28, 4096  ;;  %p2835_p1 = scmp.lt.s32.totalorder %s3349_s28, %s2833_s20 }
  0x34   : > { %p2829_p12 = scmp.ne.s32.totalorder %s3349_s28, %s2828_s22  ;;  %p2836_p2 = scmp.lt.s32.totalorder %s2834_s27, %s2828_s22 }
  0x36   : > { %p2830_p13 = pnand %p2829_p12, %p3006_p4  ;;  %p2837_p3 = por %p2836_p2, %p2835_p1 }
  0x37   : > { %2476 = vmatmul.mubr.msk.bf16.gmra.mrb[12].mxu1 %vm676_vm0, %v2776_v22  ;;  %2548 = vmatmul.mubr.msk.bf16.gmra.mrb[12].mxu0 %vm676_vm0, %v2777_v23 }
  0x38   : > { %2479 = vmatprep.mubr.msk.bf16.mxu1 %vm676_vm0, %v2778_v24  ;;  %2551 = vmatprep.mubr.msk.bf16.mxu0 %vm676_vm0, %v2779_v25  ;;  %p2831_p0 = pneg %p2830_p13 }
  0x3a   : > { %p2838_p5 = pnand %p2837_p3, %p2831_p0 }
  0x3f   : > { %2480 = vmatmul.mubr.msk.bf16.gmra.mrb[16].mxu1 %vm676_vm0, %v2780_v26  ;;  %2552 = vmatmul.mubr.msk.bf16.gmra.mrb[16].mxu0 %vm676_vm0, %v2782_v27 }
  0x40   : > { %2483 = vmatprep.mubr.msk.bf16.mxu1 %vm676_vm0, %v2784_v28  ;;  %2555 = vmatprep.mubr.msk.bf16.mxu0 %vm676_vm0, %v2785_v29 }
  0x47   : > { %2484 = vmatmul.mubr.msk.bf16.gmra.mrb[20].mxu1 %vm676_vm0, %v2786_v30  ;;  %2556 = vmatmul.mubr.msk.bf16.gmra.mrb[20].mxu0 %vm676_vm0, %v2787_v31 }
  0x48   : > { %2487 = vmatprep.mubr.msk.bf16.mxu1 %vm676_vm0, %v2788_v32  ;;  %2559 = vmatprep.mubr.msk.bf16.mxu0 %vm676_vm0, %v2789_v33 }
  0x4f   : > { %2488 = vmatmul.mubr.msk.bf16.gmra.mrb[24].mxu1 %vm676_vm0, %v2790_v34  ;;  %2560 = vmatmul.mubr.msk.bf16.gmra.mrb[24].mxu0 %vm676_vm0, %v2791_v35 }
  0x50   : > { %2491 = vmatprep.mubr.msk.bf16.mxu1 %vm676_vm0, %v2792_v36  ;;  %2563 = vmatprep.mubr.msk.bf16.mxu0 %vm676_vm0, %v2793_v37 }
  0x57   : > { %2492 = vmatmul.mubr.msk.bf16.gmra.mrb[28].mxu1 %vm676_vm0, %v2794_v38  ;;  %2564 = vmatmul.mubr.msk.bf16.gmra.mrb[28].mxu0 %vm676_vm0, %v2795_v39 }
  0x58   : > { %2499 = vmatprep.mubr.msk.bf16.mxu1 %vm676_vm0, %v2796_v40  ;;  %2571 = vmatprep.mubr.msk.bf16.mxu0 %vm676_vm0, %v2797_v41 }
  0x5f   : > { %2500 = vmatmul.mubr.msk.bf16.vlgmr.msra.gmra.mrb[0].mxu1 %vm676_vm0, %v2798_v42  ;;  %2572 = vmatmul.mubr.msk.bf16.vlgmr.msra.gmra.mrb[0].mxu0 %vm676_vm0, %v2799_v43 }
  0x60   : > { %2503 = vmatprep.mubr.msk.bf16.mxu1 %vm676_vm0, %v2800_v44  ;;  %2575 = vmatprep.mubr.msk.bf16.mxu0 %vm676_vm0, %v2801_v45 }
  0x67   : > { %2504 = vmatmul.mubr.msk.bf16.gmra.mrb[4].mxu1 %vm676_vm0, %v2802_v46  ;;  %2576 = vmatmul.mubr.msk.bf16.gmra.mrb[4].mxu0 %vm676_vm0, %v2803_v47 }
  0x68   : > { %2507 = vmatprep.mubr.msk.bf16.mxu1 %vm676_vm0, %v2804_v48  ;;  %2579 = vmatprep.mubr.msk.bf16.mxu0 %vm676_vm0, %v2805_v49 }
  0x6f   : > { %2508 = vmatmul.mubr.msk.bf16.gmra.mrb[8].mxu1 %vm676_vm0, %v2806_v50  ;;  %2580 = vmatmul.mubr.msk.bf16.gmra.mrb[8].mxu0 %vm676_vm0, %v2807_v51 }
  0x70   : > { %2511 = vmatprep.mubr.msk.bf16.mxu1 %vm676_vm0, %v2808_v52  ;;  %2583 = vmatprep.mubr.msk.bf16.mxu0 %vm676_vm0, %v2809_v53 }
  0x77   : > { %2512 = vmatmul.mubr.msk.bf16.gmra.mrb[12].mxu1 %vm676_vm0, %v2810_v54  ;;  %2584 = vmatmul.mubr.msk.bf16.gmra.mrb[12].mxu0 %vm676_vm0, %v2811_v55 }
  0x78   : > { %2515 = vmatprep.mubr.msk.bf16.mxu1 %vm676_vm0, %v2812_v56  ;;  %2587 = vmatprep.mubr.msk.bf16.mxu0 %vm676_vm0, %v2813_v57 }
  0x7f   : > { %2516 = vmatmul.mubr.msk.bf16.gmra.mrb[16].mxu1 %vm676_vm0, %v2814_v58  ;;  %2588 = vmatmul.mubr.msk.bf16.gmra.mrb[16].mxu0 %vm676_vm0, %v2815_v59 }
  0x80   : > { %2519 = vmatprep.mubr.msk.bf16.mxu1 %vm676_vm0, %v2816_v60  ;;  %2591 = vmatprep.mubr.msk.bf16.mxu0 %vm676_vm0, %v2817_v61 }
  0x87   : > { %2520 = vmatmul.mubr.msk.bf16.gmra.mrb[20].mxu1 %vm676_vm0, %v2818_v62  ;;  %2592 = vmatmul.mubr.msk.bf16.gmra.mrb[20].mxu0 %vm676_vm0, %v2819_v63 }
  0x88   : > { %2523 = vmatprep.mubr.msk.bf16.mxu1 %vm676_vm0, %v2820_v0  ;;  %2595 = vmatprep.mubr.msk.bf16.mxu0 %vm676_vm0, %v2821_v1 }
  0x8f   : > { %2524 = vmatmul.mubr.msk.bf16.gmra.mrb[24].mxu1 %vm676_vm0, %v2822_v2  ;;  %2596 = vmatmul.mubr.msk.bf16.gmra.mrb[24].mxu0 %vm676_vm0, %v2823_v3 }
  0x90   : > { %2527 = vmatprep.mubr.msk.bf16.mxu1 %vm676_vm0, %v2824_v4  ;;  %2599 = vmatprep.mubr.msk.bf16.mxu0 %vm676_vm0, %v2825_v5 }
  0x97   : > { %2528 = vmatmul.mubr.msk.bf16.gmra.mrb[28].mxu1 %vm676_vm0, %v2826_v6  ;;  %2600 = vmatmul.mubr.msk.bf16.gmra.mrb[28].mxu0 %vm676_vm0, %v2827_v7 }
 0x132   : > { %v2501_v8 = vpop.f32.mrb[0].mxu1  ;;  %v2573_v9 = vpop.f32.mrb[0].mxu0 }
 0x133   : > { %v1060_v11 = vpop.f32.mrb[1].mxu1  ;;  %v2603_v12 = vadd.f32 %v2573_v9, %v2501_v8  ;;  %v1766_v13 = vpop.f32.mrb[1].mxu0 }
 0x134   : > { %v2502_v14 = vpop.f32.mrb[2].mxu1  ;;  %v2604_v16 = vadd.f32 %v1766_v13, %v1060_v11  ;;  %v2574_v17 = vpop.f32.mrb[2].mxu0 }
 0x135   : > { %v1063_v18 = vpop.f32.mrb[3].mxu1  ;;  %v1934_v19 = vadd.f32 %v2603_v12, %v3209_v10  ;;  %v2605_v20 = vadd.f32 %v2574_v17, %v2502_v14  ;;  %v1769_v21 = vpop.f32.mrb[3].mxu0 }
 0x136   : > { %v1932_v22 = vadd.f32 %v2604_v16, %v3209_v10  ;;  %v2606_v23 = vadd.f32 %v1769_v21, %v1063_v18 }
 0x137   : > { %v1973_v24 = vadd.f32 %v3214_v15, %v1934_v19  ;;  %v1935_v25 = vadd.f32 %v2605_v20, %v3209_v10 }
 0x138   : > { %v1971_v26 = vadd.f32 %v3214_v15, %v1932_v22  ;;  %v1933_v27 = vadd.f32 %v2606_v23, %v3209_v10 }
 0x139   : > { %v2005_v28 = vmax.f32 %v1973_v24, 0.0  ;;  %v1974_v29 = vadd.f32 %v3214_v15, %v1935_v25 }
 0x13a   : > { %v2505_v30 = vpop.f32.mrb[4].mxu1  ;;  %v2003_v31 = vmax.f32 %v1971_v26, 0.0  ;;  %v1972_v32 = vadd.f32 %v3214_v15, %v1933_v27  ;;  %v2577_v33 = vpop.f32.mrb[4].mxu0 }
 0x13b   : > { %v1076_v34 = vpop.f32.mrb[5].mxu1  ;;  %2037 = vst.msk [vmem:[%s3226_s19 + $0x10] sm:$0xff] %vm676_vm0, %v2005_v28  ;;  %v2006_v35 = vmax.f32 %v1974_v29, 0.0  ;;  %v2607_v36 = vadd.f32 %v2577_v33, %v2505_v30  ;;  %v1782_v37 = vpop.f32.mrb[5].mxu0 }
 0x13c   : > { %v2506_v38 = vpop.f32.mrb[6].mxu1  ;;  %2035 = vst.msk [vmem:[%s3226_s19] sm:$0xff] %vm676_vm0, %v2003_v31  ;;  %v2004_v39 = vmax.f32 %v1972_v32, 0.0  ;;  %v2608_v40 = vadd.f32 %v1782_v37, %v1076_v34  ;;  %v2578_v41 = vpop.f32.mrb[6].mxu0 }
 0x13d   : > { %v1079_v42 = vpop.f32.mrb[7].mxu1  ;;  %2038 = vst.msk [vmem:[%s3226_s19 + $0x18] sm:$0xff] %vm676_vm0, %v2006_v35  ;;  %v1938_v43 = vadd.f32 %v2607_v36, %v3209_v10  ;;  %v2609_v44 = vadd.f32 %v2578_v41, %v2506_v38  ;;  %v1785_v45 = vpop.f32.mrb[7].mxu0 }
 0x13e   : > { %2036 = vst.msk [vmem:[%s3226_s19 + $0x8] sm:$0xff] %vm676_vm0, %v2004_v39  ;;  %v1936_v46 = vadd.f32 %v2608_v40, %v3209_v10  ;;  %v2610_v47 = vadd.f32 %v1785_v45, %v1079_v42 }
 0x13f   : > { %v1977_v48 = vadd.f32 %v3214_v15, %v1938_v43  ;;  %v1939_v49 = vadd.f32 %v2609_v44, %v3209_v10 }
 0x140   : > { %v1975_v50 = vadd.f32 %v3214_v15, %v1936_v46  ;;  %v1937_v51 = vadd.f32 %v2610_v47, %v3209_v10 }
 0x141   : > { %v2009_v52 = vmax.f32 %v1977_v48, 0.0  ;;  %v1978_v53 = vadd.f32 %v3214_v15, %v1939_v49 }
 0x142   : > { %v2509_v54 = vpop.f32.mrb[8].mxu1  ;;  %v2007_v55 = vmax.f32 %v1975_v50, 0.0  ;;  %v1976_v56 = vadd.f32 %v3214_v15, %v1937_v51  ;;  %v2581_v57 = vpop.f32.mrb[8].mxu0 }
 0x143   : > { %v1092_v58 = vpop.f32.mrb[9].mxu1  ;;  %2041 = vst.msk [vmem:[%s3226_s19 + $0x30] sm:$0xff] %vm676_vm0, %v2009_v52  ;;  %v2010_v59 = vmax.f32 %v1978_v53, 0.0  ;;  %v2611_v60 = vadd.f32 %v2581_v57, %v2509_v54  ;;  %v1798_v61 = vpop.f32.mrb[9].mxu0 }
 0x144   : > { %v2510_v62 = vpop.f32.mrb[10].mxu1  ;;  %2039 = vst.msk [vmem:[%s3226_s19 + $0x20] sm:$0xff] %vm676_vm0, %v2007_v55  ;;  %v2008_v63 = vmax.f32 %v1976_v56, 0.0  ;;  %v2612_v0 = vadd.f32 %v1798_v61, %v1092_v58  ;;  %v2582_v1 = vpop.f32.mrb[10].mxu0 }
 0x145   : > { %v1095_v2 = vpop.f32.mrb[11].mxu1  ;;  %2042 = vst.msk [vmem:[%s3226_s19 + $0x38] sm:$0xff] %vm676_vm0, %v2010_v59  ;;  %v1942_v3 = vadd.f32 %v2611_v60, %v3209_v10  ;;  %v2613_v4 = vadd.f32 %v2582_v1, %v2510_v62  ;;  %v1801_v5 = vpop.f32.mrb[11].mxu0 }
 0x146   : > { %2040 = vst.msk [vmem:[%s3226_s19 + $0x28] sm:$0xff] %vm676_vm0, %v2008_v63  ;;  %v1940_v6 = vadd.f32 %v2612_v0, %v3209_v10  ;;  %v2614_v7 = vadd.f32 %v1801_v5, %v1095_v2 }
 0x147   : > { %v1981_v8 = vadd.f32 %v3214_v15, %v1942_v3  ;;  %v1943_v9 = vadd.f32 %v2613_v4, %v3209_v10 }
 0x148   : > { %v1979_v11 = vadd.f32 %v3214_v15, %v1940_v6  ;;  %v1941_v12 = vadd.f32 %v2614_v7, %v3209_v10 }
 0x149   : > { %v2013_v13 = vmax.f32 %v1981_v8, 0.0  ;;  %v1982_v14 = vadd.f32 %v3214_v15, %v1943_v9 }
 0x14a   : > { %v2513_v16 = vpop.f32.mrb[12].mxu1  ;;  %v2011_v17 = vmax.f32 %v1979_v11, 0.0  ;;  %v1980_v18 = vadd.f32 %v3214_v15, %v1941_v12  ;;  %v2585_v19 = vpop.f32.mrb[12].mxu0 }
 0x14b   : > { %v1108_v20 = vpop.f32.mrb[13].mxu1  ;;  %2045 = vst.msk [vmem:[%s3226_s19 + $0x50] sm:$0xff] %vm676_vm0, %v2013_v13  ;;  %v2014_v21 = vmax.f32 %v1982_v14, 0.0  ;;  %v2615_v22 = vadd.f32 %v2585_v19, %v2513_v16  ;;  %v1814_v23 = vpop.f32.mrb[13].mxu0 }
 0x14c   : > { %v2514_v24 = vpop.f32.mrb[14].mxu1  ;;  %2043 = vst.msk [vmem:[%s3226_s19 + $0x40] sm:$0xff] %vm676_vm0, %v2011_v17  ;;  %v2012_v25 = vmax.f32 %v1980_v18, 0.0  ;;  %v2616_v26 = vadd.f32 %v1814_v23, %v1108_v20  ;;  %v2586_v27 = vpop.f32.mrb[14].mxu0 }
 0x14d   : > { %v1111_v28 = vpop.f32.mrb[15].mxu1  ;;  %2046 = vst.msk [vmem:[%s3226_s19 + $0x58] sm:$0xff] %vm676_vm0, %v2014_v21  ;;  %v1946_v29 = vadd.f32 %v2615_v22, %v3209_v10  ;;  %v2617_v30 = vadd.f32 %v2586_v27, %v2514_v24  ;;  %v1817_v31 = vpop.f32.mrb[15].mxu0 }
 0x14e   : > { %2044 = vst.msk [vmem:[%s3226_s19 + $0x48] sm:$0xff] %vm676_vm0, %v2012_v25  ;;  %v1944_v32 = vadd.f32 %v2616_v26, %v3209_v10  ;;  %v2618_v33 = vadd.f32 %v1817_v31, %v1111_v28 }
 0x14f   : > { %v1985_v34 = vadd.f32 %v3214_v15, %v1946_v29  ;;  %v1947_v35 = vadd.f32 %v2617_v30, %v3209_v10 }
 0x150   : > { %v1983_v36 = vadd.f32 %v3214_v15, %v1944_v32  ;;  %v1945_v37 = vadd.f32 %v2618_v33, %v3209_v10 }
 0x151   : > { %v2017_v38 = vmax.f32 %v1985_v34, 0.0  ;;  %v1986_v39 = vadd.f32 %v3214_v15, %v1947_v35 }
 0x152   : > { %v2517_v40 = vpop.f32.mrb[16].mxu1  ;;  %v2015_v41 = vmax.f32 %v1983_v36, 0.0  ;;  %v1984_v42 = vadd.f32 %v3214_v15, %v1945_v37  ;;  %v2589_v43 = vpop.f32.mrb[16].mxu0 }
 0x153   : > { %v1124_v44 = vpop.f32.mrb[17].mxu1  ;;  %2049 = vst.msk [vmem:[%s3226_s19 + $0x70] sm:$0xff] %vm676_vm0, %v2017_v38  ;;  %v2018_v45 = vmax.f32 %v1986_v39, 0.0  ;;  %v2619_v46 = vadd.f32 %v2589_v43, %v2517_v40  ;;  %v1830_v47 = vpop.f32.mrb[17].mxu0 }
 0x154   : > { %v2518_v48 = vpop.f32.mrb[18].mxu1  ;;  %2047 = vst.msk [vmem:[%s3226_s19 + $0x60] sm:$0xff] %vm676_vm0, %v2015_v41  ;;  %v2016_v49 = vmax.f32 %v1984_v42, 0.0  ;;  %v2620_v50 = vadd.f32 %v1830_v47, %v1124_v44  ;;  %v2590_v51 = vpop.f32.mrb[18].mxu0 }
 0x155   : > { %v1127_v52 = vpop.f32.mrb[19].mxu1  ;;  %2050 = vst.msk [vmem:[%s3226_s19 + $0x78] sm:$0xff] %vm676_vm0, %v2018_v45  ;;  %v1950_v53 = vadd.f32 %v2619_v46, %v3209_v10  ;;  %v2621_v54 = vadd.f32 %v2590_v51, %v2518_v48  ;;  %v1833_v55 = vpop.f32.mrb[19].mxu0 }
 0x156   : > { %2048 = vst.msk [vmem:[%s3226_s19 + $0x68] sm:$0xff] %vm676_vm0, %v2016_v49  ;;  %v1948_v56 = vadd.f32 %v2620_v50, %v3209_v10  ;;  %v2622_v57 = vadd.f32 %v1833_v55, %v1127_v52 }
 0x157   : > { %v1989_v58 = vadd.f32 %v3214_v15, %v1950_v53  ;;  %v1951_v59 = vadd.f32 %v2621_v54, %v3209_v10 }
 0x158   : > { %v1987_v60 = vadd.f32 %v3214_v15, %v1948_v56  ;;  %v1949_v61 = vadd.f32 %v2622_v57, %v3209_v10 }
 0x159   : > { %v2021_v62 = vmax.f32 %v1989_v58, 0.0  ;;  %v1990_v63 = vadd.f32 %v3214_v15, %v1951_v59 }
 0x15a   : > { %v2521_v0 = vpop.f32.mrb[20].mxu1  ;;  %v2019_v1 = vmax.f32 %v1987_v60, 0.0  ;;  %v1988_v2 = vadd.f32 %v3214_v15, %v1949_v61  ;;  %v2593_v3 = vpop.f32.mrb[20].mxu0 }
 0x15b   : > { %v1140_v4 = vpop.f32.mrb[21].mxu1  ;;  %2053 = vst.msk [vmem:[%s3226_s19 + $0x90] sm:$0xff] %vm676_vm0, %v2021_v62  ;;  %v2022_v5 = vmax.f32 %v1990_v63, 0.0  ;;  %v2623_v6 = vadd.f32 %v2593_v3, %v2521_v0  ;;  %v1846_v7 = vpop.f32.mrb[21].mxu0 }
 0x15c   : > { %v2522_v8 = vpop.f32.mrb[22].mxu1  ;;  %2051 = vst.msk [vmem:[%s3226_s19 + $0x80] sm:$0xff] %vm676_vm0, %v2019_v1  ;;  %v2020_v9 = vmax.f32 %v1988_v2, 0.0  ;;  %v2624_v11 = vadd.f32 %v1846_v7, %v1140_v4  ;;  %v2594_v12 = vpop.f32.mrb[22].mxu0 }
 0x15d   : > { %v1143_v13 = vpop.f32.mrb[23].mxu1  ;;  %2054 = vst.msk [vmem:[%s3226_s19 + $0x98] sm:$0xff] %vm676_vm0, %v2022_v5  ;;  %v1954_v14 = vadd.f32 %v2623_v6, %v3209_v10  ;;  %v2625_v16 = vadd.f32 %v2594_v12, %v2522_v8  ;;  %v1849_v17 = vpop.f32.mrb[23].mxu0 }
 0x15e   : > { %2052 = vst.msk [vmem:[%s3226_s19 + $0x88] sm:$0xff] %vm676_vm0, %v2020_v9  ;;  %v1952_v18 = vadd.f32 %v2624_v11, %v3209_v10  ;;  %v2626_v19 = vadd.f32 %v1849_v17, %v1143_v13 }
 0x15f   : > { %v1993_v20 = vadd.f32 %v3214_v15, %v1954_v14  ;;  %v1955_v21 = vadd.f32 %v2625_v16, %v3209_v10 }
 0x160   : > { %v1991_v22 = vadd.f32 %v3214_v15, %v1952_v18  ;;  %v1953_v23 = vadd.f32 %v2626_v19, %v3209_v10 }
 0x161   : > { %v2025_v24 = vmax.f32 %v1993_v20, 0.0  ;;  %v1994_v25 = vadd.f32 %v3214_v15, %v1955_v21 }
 0x162   : > { %v2525_v26 = vpop.f32.mrb[24].mxu1  ;;  %v2023_v27 = vmax.f32 %v1991_v22, 0.0  ;;  %v1992_v28 = vadd.f32 %v3214_v15, %v1953_v23  ;;  %v2597_v29 = vpop.f32.mrb[24].mxu0 }
 0x163   : > { %v1156_v30 = vpop.f32.mrb[25].mxu1  ;;  %2057 = vst.msk [vmem:[%s3226_s19 + $0xb0] sm:$0xff] %vm676_vm0, %v2025_v24  ;;  %v2026_v31 = vmax.f32 %v1994_v25, 0.0  ;;  %v2627_v32 = vadd.f32 %v2597_v29, %v2525_v26  ;;  %v1862_v33 = vpop.f32.mrb[25].mxu0 }
 0x164   : > { %v2526_v34 = vpop.f32.mrb[26].mxu1  ;;  %2055 = vst.msk [vmem:[%s3226_s19 + $0xa0] sm:$0xff] %vm676_vm0, %v2023_v27  ;;  %v2024_v35 = vmax.f32 %v1992_v28, 0.0  ;;  %v2628_v36 = vadd.f32 %v1862_v33, %v1156_v30  ;;  %v2598_v37 = vpop.f32.mrb[26].mxu0 }
 0x165   : > { %v1159_v38 = vpop.f32.mrb[27].mxu1  ;;  %2058 = vst.msk [vmem:[%s3226_s19 + $0xb8] sm:$0xff] %vm676_vm0, %v2026_v31  ;;  %v1958_v39 = vadd.f32 %v2627_v32, %v3209_v10  ;;  %v2629_v40 = vadd.f32 %v2598_v37, %v2526_v34  ;;  %v1865_v41 = vpop.f32.mrb[27].mxu0 }
 0x166   : > { %2056 = vst.msk [vmem:[%s3226_s19 + $0xa8] sm:$0xff] %vm676_vm0, %v2024_v35  ;;  %v1956_v42 = vadd.f32 %v2628_v36, %v3209_v10  ;;  %v2630_v43 = vadd.f32 %v1865_v41, %v1159_v38 }
 0x167   : > { %v1997_v44 = vadd.f32 %v3214_v15, %v1958_v39  ;;  %v1959_v45 = vadd.f32 %v2629_v40, %v3209_v10 }
 0x168   : > { %v1995_v46 = vadd.f32 %v3214_v15, %v1956_v42  ;;  %v1957_v47 = vadd.f32 %v2630_v43, %v3209_v10 }
 0x169   : > { %v2029_v48 = vmax.f32 %v1997_v44, 0.0  ;;  %v1998_v49 = vadd.f32 %v3214_v15, %v1959_v45 }
 0x16a   : > { %v2529_v50 = vpop.f32.mrb[28].mxu1  ;;  %v2027_v51 = vmax.f32 %v1995_v46, 0.0  ;;  %v1996_v52 = vadd.f32 %v3214_v15, %v1957_v47  ;;  %v2601_v53 = vpop.f32.mrb[28].mxu0 }
 0x16b   : > { %v1172_v54 = vpop.f32.mrb[29].mxu1  ;;  %2061 = vst.msk [vmem:[%s3226_s19 + $0xd0] sm:$0xff] %vm676_vm0, %v2029_v48  ;;  %v2030_v55 = vmax.f32 %v1998_v49, 0.0  ;;  %v2631_v56 = vadd.f32 %v2601_v53, %v2529_v50  ;;  %v1878_v57 = vpop.f32.mrb[29].mxu0 }
 0x16c   : > { %v2530_v58 = vpop.f32.mrb[30].mxu1  ;;  %2059 = vst.msk [vmem:[%s3226_s19 + $0xc0] sm:$0xff] %vm676_vm0, %v2027_v51  ;;  %v2028_v59 = vmax.f32 %v1996_v52, 0.0  ;;  %v2632_v60 = vadd.f32 %v1878_v57, %v1172_v54  ;;  %v2602_v61 = vpop.f32.mrb[30].mxu0 }
 0x16d   : > { %v1175_v62 = vpop.f32.mrb[31].mxu1  ;;  %2062 = vst.msk [vmem:[%s3226_s19 + $0xd8] sm:$0xff] %vm676_vm0, %v2030_v55  ;;  %v1962_v63 = vadd.f32 %v2631_v56, %v3209_v10  ;;  %v2633_v0 = vadd.f32 %v2602_v61, %v2530_v58  ;;  %v1881_v1 = vpop.f32.mrb[31].mxu0 }
 0x16e   : > { %2060 = vst.msk [vmem:[%s3226_s19 + $0xc8] sm:$0xff] %vm676_vm0, %v2028_v59  ;;  %v1960_v2 = vadd.f32 %v2632_v60, %v3209_v10  ;;  %v2634_v3 = vadd.f32 %v1881_v1, %v1175_v62 }
 0x16f   : > { %v2001_v4 = vadd.f32 %v3214_v15, %v1962_v63  ;;  %v1963_v5 = vadd.f32 %v2633_v0, %v3209_v10 }
 0x170   : > { %v1999_v6 = vadd.f32 %v3214_v15, %v1960_v2  ;;  %v1961_v7 = vadd.f32 %v2634_v3, %v3209_v10 }
 0x171   : > { %v2033_v8 = vmax.f32 %v2001_v4, 0.0  ;;  %v2002_v9 = vadd.f32 %v3214_v15, %v1963_v5 }
 0x172   : > { %v2031_v11 = vmax.f32 %v1999_v6, 0.0  ;;  %v2000_v12 = vadd.f32 %v3214_v15, %v1961_v7 }
 0x173   : > { %2065 = vst.msk [vmem:[%s3226_s19 + $0xf0] sm:$0xff] %vm676_vm0, %v2033_v8  ;;  %v2034_v13 = vmax.f32 %v2002_v9, 0.0 }
 0x174   : > { %2063 = vst.msk [vmem:[%s3226_s19 + $0xe0] sm:$0xff] %vm676_vm0, %v2031_v11  ;;  %v2032_v10 = vmax.f32 %v2000_v12, 0.0 }
 0x175   : > { %2066 = vst.msk [vmem:[%s3226_s19 + $0xf8] sm:$0xff] %vm676_vm0, %v2034_v13 }
 0x176   : > { %2064 = vst.msk [vmem:[%s3226_s19 + $0xe8] sm:$0xff] %vm676_vm0, %v2032_v10 }
 0x177   : > { %2841 = shalt.err (!%p2838_p5)
}
 0x178   : > { %s2842_s30 = scalar_lea.hbm %s3347_s11, 4096  ;;  %s2846_s29 = scalar_lea.hbm %s3415_s10, 8192 }
 0x179   : > { %p2843_p6 = scmp.ne.s32.totalorder %s3347_s11, %s2842_s30  ;;  %p2847_p10 = scmp.lt.u32.totalorder %s3347_s11, %s3415_s10 }
 0x17a   : > { %p2848_p11 = scmp.lt.u32.totalorder %s2846_s29, %s2842_s30  ;;  %p2850_p13 = scmp.lt.u32.totalorder %s2842_s30, %s3347_s11 }
 0x17b   : > { %p2844_p7 = pnand %p2843_p6, %p3006_p4 }
 0x17c   : > { %p2849_p12 = por %p2848_p11, %p2847_p10 }
 0x17d   : > { %p2845_p9 = pneg %p2844_p7 }
 0x17e   : > { %p2851_p0 = por %p2850_p13, %p2849_p12 }
 0x180   : > { %p2852_p1 = pnand %p2851_p0, %p2845_p9 }
 0x182   : > { %2855 = shalt.err (!%p2852_p1)
}
 0x183   : > { %s2909_s22 = smov 128   ;;  %s2910_s20 = smov 8  }
 0x184   : > { %2699 = dma.vmem_to_hbm [thread:$0]  (%p3006_p4), %s3349_s28, 4096, %s3347_s11, %s3359_s16, %s2909_s22, %s2909_s22, %s2910_s20  }
 0x185 PF: > { %p2705_p2 = scmp.ge.s32.totalorder %s2906_s18, 2  ;;  %s2098_s27 = sand.u32 1, %s2886_s13  }
 0x186   : > { %s2099_s30 = scalar_lea.sflag [#allocation3], %s2098_s27 }
 0x187   : > { %p2702_p3 = pnand %p2705_p2, %p3013_p8 }
 0x189   : > { %2881 = dma.done.wait (!%p2702_p3), %s2099_s30, 4096  }
 0x18a   : > { %2883 = vsyncadd (!%p2702_p3), %s2099_s30, 4294963200  ;;  %s23_s18 = sadd.s32 1, %s2906_s18   ;;  %s3420_s13 = smov %s2890_s14 }
 0x18b   : > { %p20_p5 = scmp.ge.s32.totalorder %s23_s18, 4   ;;  %s3421_s14 = smov %s2894_s15 }
 0x18c   : > { %s3422_s15 = smov %s3019_s26  ;;  %s3423_s16 = smov %s2902_s17 }
 0x18d   : > { %s3424_s17 = smov %s3426_s21  ;;  %22 = sbr.rel (!%p20_p5) target bundleno = 6 (0x6), region = 107 }
 0x194   :  { %2104 = vsyncpa [#allocation3], 1 }
 0x195   :  { %2106 = vsyncpa [#allocation3 + $0x1], 1 }

</bundles_post_ra>
